<compile_context>
chip_gen: v7x
topology: tpu7x:2x2x1
jax: 0.10.0
libtpu: 0.0.40
codegen_flags: <defaults>
</compile_context>

<pallas_src>
import functools

import jax
import jax.numpy as jnp
from jax.experimental import pallas as pl
from jax.experimental.pallas import tpu as pltpu

# ----------------------------- configuration -----------------------------
B = 2            # batch
S = 16           # sequence length
D = 128          # d_model
H = 4            # attention heads
DH = D // H      # head dim
DFF = 256        # FFN hidden dim
NLAYERS = 2      # encoder layers
VOCAB = 100
TYPE_VOCAB = 2
MAXPOS = 64
NUM_CLASSES = 8
CLS_PAD = 128    # lane-dense classifier width (sliced to NUM_CLASSES outside)
EPS = 1e-12
NEG_INF = -1e9

# Batch elements processed per grid step (row-folded into the matmuls).
# Single-TC chips (v5e / v6e): fold everything (BATCH_BLOCK = B).
# v7x (2 TensorCores): set BATCH_BLOCK = B // 2 to engage both cores.
BATCH_BLOCK = B


# ------------------------------- kernel helpers ---------------------------
def _gelu(x):
    # TODO(synk): tanh-approximate GELU; HF BERT default is exact erf GELU.
    c = jnp.float32(0.7978845608028654)  # sqrt(2/pi)
    return 0.5 * x * (1.0 + jnp.tanh(c * (x + 0.044715 * x * x * x)))


def _layernorm(x, g, b, eps):
    mu = jnp.mean(x, axis=-1, keepdims=True)
    var = jnp.mean(jnp.square(x - mu), axis=-1, keepdims=True)
    return (x - mu) * jax.lax.rsqrt(var + eps) * g + b


def _mm(x, w):
    # bf16 MXU operands, f32 accumulation.
    return jnp.dot(x.astype(jnp.bfloat16), w, preferred_element_type=jnp.float32)


# ------------------------------- fused kernel -----------------------------
def _bert_fused_kernel(emb_ref, mask_ref,
                       embg_ref, embb_ref,
                       wqkv_ref, bqkv_ref, wo_ref, bo_ref,
                       ln1g_ref, ln1b_ref,
                       w1_ref, b1_ref, w2_ref, b2_ref,
                       ln2g_ref, ln2b_ref,
                       pw_ref, pb_ref,
                       out_ref,
                       h_sc,
                       *, batch_block, seq, nheads, dh, nlayers, eps,
                       is_causal):
    """Grid = (batch_blocks, nlayers).  h_sc carries (R, D) f32 across layers."""
    l = pl.program_id(1)
    dmod = h_sc.shape[-1]

    # ---- layer 0: embedding LayerNorm (residual-free, f32 math) ----
    @pl.when(l == 0)
    def _():
        h_sc[...] = _layernorm(emb_ref[...], embg_ref[...], embb_ref[...], eps)

    h = h_sc[...]                                            # (R, D) f32

    # ----- fused QKV projection: one (R, D) @ (D, 3D) matmul -----
    # (1/sqrt(DH) scale already folded into the Q columns of wqkv/bqkv.)
    qkv = _mm(h, wqkv_ref[0]) + bqkv_ref[0]                  # (R, 3D) f32
    q = qkv[:, 0:dmod].astype(jnp.bfloat16)                  # cast once per layer
    k = qkv[:, dmod:2 * dmod].astype(jnp.bfloat16)
    v = qkv[:, 2 * dmod:3 * dmod].astype(jnp.bfloat16)

    if is_causal:
        qi = jax.lax.broadcasted_iota(jnp.int32, (seq, seq), 0)
        ki = jax.lax.broadcasted_iota(jnp.int32, (seq, seq), 1)
        causal_bias = jnp.where(qi >= ki, 0.0, NEG_INF)      # (S, S)

    # ----- per-batch attention; head outputs concatenated lane-dense -----
    ctx_rows = []
    for b in range(batch_block):
        r0 = b * seq
        bias = jnp.where(mask_ref[b] > 0.0, 0.0, NEG_INF)    # (1, S) from raw mask
        if is_causal:
            bias = bias + causal_bias                        # (S, S)
        q_b = q[r0:r0 + seq, :]
        k_b = k[r0:r0 + seq, :]
        v_b = v[r0:r0 + seq, :]
        heads = []
        for hd in range(nheads):
            lo = hd * dh
            s = jax.lax.dot_general(
                q_b[:, lo:lo + dh], k_b[:, lo:lo + dh],
                (((1,), (1,)), ((), ())),
                preferred_element_type=jnp.float32) + bias   # (S, S)
            s = s - jnp.max(s, axis=-1, keepdims=True)
            p = jnp.exp(s)
            p = p * pl.reciprocal(jnp.sum(p, axis=-1, keepdims=True),
                                  approx=True)
            heads.append(jnp.dot(p.astype(jnp.bfloat16), v_b[:, lo:lo + dh],
                                 preferred_element_type=jnp.float32))
        ctx_rows.append(jnp.concatenate(heads, axis=-1))     # (S, D)
    ctx = jnp.concatenate(ctx_rows, axis=0)                  # (R, D)

    # ----- single K=128 output projection over the whole batch block -----
    attn = _mm(ctx, wo_ref[0]) + bo_ref[0]                   # (R, D)
    h = _layernorm(attn + h, ln1g_ref[0], ln1b_ref[0], eps)

    # ----- feed-forward -----
    f = _gelu(_mm(h, w1_ref[0]) + b1_ref[0])                 # (R, DFF)
    f = _mm(f, w2_ref[0]) + b2_ref[0]                        # (R, D)
    h = _layernorm(f + h, ln2g_ref[0], ln2b_ref[0], eps)
    h_sc[...] = h

    # ---- last layer: classifier on the [CLS] rows, lane-dense output ----
    @pl.when(l == nlayers - 1)
    def _():
        cls = jnp.concatenate(
            [h[b * seq:b * seq + 1, :] for b in range(batch_block)], axis=0)
        logits = _mm(cls, pw_ref[...]) + pb_ref[...]         # (BB, CLS_PAD)
        out_ref[...] = logits.astype(out_ref.dtype)


# ----------------------------- parameters ---------------------------------
def init_params(key):
    keys = iter(jax.random.split(key, 16))

    def nrm(shape, scale=0.02):
        return scale * jax.random.normal(next(keys), shape, jnp.float32)

    # Fold the 1/sqrt(DH) attention scale into the Q projection (zero runtime
    # cost).  A non-zero Q bias would be scaled identically.
    att_scale = 1.0 / float(DH) ** 0.5
    wqkv = nrm((NLAYERS, D, 3 * D))
    wqkv = wqkv.at[:, :, :D].multiply(att_scale)
    bqkv = jnp.zeros((NLAYERS, 1, 3 * D), jnp.float32)
    bqkv = bqkv.at[:, :, :D].multiply(att_scale)

    proj_w = jnp.zeros((D, CLS_PAD), jnp.float32)
    proj_w = proj_w.at[:, :NUM_CLASSES].set(nrm((D, NUM_CLASSES)))

    return {
        "word_emb": nrm((VOCAB, D)),
        "type_emb": nrm((TYPE_VOCAB, D)),
        "pos_emb": nrm((MAXPOS, D)),
        "emb_ln_g": jnp.ones((1, D), jnp.float32),
        "emb_ln_b": jnp.zeros((1, D), jnp.float32),
        # stacked per-layer weights; matmul weights bf16, bias/LN f32
        "wqkv": wqkv.astype(jnp.bfloat16),
        "bqkv": bqkv,
        "wo": nrm((NLAYERS, D, D)).astype(jnp.bfloat16),
        "bo": jnp.zeros((NLAYERS, 1, D), jnp.float32),
        "ln1_g": jnp.ones((NLAYERS, 1, D), jnp.float32),
        "ln1_b": jnp.zeros((NLAYERS, 1, D), jnp.float32),
        "w1": nrm((NLAYERS, D, DFF)).astype(jnp.bfloat16),
        "b1": jnp.zeros((NLAYERS, 1, DFF), jnp.float32),
        "w2": nrm((NLAYERS, DFF, D)).astype(jnp.bfloat16),
        "b2": jnp.zeros((NLAYERS, 1, D), jnp.float32),
        "ln2_g": jnp.ones((NLAYERS, 1, D), jnp.float32),
        "ln2_b": jnp.zeros((NLAYERS, 1, D), jnp.float32),
        "proj_w": proj_w.astype(jnp.bfloat16),
        "proj_b": jnp.zeros((1, CLS_PAD), jnp.float32),
    }


# ------------------------------ forward -----------------------------------
def bert_for_sequence_classification(params, input_ids, token_type_ids,
                                     attn_mask=None, is_causal=False):
    Bb, Ss = input_ids.shape
    assert Bb % BATCH_BLOCK == 0
    n_bblocks = Bb // BATCH_BLOCK
    R = BATCH_BLOCK * Ss                                      # folded row count

    # Embedding gathers are glue in plain JAX; everything else is one kernel.
    emb = (params["word_emb"][input_ids]
           + params["type_emb"][token_type_ids]
           + params["pos_emb"][:Ss][None, :, :]).astype(jnp.float32)
    emb = emb.reshape(Bb * Ss, D)                             # (B*S, D) row slab

    if attn_mask is None:
        mask = jnp.ones((Bb, 1, Ss), jnp.float32)
    else:
        mask = attn_mask.reshape(Bb, 1, Ss).astype(jnp.float32)

    kernel = functools.partial(
        _bert_fused_kernel, batch_block=BATCH_BLOCK, seq=Ss, nheads=H, dh=DH,
        nlayers=NLAYERS, eps=EPS, is_causal=is_causal)

    const2 = lambda b, l: (0, 0)
    per_layer3 = lambda b, l: (l, 0, 0)

    # NOTE: constant-index blocks (emb LN, proj) could use
    # pipeline_mode=pl.Buffered(1) to avoid a dead second buffer; negligible
    # at this size.  Per-layer weight blocks keep the default double-buffering
    # so the next layer's weight DMA overlaps the current layer's compute.
    out = pl.pallas_call(
        kernel,
        out_shape=jax.ShapeDtypeStruct((Bb, CLS_PAD), jnp.float32),
        grid=(n_bblocks, NLAYERS),
        in_specs=[
            pl.BlockSpec((R, D), lambda b, l: (b, 0)),                # embeddings
            pl.BlockSpec((BATCH_BLOCK, 1, Ss), lambda b, l: (b, 0, 0)),  # raw mask
            pl.BlockSpec((1, D), const2),                             # emb LN gamma
            pl.BlockSpec((1, D), const2),                             # emb LN beta
            pl.BlockSpec((1, D, 3 * D), per_layer3),                  # wqkv
            pl.BlockSpec((1, 1, 3 * D), per_layer3),                  # bqkv
            pl.BlockSpec((1, D, D), per_layer3),                      # wo
            pl.BlockSpec((1, 1, D), per_layer3),                      # bo
            pl.BlockSpec((1, 1, D), per_layer3),                      # ln1 gamma
            pl.BlockSpec((1, 1, D), per_layer3),                      # ln1 beta
            pl.BlockSpec((1, D, DFF), per_layer3),                    # w1
            pl.BlockSpec((1, 1, DFF), per_layer3),                    # b1
            pl.BlockSpec((1, DFF, D), per_layer3),                    # w2
            pl.BlockSpec((1, 1, D), per_layer3),                      # b2
            pl.BlockSpec((1, 1, D), per_layer3),                      # ln2 gamma
            pl.BlockSpec((1, 1, D), per_layer3),                      # ln2 beta
            pl.BlockSpec((D, CLS_PAD), const2),                       # proj_w (pad)
            pl.BlockSpec((1, CLS_PAD), const2),                       # proj_b (pad)
        ],
        out_specs=pl.BlockSpec((BATCH_BLOCK, CLS_PAD), lambda b, l: (b, 0)),
        scratch_shapes=[pltpu.VMEM((R, D), jnp.float32)],             # resident act
        compiler_params=pltpu.CompilerParams(
            dimension_semantics=("parallel", "arbitrary")),
    )(emb, mask,
      params["emb_ln_g"], params["emb_ln_b"],
      params["wqkv"], params["bqkv"], params["wo"], params["bo"],
      params["ln1_g"], params["ln1_b"],
      params["w1"], params["b1"], params["w2"], params["b2"],
      params["ln2_g"], params["ln2_b"],
      params["proj_w"], params["proj_b"])

    # spec: self.proj(final_hiddens[:, 0, :]) -> (B, num_classes)
    return out[:, :NUM_CLASSES]


# -------------------------------- main -------------------------------------
if __name__ == "__main__":
    key = jax.random.PRNGKey(0)
    pkey, ikey, tkey = jax.random.split(key, 3)
    params = init_params(pkey)

    input_ids = jax.random.randint(ikey, (B, S), 0, VOCAB, dtype=jnp.int32)
    token_type_ids = jax.random.randint(tkey, (B, S), 0, TYPE_VOCAB,
                                        dtype=jnp.int32)
    attn_mask = jnp.ones((B, S), jnp.int32)

    logits = bert_for_sequence_classification(params, input_ids,
                                              token_type_ids,
                                              attn_mask=attn_mask,
                                              is_causal=False)
    jax.block_until_ready(logits)
    assert logits.shape == (B, NUM_CLASSES)
    assert logits.dtype == jnp.float32
    print("KERNEL_OK")
</pallas_src>

<mosaic_0001>
module attributes {stable_mosaic.version = 11 : i64} {
  func.func @_bert_fused_kernel(%arg0: i32, %arg1: i32, %arg2: memref<32x128xf32, #tpu.memory_space<vmem>>, %arg3: memref<2x1x16xf32, #tpu.memory_space<vmem>>, %arg4: memref<1x128xf32, #tpu.memory_space<vmem>>, %arg5: memref<1x128xf32, #tpu.memory_space<vmem>>, %arg6: memref<1x128x384xbf16, #tpu.memory_space<vmem>>, %arg7: memref<1x1x384xf32, #tpu.memory_space<vmem>>, %arg8: memref<1x128x128xbf16, #tpu.memory_space<vmem>>, %arg9: memref<1x1x128xf32, #tpu.memory_space<vmem>>, %arg10: memref<1x1x128xf32, #tpu.memory_space<vmem>>, %arg11: memref<1x1x128xf32, #tpu.memory_space<vmem>>, %arg12: memref<1x128x256xbf16, #tpu.memory_space<vmem>>, %arg13: memref<1x1x256xf32, #tpu.memory_space<vmem>>, %arg14: memref<1x256x128xbf16, #tpu.memory_space<vmem>>, %arg15: memref<1x1x128xf32, #tpu.memory_space<vmem>>, %arg16: memref<1x1x128xf32, #tpu.memory_space<vmem>>, %arg17: memref<1x1x128xf32, #tpu.memory_space<vmem>>, %arg18: memref<128x128xbf16, #tpu.memory_space<vmem>>, %arg19: memref<1x128xf32, #tpu.memory_space<vmem>>, %arg20: memref<2x128xf32, #tpu.memory_space<vmem>>, %arg21: memref<32x128xf32, #tpu.memory_space<vmem>>) attributes {dimension_semantics = [#tpu.dimension_semantics<parallel>, #tpu.dimension_semantics<arbitrary>], iteration_bounds = array<i64: 1, 2>, scalar_prefetch = 0 : i64, scratch_operands = 1 : i64, tpu.core_type = #tpu.core_type<tc>, window_params = [{transform_indices = @transform_0, window_bounds = array<i64: 32, 128>}, {transform_indices = @transform_1, window_bounds = array<i64: 2, 1, 16>}, {pipeline_mode = #tpu.pipeline_mode<synchronous>, transform_indices = @transform_2, window_bounds = array<i64: 1, 128>}, {pipeline_mode = #tpu.pipeline_mode<synchronous>, transform_indices = @transform_3, window_bounds = array<i64: 1, 128>}, {transform_indices = @transform_4, window_bounds = array<i64: 1, 128, 384>}, {transform_indices = @transform_5, window_bounds = array<i64: 1, 1, 384>}, {transform_indices = @transform_6, window_bounds = array<i64: 1, 128, 128>}, {transform_indices = @transform_7, window_bounds = array<i64: 1, 1, 128>}, {transform_indices = @transform_8, window_bounds = array<i64: 1, 1, 128>}, {transform_indices = @transform_9, window_bounds = array<i64: 1, 1, 128>}, {transform_indices = @transform_10, window_bounds = array<i64: 1, 128, 256>}, {transform_indices = @transform_11, window_bounds = array<i64: 1, 1, 256>}, {transform_indices = @transform_12, window_bounds = array<i64: 1, 256, 128>}, {transform_indices = @transform_13, window_bounds = array<i64: 1, 1, 128>}, {transform_indices = @transform_14, window_bounds = array<i64: 1, 1, 128>}, {transform_indices = @transform_15, window_bounds = array<i64: 1, 1, 128>}, {pipeline_mode = #tpu.pipeline_mode<synchronous>, transform_indices = @transform_16, window_bounds = array<i64: 128, 128>}, {pipeline_mode = #tpu.pipeline_mode<synchronous>, transform_indices = @transform_17, window_bounds = array<i64: 1, 128>}, {transform_indices = @transform_18, window_bounds = array<i64: 2, 128>}]} {
    %c0_i32 = arith.constant 0 : i32
    %0 = arith.cmpi eq, %arg1, %c0_i32 : i32
    %1 = arith.extui %0 : i1 to i32
    %c0_i32_0 = arith.constant 0 : i32
    %2 = arith.cmpi ne, %1, %c0_i32_0 : i32
    scf.if %2 {
      %c0_101 = arith.constant 0 : index
      %c0_102 = arith.constant 0 : index
      %280 = vector.load %arg2[%c0_101, %c0_102] : memref<32x128xf32, #tpu.memory_space<vmem>>, vector<32x128xf32>
      %c0_103 = arith.constant 0 : index
      %c0_104 = arith.constant 0 : index
      %281 = vector.load %arg4[%c0_103, %c0_104] : memref<1x128xf32, #tpu.memory_space<vmem>>, vector<1x128xf32>
      %c0_105 = arith.constant 0 : index
      %c0_106 = arith.constant 0 : index
      %282 = vector.load %arg5[%c0_105, %c0_106] : memref<1x128xf32, #tpu.memory_space<vmem>>, vector<1x128xf32>
      %cst_107 = arith.constant dense<0.000000e+00> : vector<32xf32>
      %283 = vector.multi_reduction <add>, %280, %cst_107 [1] : vector<32x128xf32> to vector<32xf32>
      %284 = vector.shape_cast %283 : vector<32xf32> to vector<32x1xf32>
      %cst_108 = arith.constant 1.280000e+02 : f32
      %285 = vector.broadcast %cst_108 : f32 to vector<32x1xf32>
      %286 = arith.divf %284, %285 : vector<32x1xf32>
      %287 = vector.broadcast %286 : vector<32x1xf32> to vector<32x128xf32>
      %288 = arith.subf %280, %287 : vector<32x128xf32>
      %289 = arith.mulf %288, %288 : vector<32x128xf32>
      %cst_109 = arith.constant dense<0.000000e+00> : vector<32xf32>
      %290 = vector.multi_reduction <add>, %289, %cst_109 [1] : vector<32x128xf32> to vector<32xf32>
      %291 = vector.shape_cast %290 : vector<32xf32> to vector<32x1xf32>
      %cst_110 = arith.constant 1.280000e+02 : f32
      %292 = vector.broadcast %cst_110 : f32 to vector<32x1xf32>
      %293 = arith.divf %291, %292 : vector<32x1xf32>
      %294 = vector.broadcast %286 : vector<32x1xf32> to vector<32x128xf32>
      %295 = arith.subf %280, %294 : vector<32x128xf32>
      %cst_111 = arith.constant 9.99999996E-13 : f32
      %296 = vector.broadcast %cst_111 : f32 to vector<32x1xf32>
      %297 = arith.addf %293, %296 : vector<32x1xf32>
      %298 = math.rsqrt %297 : vector<32x1xf32>
      %299 = vector.broadcast %298 : vector<32x1xf32> to vector<32x128xf32>
      %300 = arith.mulf %295, %299 : vector<32x128xf32>
      %301 = vector.broadcast %281 : vector<1x128xf32> to vector<32x128xf32>
      %302 = arith.mulf %300, %301 : vector<32x128xf32>
      %303 = vector.broadcast %282 : vector<1x128xf32> to vector<32x128xf32>
      %304 = arith.addf %302, %303 : vector<32x128xf32>
      %c0_112 = arith.constant 0 : index
      %c0_113 = arith.constant 0 : index
      %305 = vector.load %arg21[%c0_112, %c0_113] : memref<32x128xf32, #tpu.memory_space<vmem>>, vector<32x128xf32>
      tpu.vector_store %arg21[%c0_112, %c0_113], %304 {strides = array<i32>} : memref<32x128xf32, #tpu.memory_space<vmem>>, vector<32x128xf32>,
    } else {
    }
    %c0 = arith.constant 0 : index
    %c0_1 = arith.constant 0 : index
    %3 = vector.load %arg21[%c0, %c0_1] : memref<32x128xf32, #tpu.memory_space<vmem>>, vector<32x128xf32>
    %c0_2 = arith.constant 0 : index
    %c0_3 = arith.constant 0 : index
    %c0_4 = arith.constant 0 : index
    %4 = vector.load %arg6[%c0_2, %c0_3, %c0_4] : memref<1x128x384xbf16, #tpu.memory_space<vmem>>, vector<1x128x384xbf16>
    %5 = vector.shape_cast %4 : vector<1x128x384xbf16> to vector<128x384xbf16>
    %6 = arith.truncf %3 : vector<32x128xf32> to vector<32x128xbf16>
    %cst = arith.constant dense<0.000000e+00> : vector<32x384xf32>
    %7 = tpu.matmul %6, %5, %cst {dimension_numbers = #tpu.dot_dimension_numbers<[1], [0], [0], [1], [0, 0, 1, 1], [], []>} : vector<32x128xbf16>, vector<128x384xbf16>, vector<32x384xf32> -> vector<32x384xf32>
    %c0_5 = arith.constant 0 : index
    %c0_6 = arith.constant 0 : index
    %c0_7 = arith.constant 0 : index
    %8 = vector.load %arg7[%c0_5, %c0_6, %c0_7] : memref<1x1x384xf32, #tpu.memory_space<vmem>>, vector<1x1x384xf32>
    %9 = vector.shape_cast %8 : vector<1x1x384xf32> to vector<1x384xf32>
    %10 = vector.broadcast %9 : vector<1x384xf32> to vector<32x384xf32>
    %11 = arith.addf %7, %10 : vector<32x384xf32>
    %12 = vector.extract_strided_slice %11 {offsets = [0, 0], sizes = [32, 128], strides = [1, 1]} : vector<32x384xf32> to vector<32x128xf32>
    %13 = arith.truncf %12 : vector<32x128xf32> to vector<32x128xbf16>
    %14 = vector.extract_strided_slice %11 {offsets = [0, 128], sizes = [32, 128], strides = [1, 1]} : vector<32x384xf32> to vector<32x128xf32>
    %15 = arith.truncf %14 : vector<32x128xf32> to vector<32x128xbf16>
    %16 = vector.extract_strided_slice %11 {offsets = [0, 256], sizes = [32, 128], strides = [1, 1]} : vector<32x384xf32> to vector<32x128xf32>
    %17 = arith.truncf %16 : vector<32x128xf32> to vector<32x128xbf16>
    %c0_8 = arith.constant 0 : index
    %c0_9 = arith.constant 0 : index
    %c0_10 = arith.constant 0 : index
    %18 = vector.load %arg3[%c0_8, %c0_9, %c0_10] : memref<2x1x16xf32, #tpu.memory_space<vmem>>, vector<1x1x16xf32>
    %19 = vector.shape_cast %18 : vector<1x1x16xf32> to vector<1x16xf32>
    %cst_11 = arith.constant 0.000000e+00 : f32
    %20 = vector.broadcast %cst_11 : f32 to vector<1x16xf32>
    %21 = arith.cmpf ogt, %19, %20 : vector<1x16xf32>
    %cst_12 = arith.constant 0.000000e+00 : f32
    %cst_13 = arith.constant -1.000000e+09 : f32
    %22 = vector.broadcast %cst_12 : f32 to vector<1x16xf32>
    %23 = vector.broadcast %cst_13 : f32 to vector<1x16xf32>
    %24 = arith.select %21, %22, %23 : vector<1x16xi1>, vector<1x16xf32>
    %25 = vector.extract_strided_slice %13 {offsets = [0, 0], sizes = [16, 128], strides = [1, 1]} : vector<32x128xbf16> to vector<16x128xbf16>
    %26 = vector.extract_strided_slice %15 {offsets = [0, 0], sizes = [16, 128], strides = [1, 1]} : vector<32x128xbf16> to vector<16x128xbf16>
    %27 = vector.extract_strided_slice %17 {offsets = [0, 0], sizes = [16, 128], strides = [1, 1]} : vector<32x128xbf16> to vector<16x128xbf16>
    %28 = vector.extract_strided_slice %25 {offsets = [0, 0], sizes = [16, 32], strides = [1, 1]} : vector<16x128xbf16> to vector<16x32xbf16>
    %29 = vector.extract_strided_slice %26 {offsets = [0, 0], sizes = [16, 32], strides = [1, 1]} : vector<16x128xbf16> to vector<16x32xbf16>
    %cst_14 = arith.constant dense<0.000000e+00> : vector<16x16xf32>
    %30 = tpu.matmul %28, %29, %cst_14 {dimension_numbers = #tpu.dot_dimension_numbers<[1], [1], [0], [0], [0, 0, 1, 0], [], []>} : vector<16x32xbf16>, vector<16x32xbf16>, vector<16x16xf32> -> vector<16x16xf32>
    %31 = vector.broadcast %24 : vector<1x16xf32> to vector<16x16xf32>
    %32 = arith.addf %30, %31 : vector<16x16xf32>
    %cst_15 = arith.constant dense<0xFF800000> : vector<16xf32>
    %33 = vector.multi_reduction <maximumf>, %32, %cst_15 [1] : vector<16x16xf32> to vector<16xf32>
    %34 = vector.shape_cast %33 : vector<16xf32> to vector<16x1xf32>
    %35 = vector.broadcast %34 : vector<16x1xf32> to vector<16x16xf32>
    %36 = arith.subf %32, %35 : vector<16x16xf32>
    %37 = math.exp %36 : vector<16x16xf32>
    %cst_16 = arith.constant dense<0.000000e+00> : vector<16xf32>
    %38 = vector.multi_reduction <add>, %37, %cst_16 [1] : vector<16x16xf32> to vector<16xf32>
    %39 = vector.shape_cast %38 : vector<16xf32> to vector<16x1xf32>
    %40 = tpu.reciprocal %39 {approx = true} : vector<16x1xf32> -> vector<16x1xf32>
    %41 = vector.broadcast %40 : vector<16x1xf32> to vector<16x16xf32>
    %42 = arith.mulf %37, %41 : vector<16x16xf32>
    %43 = arith.truncf %42 : vector<16x16xf32> to vector<16x16xbf16>
    %44 = vector.extract_strided_slice %27 {offsets = [0, 0], sizes = [16, 32], strides = [1, 1]} : vector<16x128xbf16> to vector<16x32xbf16>
    %cst_17 = arith.constant dense<0.000000e+00> : vector<16x32xf32>
    %45 = tpu.matmul %43, %44, %cst_17 {dimension_numbers = #tpu.dot_dimension_numbers<[1], [0], [0], [1], [0, 0, 1, 1], [], []>} : vector<16x16xbf16>, vector<16x32xbf16>, vector<16x32xf32> -> vector<16x32xf32>
    %46 = vector.extract_strided_slice %25 {offsets = [0, 32], sizes = [16, 32], strides = [1, 1]} : vector<16x128xbf16> to vector<16x32xbf16>
    %47 = vector.extract_strided_slice %26 {offsets = [0, 32], sizes = [16, 32], strides = [1, 1]} : vector<16x128xbf16> to vector<16x32xbf16>
    %cst_18 = arith.constant dense<0.000000e+00> : vector<16x16xf32>
    %48 = tpu.matmul %46, %47, %cst_18 {dimension_numbers = #tpu.dot_dimension_numbers<[1], [1], [0], [0], [0, 0, 1, 0], [], []>} : vector<16x32xbf16>, vector<16x32xbf16>, vector<16x16xf32> -> vector<16x16xf32>
    %49 = vector.broadcast %24 : vector<1x16xf32> to vector<16x16xf32>
    %50 = arith.addf %48, %49 : vector<16x16xf32>
    %cst_19 = arith.constant dense<0xFF800000> : vector<16xf32>
    %51 = vector.multi_reduction <maximumf>, %50, %cst_19 [1] : vector<16x16xf32> to vector<16xf32>
    %52 = vector.shape_cast %51 : vector<16xf32> to vector<16x1xf32>
    %53 = vector.broadcast %52 : vector<16x1xf32> to vector<16x16xf32>
    %54 = arith.subf %50, %53 : vector<16x16xf32>
    %55 = math.exp %54 : vector<16x16xf32>
    %cst_20 = arith.constant dense<0.000000e+00> : vector<16xf32>
    %56 = vector.multi_reduction <add>, %55, %cst_20 [1] : vector<16x16xf32> to vector<16xf32>
    %57 = vector.shape_cast %56 : vector<16xf32> to vector<16x1xf32>
    %58 = tpu.reciprocal %57 {approx = true} : vector<16x1xf32> -> vector<16x1xf32>
    %59 = vector.broadcast %58 : vector<16x1xf32> to vector<16x16xf32>
    %60 = arith.mulf %55, %59 : vector<16x16xf32>
    %61 = arith.truncf %60 : vector<16x16xf32> to vector<16x16xbf16>
    %62 = vector.extract_strided_slice %27 {offsets = [0, 32], sizes = [16, 32], strides = [1, 1]} : vector<16x128xbf16> to vector<16x32xbf16>
    %cst_21 = arith.constant dense<0.000000e+00> : vector<16x32xf32>
    %63 = tpu.matmul %61, %62, %cst_21 {dimension_numbers = #tpu.dot_dimension_numbers<[1], [0], [0], [1], [0, 0, 1, 1], [], []>} : vector<16x16xbf16>, vector<16x32xbf16>, vector<16x32xf32> -> vector<16x32xf32>
    %64 = vector.extract_strided_slice %25 {offsets = [0, 64], sizes = [16, 32], strides = [1, 1]} : vector<16x128xbf16> to vector<16x32xbf16>
    %65 = vector.extract_strided_slice %26 {offsets = [0, 64], sizes = [16, 32], strides = [1, 1]} : vector<16x128xbf16> to vector<16x32xbf16>
    %cst_22 = arith.constant dense<0.000000e+00> : vector<16x16xf32>
    %66 = tpu.matmul %64, %65, %cst_22 {dimension_numbers = #tpu.dot_dimension_numbers<[1], [1], [0], [0], [0, 0, 1, 0], [], []>} : vector<16x32xbf16>, vector<16x32xbf16>, vector<16x16xf32> -> vector<16x16xf32>
    %67 = vector.broadcast %24 : vector<1x16xf32> to vector<16x16xf32>
    %68 = arith.addf %66, %67 : vector<16x16xf32>
    %cst_23 = arith.constant dense<0xFF800000> : vector<16xf32>
    %69 = vector.multi_reduction <maximumf>, %68, %cst_23 [1] : vector<16x16xf32> to vector<16xf32>
    %70 = vector.shape_cast %69 : vector<16xf32> to vector<16x1xf32>
    %71 = vector.broadcast %70 : vector<16x1xf32> to vector<16x16xf32>
    %72 = arith.subf %68, %71 : vector<16x16xf32>
    %73 = math.exp %72 : vector<16x16xf32>
    %cst_24 = arith.constant dense<0.000000e+00> : vector<16xf32>
    %74 = vector.multi_reduction <add>, %73, %cst_24 [1] : vector<16x16xf32> to vector<16xf32>
    %75 = vector.shape_cast %74 : vector<16xf32> to vector<16x1xf32>
    %76 = tpu.reciprocal %75 {approx = true} : vector<16x1xf32> -> vector<16x1xf32>
    %77 = vector.broadcast %76 : vector<16x1xf32> to vector<16x16xf32>
    %78 = arith.mulf %73, %77 : vector<16x16xf32>
    %79 = arith.truncf %78 : vector<16x16xf32> to vector<16x16xbf16>
    %80 = vector.extract_strided_slice %27 {offsets = [0, 64], sizes = [16, 32], strides = [1, 1]} : vector<16x128xbf16> to vector<16x32xbf16>
    %cst_25 = arith.constant dense<0.000000e+00> : vector<16x32xf32>
    %81 = tpu.matmul %79, %80, %cst_25 {dimension_numbers = #tpu.dot_dimension_numbers<[1], [0], [0], [1], [0, 0, 1, 1], [], []>} : vector<16x16xbf16>, vector<16x32xbf16>, vector<16x32xf32> -> vector<16x32xf32>
    %82 = vector.extract_strided_slice %25 {offsets = [0, 96], sizes = [16, 32], strides = [1, 1]} : vector<16x128xbf16> to vector<16x32xbf16>
    %83 = vector.extract_strided_slice %26 {offsets = [0, 96], sizes = [16, 32], strides = [1, 1]} : vector<16x128xbf16> to vector<16x32xbf16>
    %cst_26 = arith.constant dense<0.000000e+00> : vector<16x16xf32>
    %84 = tpu.matmul %82, %83, %cst_26 {dimension_numbers = #tpu.dot_dimension_numbers<[1], [1], [0], [0], [0, 0, 1, 0], [], []>} : vector<16x32xbf16>, vector<16x32xbf16>, vector<16x16xf32> -> vector<16x16xf32>
    %85 = vector.broadcast %24 : vector<1x16xf32> to vector<16x16xf32>
    %86 = arith.addf %84, %85 : vector<16x16xf32>
    %cst_27 = arith.constant dense<0xFF800000> : vector<16xf32>
    %87 = vector.multi_reduction <maximumf>, %86, %cst_27 [1] : vector<16x16xf32> to vector<16xf32>
    %88 = vector.shape_cast %87 : vector<16xf32> to vector<16x1xf32>
    %89 = vector.broadcast %88 : vector<16x1xf32> to vector<16x16xf32>
    %90 = arith.subf %86, %89 : vector<16x16xf32>
    %91 = math.exp %90 : vector<16x16xf32>
    %cst_28 = arith.constant dense<0.000000e+00> : vector<16xf32>
    %92 = vector.multi_reduction <add>, %91, %cst_28 [1] : vector<16x16xf32> to vector<16xf32>
    %93 = vector.shape_cast %92 : vector<16xf32> to vector<16x1xf32>
    %94 = tpu.reciprocal %93 {approx = true} : vector<16x1xf32> -> vector<16x1xf32>
    %95 = vector.broadcast %94 : vector<16x1xf32> to vector<16x16xf32>
    %96 = arith.mulf %91, %95 : vector<16x16xf32>
    %97 = arith.truncf %96 : vector<16x16xf32> to vector<16x16xbf16>
    %98 = vector.extract_strided_slice %27 {offsets = [0, 96], sizes = [16, 32], strides = [1, 1]} : vector<16x128xbf16> to vector<16x32xbf16>
    %cst_29 = arith.constant dense<0.000000e+00> : vector<16x32xf32>
    %99 = tpu.matmul %97, %98, %cst_29 {dimension_numbers = #tpu.dot_dimension_numbers<[1], [0], [0], [1], [0, 0, 1, 1], [], []>} : vector<16x16xbf16>, vector<16x32xbf16>, vector<16x32xf32> -> vector<16x32xf32>
    %100 = tpu.concatenate %45, %63, %81, %99 in 1 : vector<16x32xf32>, vector<16x32xf32>, vector<16x32xf32>, vector<16x32xf32> -> vector<16x128xf32>
    %c1 = arith.constant 1 : index
    %c0_30 = arith.constant 0 : index
    %c0_31 = arith.constant 0 : index
    %101 = vector.load %arg3[%c1, %c0_30, %c0_31] : memref<2x1x16xf32, #tpu.memory_space<vmem>>, vector<1x1x16xf32>
    %102 = vector.shape_cast %101 : vector<1x1x16xf32> to vector<1x16xf32>
    %cst_32 = arith.constant 0.000000e+00 : f32
    %103 = vector.broadcast %cst_32 : f32 to vector<1x16xf32>
    %104 = arith.cmpf ogt, %102, %103 : vector<1x16xf32>
    %cst_33 = arith.constant 0.000000e+00 : f32
    %cst_34 = arith.constant -1.000000e+09 : f32
    %105 = vector.broadcast %cst_33 : f32 to vector<1x16xf32>
    %106 = vector.broadcast %cst_34 : f32 to vector<1x16xf32>
    %107 = arith.select %104, %105, %106 : vector<1x16xi1>, vector<1x16xf32>
    %108 = vector.extract_strided_slice %13 {offsets = [16, 0], sizes = [16, 128], strides = [1, 1]} : vector<32x128xbf16> to vector<16x128xbf16>
    %109 = vector.extract_strided_slice %15 {offsets = [16, 0], sizes = [16, 128], strides = [1, 1]} : vector<32x128xbf16> to vector<16x128xbf16>
    %110 = vector.extract_strided_slice %17 {offsets = [16, 0], sizes = [16, 128], strides = [1, 1]} : vector<32x128xbf16> to vector<16x128xbf16>
    %111 = vector.extract_strided_slice %108 {offsets = [0, 0], sizes = [16, 32], strides = [1, 1]} : vector<16x128xbf16> to vector<16x32xbf16>
    %112 = vector.extract_strided_slice %109 {offsets = [0, 0], sizes = [16, 32], strides = [1, 1]} : vector<16x128xbf16> to vector<16x32xbf16>
    %cst_35 = arith.constant dense<0.000000e+00> : vector<16x16xf32>
    %113 = tpu.matmul %111, %112, %cst_35 {dimension_numbers = #tpu.dot_dimension_numbers<[1], [1], [0], [0], [0, 0, 1, 0], [], []>} : vector<16x32xbf16>, vector<16x32xbf16>, vector<16x16xf32> -> vector<16x16xf32>
    %114 = vector.broadcast %107 : vector<1x16xf32> to vector<16x16xf32>
    %115 = arith.addf %113, %114 : vector<16x16xf32>
    %cst_36 = arith.constant dense<0xFF800000> : vector<16xf32>
    %116 = vector.multi_reduction <maximumf>, %115, %cst_36 [1] : vector<16x16xf32> to vector<16xf32>
    %117 = vector.shape_cast %116 : vector<16xf32> to vector<16x1xf32>
    %118 = vector.broadcast %117 : vector<16x1xf32> to vector<16x16xf32>
    %119 = arith.subf %115, %118 : vector<16x16xf32>
    %120 = math.exp %119 : vector<16x16xf32>
    %cst_37 = arith.constant dense<0.000000e+00> : vector<16xf32>
    %121 = vector.multi_reduction <add>, %120, %cst_37 [1] : vector<16x16xf32> to vector<16xf32>
    %122 = vector.shape_cast %121 : vector<16xf32> to vector<16x1xf32>
    %123 = tpu.reciprocal %122 {approx = true} : vector<16x1xf32> -> vector<16x1xf32>
    %124 = vector.broadcast %123 : vector<16x1xf32> to vector<16x16xf32>
    %125 = arith.mulf %120, %124 : vector<16x16xf32>
    %126 = arith.truncf %125 : vector<16x16xf32> to vector<16x16xbf16>
    %127 = vector.extract_strided_slice %110 {offsets = [0, 0], sizes = [16, 32], strides = [1, 1]} : vector<16x128xbf16> to vector<16x32xbf16>
    %cst_38 = arith.constant dense<0.000000e+00> : vector<16x32xf32>
    %128 = tpu.matmul %126, %127, %cst_38 {dimension_numbers = #tpu.dot_dimension_numbers<[1], [0], [0], [1], [0, 0, 1, 1], [], []>} : vector<16x16xbf16>, vector<16x32xbf16>, vector<16x32xf32> -> vector<16x32xf32>
    %129 = vector.extract_strided_slice %108 {offsets = [0, 32], sizes = [16, 32], strides = [1, 1]} : vector<16x128xbf16> to vector<16x32xbf16>
    %130 = vector.extract_strided_slice %109 {offsets = [0, 32], sizes = [16, 32], strides = [1, 1]} : vector<16x128xbf16> to vector<16x32xbf16>
    %cst_39 = arith.constant dense<0.000000e+00> : vector<16x16xf32>
    %131 = tpu.matmul %129, %130, %cst_39 {dimension_numbers = #tpu.dot_dimension_numbers<[1], [1], [0], [0], [0, 0, 1, 0], [], []>} : vector<16x32xbf16>, vector<16x32xbf16>, vector<16x16xf32> -> vector<16x16xf32>
    %132 = vector.broadcast %107 : vector<1x16xf32> to vector<16x16xf32>
    %133 = arith.addf %131, %132 : vector<16x16xf32>
    %cst_40 = arith.constant dense<0xFF800000> : vector<16xf32>
    %134 = vector.multi_reduction <maximumf>, %133, %cst_40 [1] : vector<16x16xf32> to vector<16xf32>
    %135 = vector.shape_cast %134 : vector<16xf32> to vector<16x1xf32>
    %136 = vector.broadcast %135 : vector<16x1xf32> to vector<16x16xf32>
    %137 = arith.subf %133, %136 : vector<16x16xf32>
    %138 = math.exp %137 : vector<16x16xf32>
    %cst_41 = arith.constant dense<0.000000e+00> : vector<16xf32>
    %139 = vector.multi_reduction <add>, %138, %cst_41 [1] : vector<16x16xf32> to vector<16xf32>
    %140 = vector.shape_cast %139 : vector<16xf32> to vector<16x1xf32>
    %141 = tpu.reciprocal %140 {approx = true} : vector<16x1xf32> -> vector<16x1xf32>
    %142 = vector.broadcast %141 : vector<16x1xf32> to vector<16x16xf32>
    %143 = arith.mulf %138, %142 : vector<16x16xf32>
    %144 = arith.truncf %143 : vector<16x16xf32> to vector<16x16xbf16>
    %145 = vector.extract_strided_slice %110 {offsets = [0, 32], sizes = [16, 32], strides = [1, 1]} : vector<16x128xbf16> to vector<16x32xbf16>
    %cst_42 = arith.constant dense<0.000000e+00> : vector<16x32xf32>
    %146 = tpu.matmul %144, %145, %cst_42 {dimension_numbers = #tpu.dot_dimension_numbers<[1], [0], [0], [1], [0, 0, 1, 1], [], []>} : vector<16x16xbf16>, vector<16x32xbf16>, vector<16x32xf32> -> vector<16x32xf32>
    %147 = vector.extract_strided_slice %108 {offsets = [0, 64], sizes = [16, 32], strides = [1, 1]} : vector<16x128xbf16> to vector<16x32xbf16>
    %148 = vector.extract_strided_slice %109 {offsets = [0, 64], sizes = [16, 32], strides = [1, 1]} : vector<16x128xbf16> to vector<16x32xbf16>
    %cst_43 = arith.constant dense<0.000000e+00> : vector<16x16xf32>
    %149 = tpu.matmul %147, %148, %cst_43 {dimension_numbers = #tpu.dot_dimension_numbers<[1], [1], [0], [0], [0, 0, 1, 0], [], []>} : vector<16x32xbf16>, vector<16x32xbf16>, vector<16x16xf32> -> vector<16x16xf32>
    %150 = vector.broadcast %107 : vector<1x16xf32> to vector<16x16xf32>
    %151 = arith.addf %149, %150 : vector<16x16xf32>
    %cst_44 = arith.constant dense<0xFF800000> : vector<16xf32>
    %152 = vector.multi_reduction <maximumf>, %151, %cst_44 [1] : vector<16x16xf32> to vector<16xf32>
    %153 = vector.shape_cast %152 : vector<16xf32> to vector<16x1xf32>
    %154 = vector.broadcast %153 : vector<16x1xf32> to vector<16x16xf32>
    %155 = arith.subf %151, %154 : vector<16x16xf32>
    %156 = math.exp %155 : vector<16x16xf32>
    %cst_45 = arith.constant dense<0.000000e+00> : vector<16xf32>
    %157 = vector.multi_reduction <add>, %156, %cst_45 [1] : vector<16x16xf32> to vector<16xf32>
    %158 = vector.shape_cast %157 : vector<16xf32> to vector<16x1xf32>
    %159 = tpu.reciprocal %158 {approx = true} : vector<16x1xf32> -> vector<16x1xf32>
    %160 = vector.broadcast %159 : vector<16x1xf32> to vector<16x16xf32>
    %161 = arith.mulf %156, %160 : vector<16x16xf32>
    %162 = arith.truncf %161 : vector<16x16xf32> to vector<16x16xbf16>
    %163 = vector.extract_strided_slice %110 {offsets = [0, 64], sizes = [16, 32], strides = [1, 1]} : vector<16x128xbf16> to vector<16x32xbf16>
    %cst_46 = arith.constant dense<0.000000e+00> : vector<16x32xf32>
    %164 = tpu.matmul %162, %163, %cst_46 {dimension_numbers = #tpu.dot_dimension_numbers<[1], [0], [0], [1], [0, 0, 1, 1], [], []>} : vector<16x16xbf16>, vector<16x32xbf16>, vector<16x32xf32> -> vector<16x32xf32>
    %165 = vector.extract_strided_slice %108 {offsets = [0, 96], sizes = [16, 32], strides = [1, 1]} : vector<16x128xbf16> to vector<16x32xbf16>
    %166 = vector.extract_strided_slice %109 {offsets = [0, 96], sizes = [16, 32], strides = [1, 1]} : vector<16x128xbf16> to vector<16x32xbf16>
    %cst_47 = arith.constant dense<0.000000e+00> : vector<16x16xf32>
    %167 = tpu.matmul %165, %166, %cst_47 {dimension_numbers = #tpu.dot_dimension_numbers<[1], [1], [0], [0], [0, 0, 1, 0], [], []>} : vector<16x32xbf16>, vector<16x32xbf16>, vector<16x16xf32> -> vector<16x16xf32>
    %168 = vector.broadcast %107 : vector<1x16xf32> to vector<16x16xf32>
    %169 = arith.addf %167, %168 : vector<16x16xf32>
    %cst_48 = arith.constant dense<0xFF800000> : vector<16xf32>
    %170 = vector.multi_reduction <maximumf>, %169, %cst_48 [1] : vector<16x16xf32> to vector<16xf32>
    %171 = vector.shape_cast %170 : vector<16xf32> to vector<16x1xf32>
    %172 = vector.broadcast %171 : vector<16x1xf32> to vector<16x16xf32>
    %173 = arith.subf %169, %172 : vector<16x16xf32>
    %174 = math.exp %173 : vector<16x16xf32>
    %cst_49 = arith.constant dense<0.000000e+00> : vector<16xf32>
    %175 = vector.multi_reduction <add>, %174, %cst_49 [1] : vector<16x16xf32> to vector<16xf32>
    %176 = vector.shape_cast %175 : vector<16xf32> to vector<16x1xf32>
    %177 = tpu.reciprocal %176 {approx = true} : vector<16x1xf32> -> vector<16x1xf32>
    %178 = vector.broadcast %177 : vector<16x1xf32> to vector<16x16xf32>
    %179 = arith.mulf %174, %178 : vector<16x16xf32>
    %180 = arith.truncf %179 : vector<16x16xf32> to vector<16x16xbf16>
    %181 = vector.extract_strided_slice %110 {offsets = [0, 96], sizes = [16, 32], strides = [1, 1]} : vector<16x128xbf16> to vector<16x32xbf16>
    %cst_50 = arith.constant dense<0.000000e+00> : vector<16x32xf32>
    %182 = tpu.matmul %180, %181, %cst_50 {dimension_numbers = #tpu.dot_dimension_numbers<[1], [0], [0], [1], [0, 0, 1, 1], [], []>} : vector<16x16xbf16>, vector<16x32xbf16>, vector<16x32xf32> -> vector<16x32xf32>
    %183 = tpu.concatenate %128, %146, %164, %182 in 1 : vector<16x32xf32>, vector<16x32xf32>, vector<16x32xf32>, vector<16x32xf32> -> vector<16x128xf32>
    %184 = tpu.concatenate %100, %183 in 0 : vector<16x128xf32>, vector<16x128xf32> -> vector<32x128xf32>
    %c0_51 = arith.constant 0 : index
    %c0_52 = arith.constant 0 : index
    %c0_53 = arith.constant 0 : index
    %185 = vector.load %arg8[%c0_51, %c0_52, %c0_53] : memref<1x128x128xbf16, #tpu.memory_space<vmem>>, vector<1x128x128xbf16>
    %186 = vector.shape_cast %185 : vector<1x128x128xbf16> to vector<128x128xbf16>
    %187 = arith.truncf %184 : vector<32x128xf32> to vector<32x128xbf16>
    %cst_54 = arith.constant dense<0.000000e+00> : vector<32x128xf32>
    %188 = tpu.matmul %187, %186, %cst_54 {dimension_numbers = #tpu.dot_dimension_numbers<[1], [0], [0], [1], [0, 0, 1, 1], [], []>} : vector<32x128xbf16>, vector<128x128xbf16>, vector<32x128xf32> -> vector<32x128xf32>
    %c0_55 = arith.constant 0 : index
    %c0_56 = arith.constant 0 : index
    %c0_57 = arith.constant 0 : index
    %189 = vector.load %arg9[%c0_55, %c0_56, %c0_57] : memref<1x1x128xf32, #tpu.memory_space<vmem>>, vector<1x1x128xf32>
    %190 = vector.shape_cast %189 : vector<1x1x128xf32> to vector<1x128xf32>
    %191 = vector.broadcast %190 : vector<1x128xf32> to vector<32x128xf32>
    %192 = arith.addf %188, %191 : vector<32x128xf32>
    %193 = arith.addf %192, %3 : vector<32x128xf32>
    %c0_58 = arith.constant 0 : index
    %c0_59 = arith.constant 0 : index
    %c0_60 = arith.constant 0 : index
    %194 = vector.load %arg10[%c0_58, %c0_59, %c0_60] : memref<1x1x128xf32, #tpu.memory_space<vmem>>, vector<1x1x128xf32>
    %195 = vector.shape_cast %194 : vector<1x1x128xf32> to vector<1x128xf32>
    %c0_61 = arith.constant 0 : index
    %c0_62 = arith.constant 0 : index
    %c0_63 = arith.constant 0 : index
    %196 = vector.load %arg11[%c0_61, %c0_62, %c0_63] : memref<1x1x128xf32, #tpu.memory_space<vmem>>, vector<1x1x128xf32>
    %197 = vector.shape_cast %196 : vector<1x1x128xf32> to vector<1x128xf32>
    %cst_64 = arith.constant dense<0.000000e+00> : vector<32xf32>
    %198 = vector.multi_reduction <add>, %193, %cst_64 [1] : vector<32x128xf32> to vector<32xf32>
    %199 = vector.shape_cast %198 : vector<32xf32> to vector<32x1xf32>
    %cst_65 = arith.constant 1.280000e+02 : f32
    %200 = vector.broadcast %cst_65 : f32 to vector<32x1xf32>
    %201 = arith.divf %199, %200 : vector<32x1xf32>
    %202 = vector.broadcast %201 : vector<32x1xf32> to vector<32x128xf32>
    %203 = arith.subf %193, %202 : vector<32x128xf32>
    %204 = arith.mulf %203, %203 : vector<32x128xf32>
    %cst_66 = arith.constant dense<0.000000e+00> : vector<32xf32>
    %205 = vector.multi_reduction <add>, %204, %cst_66 [1] : vector<32x128xf32> to vector<32xf32>
    %206 = vector.shape_cast %205 : vector<32xf32> to vector<32x1xf32>
    %cst_67 = arith.constant 1.280000e+02 : f32
    %207 = vector.broadcast %cst_67 : f32 to vector<32x1xf32>
    %208 = arith.divf %206, %207 : vector<32x1xf32>
    %209 = vector.broadcast %201 : vector<32x1xf32> to vector<32x128xf32>
    %210 = arith.subf %193, %209 : vector<32x128xf32>
    %cst_68 = arith.constant 9.99999996E-13 : f32
    %211 = vector.broadcast %cst_68 : f32 to vector<32x1xf32>
    %212 = arith.addf %208, %211 : vector<32x1xf32>
    %213 = math.rsqrt %212 : vector<32x1xf32>
    %214 = vector.broadcast %213 : vector<32x1xf32> to vector<32x128xf32>
    %215 = arith.mulf %210, %214 : vector<32x128xf32>
    %216 = vector.broadcast %195 : vector<1x128xf32> to vector<32x128xf32>
    %217 = arith.mulf %215, %216 : vector<32x128xf32>
    %218 = vector.broadcast %197 : vector<1x128xf32> to vector<32x128xf32>
    %219 = arith.addf %217, %218 : vector<32x128xf32>
    %c0_69 = arith.constant 0 : index
    %c0_70 = arith.constant 0 : index
    %c0_71 = arith.constant 0 : index
    %220 = vector.load %arg12[%c0_69, %c0_70, %c0_71] : memref<1x128x256xbf16, #tpu.memory_space<vmem>>, vector<1x128x256xbf16>
    %221 = vector.shape_cast %220 : vector<1x128x256xbf16> to vector<128x256xbf16>
    %222 = arith.truncf %219 : vector<32x128xf32> to vector<32x128xbf16>
    %cst_72 = arith.constant dense<0.000000e+00> : vector<32x256xf32>
    %223 = tpu.matmul %222, %221, %cst_72 {dimension_numbers = #tpu.dot_dimension_numbers<[1], [0], [0], [1], [0, 0, 1, 1], [], []>} : vector<32x128xbf16>, vector<128x256xbf16>, vector<32x256xf32> -> vector<32x256xf32>
    %c0_73 = arith.constant 0 : index
    %c0_74 = arith.constant 0 : index
    %c0_75 = arith.constant 0 : index
    %224 = vector.load %arg13[%c0_73, %c0_74, %c0_75] : memref<1x1x256xf32, #tpu.memory_space<vmem>>, vector<1x1x256xf32>
    %225 = vector.shape_cast %224 : vector<1x1x256xf32> to vector<1x256xf32>
    %226 = vector.broadcast %225 : vector<1x256xf32> to vector<32x256xf32>
    %227 = arith.addf %223, %226 : vector<32x256xf32>
    %cst_76 = arith.constant 5.000000e-01 : f32
    %228 = vector.broadcast %cst_76 : f32 to vector<32x256xf32>
    %229 = arith.mulf %228, %227 : vector<32x256xf32>
    %cst_77 = arith.constant 4.471500e-02 : f32
    %230 = vector.broadcast %cst_77 : f32 to vector<32x256xf32>
    %231 = arith.mulf %230, %227 : vector<32x256xf32>
    %232 = arith.mulf %231, %227 : vector<32x256xf32>
    %233 = arith.mulf %232, %227 : vector<32x256xf32>
    %234 = arith.addf %227, %233 : vector<32x256xf32>
    %cst_78 = arith.constant 0.797884583 : f32
    %235 = vector.broadcast %cst_78 : f32 to vector<32x256xf32>
    %236 = arith.mulf %235, %234 : vector<32x256xf32>
    %237 = math.tanh %236 : vector<32x256xf32>
    %cst_79 = arith.constant 1.000000e+00 : f32
    %238 = vector.broadcast %cst_79 : f32 to vector<32x256xf32>
    %239 = arith.addf %238, %237 : vector<32x256xf32>
    %240 = arith.mulf %229, %239 : vector<32x256xf32>
    %c0_80 = arith.constant 0 : index
    %c0_81 = arith.constant 0 : index
    %c0_82 = arith.constant 0 : index
    %241 = vector.load %arg14[%c0_80, %c0_81, %c0_82] : memref<1x256x128xbf16, #tpu.memory_space<vmem>>, vector<1x256x128xbf16>
    %242 = vector.shape_cast %241 : vector<1x256x128xbf16> to vector<256x128xbf16>
    %243 = arith.truncf %240 : vector<32x256xf32> to vector<32x256xbf16>
    %cst_83 = arith.constant dense<0.000000e+00> : vector<32x128xf32>
    %244 = tpu.matmul %243, %242, %cst_83 {dimension_numbers = #tpu.dot_dimension_numbers<[1], [0], [0], [1], [0, 0, 1, 1], [], []>} : vector<32x256xbf16>, vector<256x128xbf16>, vector<32x128xf32> -> vector<32x128xf32>
    %c0_84 = arith.constant 0 : index
    %c0_85 = arith.constant 0 : index
    %c0_86 = arith.constant 0 : index
    %245 = vector.load %arg15[%c0_84, %c0_85, %c0_86] : memref<1x1x128xf32, #tpu.memory_space<vmem>>, vector<1x1x128xf32>
    %246 = vector.shape_cast %245 : vector<1x1x128xf32> to vector<1x128xf32>
    %247 = vector.broadcast %246 : vector<1x128xf32> to vector<32x128xf32>
    %248 = arith.addf %244, %247 : vector<32x128xf32>
    %249 = arith.addf %248, %219 : vector<32x128xf32>
    %c0_87 = arith.constant 0 : index
    %c0_88 = arith.constant 0 : index
    %c0_89 = arith.constant 0 : index
    %250 = vector.load %arg16[%c0_87, %c0_88, %c0_89] : memref<1x1x128xf32, #tpu.memory_space<vmem>>, vector<1x1x128xf32>
    %251 = vector.shape_cast %250 : vector<1x1x128xf32> to vector<1x128xf32>
    %c0_90 = arith.constant 0 : index
    %c0_91 = arith.constant 0 : index
    %c0_92 = arith.constant 0 : index
    %252 = vector.load %arg17[%c0_90, %c0_91, %c0_92] : memref<1x1x128xf32, #tpu.memory_space<vmem>>, vector<1x1x128xf32>
    %253 = vector.shape_cast %252 : vector<1x1x128xf32> to vector<1x128xf32>
    %cst_93 = arith.constant dense<0.000000e+00> : vector<32xf32>
    %254 = vector.multi_reduction <add>, %249, %cst_93 [1] : vector<32x128xf32> to vector<32xf32>
    %255 = vector.shape_cast %254 : vector<32xf32> to vector<32x1xf32>
    %cst_94 = arith.constant 1.280000e+02 : f32
    %256 = vector.broadcast %cst_94 : f32 to vector<32x1xf32>
    %257 = arith.divf %255, %256 : vector<32x1xf32>
    %258 = vector.broadcast %257 : vector<32x1xf32> to vector<32x128xf32>
    %259 = arith.subf %249, %258 : vector<32x128xf32>
    %260 = arith.mulf %259, %259 : vector<32x128xf32>
    %cst_95 = arith.constant dense<0.000000e+00> : vector<32xf32>
    %261 = vector.multi_reduction <add>, %260, %cst_95 [1] : vector<32x128xf32> to vector<32xf32>
    %262 = vector.shape_cast %261 : vector<32xf32> to vector<32x1xf32>
    %cst_96 = arith.constant 1.280000e+02 : f32
    %263 = vector.broadcast %cst_96 : f32 to vector<32x1xf32>
    %264 = arith.divf %262, %263 : vector<32x1xf32>
    %265 = vector.broadcast %257 : vector<32x1xf32> to vector<32x128xf32>
    %266 = arith.subf %249, %265 : vector<32x128xf32>
    %cst_97 = arith.constant 9.99999996E-13 : f32
    %267 = vector.broadcast %cst_97 : f32 to vector<32x1xf32>
    %268 = arith.addf %264, %267 : vector<32x1xf32>
    %269 = math.rsqrt %268 : vector<32x1xf32>
    %270 = vector.broadcast %269 : vector<32x1xf32> to vector<32x128xf32>
    %271 = arith.mulf %266, %270 : vector<32x128xf32>
    %272 = vector.broadcast %251 : vector<1x128xf32> to vector<32x128xf32>
    %273 = arith.mulf %271, %272 : vector<32x128xf32>
    %274 = vector.broadcast %253 : vector<1x128xf32> to vector<32x128xf32>
    %275 = arith.addf %273, %274 : vector<32x128xf32>
    %c0_98 = arith.constant 0 : index
    %c0_99 = arith.constant 0 : index
    %276 = vector.load %arg21[%c0_98, %c0_99] : memref<32x128xf32, #tpu.memory_space<vmem>>, vector<32x128xf32>
    tpu.vector_store %arg21[%c0_98, %c0_99], %275 {strides = array<i32>} : memref<32x128xf32, #tpu.memory_space<vmem>>, vector<32x128xf32>,
    %c1_i32 = arith.constant 1 : i32
    %277 = arith.cmpi eq, %arg1, %c1_i32 : i32
    %278 = arith.extui %277 : i1 to i32
    %c0_i32_100 = arith.constant 0 : i32
    %279 = arith.cmpi ne, %278, %c0_i32_100 : i32
    scf.if %279 {
      %280 = vector.extract_strided_slice %275 {offsets = [0, 0], sizes = [1, 128], strides = [1, 1]} : vector<32x128xf32> to vector<1x128xf32>
      %281 = vector.extract_strided_slice %275 {offsets = [16, 0], sizes = [1, 128], strides = [1, 1]} : vector<32x128xf32> to vector<1x128xf32>
      %282 = tpu.concatenate %280, %281 in 0 : vector<1x128xf32>, vector<1x128xf32> -> vector<2x128xf32>
      %c0_101 = arith.constant 0 : index
      %c0_102 = arith.constant 0 : index
      %283 = vector.load %arg18[%c0_101, %c0_102] : memref<128x128xbf16, #tpu.memory_space<vmem>>, vector<128x128xbf16>
      %284 = arith.truncf %282 : vector<2x128xf32> to vector<2x128xbf16>
      %cst_103 = arith.constant dense<0.000000e+00> : vector<2x128xf32>
      %285 = tpu.matmul %284, %283, %cst_103 {dimension_numbers = #tpu.dot_dimension_numbers<[1], [0], [0], [1], [0, 0, 1, 1], [], []>} : vector<2x128xbf16>, vector<128x128xbf16>, vector<2x128xf32> -> vector<2x128xf32>
      %c0_104 = arith.constant 0 : index
      %c0_105 = arith.constant 0 : index
      %286 = vector.load %arg19[%c0_104, %c0_105] : memref<1x128xf32, #tpu.memory_space<vmem>>, vector<1x128xf32>
      %287 = vector.broadcast %286 : vector<1x128xf32> to vector<2x128xf32>
      %288 = arith.addf %285, %287 : vector<2x128xf32>
      %c0_106 = arith.constant 0 : index
      %c0_107 = arith.constant 0 : index
      %289 = vector.load %arg20[%c0_106, %c0_107] : memref<2x128xf32, #tpu.memory_space<vmem>>, vector<2x128xf32>
      tpu.vector_store %arg20[%c0_106, %c0_107], %288 {strides = array<i32>} : memref<2x128xf32, #tpu.memory_space<vmem>>, vector<2x128xf32>,
    } else {
    }
    return
  }
  func.func @transform_0(%arg0: i32, %arg1: i32) -> (i32, i32) {
    %c0_i32 = arith.constant 0 : i32
    %c0_i32_0 = arith.constant 0 : i32
    return %arg0, %c0_i32 : i32, i32
  }
  func.func @transform_1(%arg0: i32, %arg1: i32) -> (i32, i32, i32) {
    %c0_i32 = arith.constant 0 : i32
    %c0_i32_0 = arith.constant 0 : i32
    %c0_i32_1 = arith.constant 0 : i32
    return %arg0, %c0_i32, %c0_i32_0 : i32, i32, i32
  }
  func.func @transform_2(%arg0: i32, %arg1: i32) -> (i32, i32) {
    %c0_i32 = arith.constant 0 : i32
    %c0_i32_0 = arith.constant 0 : i32
    %c0_i32_1 = arith.constant 0 : i32
    return %c0_i32, %c0_i32_0 : i32, i32
  }
  func.func @transform_3(%arg0: i32, %arg1: i32) -> (i32, i32) {
    %c0_i32 = arith.constant 0 : i32
    %c0_i32_0 = arith.constant 0 : i32
    %c0_i32_1 = arith.constant 0 : i32
    return %c0_i32, %c0_i32_0 : i32, i32
  }
  func.func @transform_4(%arg0: i32, %arg1: i32) -> (i32, i32, i32) {
    %c0_i32 = arith.constant 0 : i32
    %c0_i32_0 = arith.constant 0 : i32
    %c0_i32_1 = arith.constant 0 : i32
    return %arg1, %c0_i32, %c0_i32_0 : i32, i32, i32
  }
  func.func @transform_5(%arg0: i32, %arg1: i32) -> (i32, i32, i32) {
    %c0_i32 = arith.constant 0 : i32
    %c0_i32_0 = arith.constant 0 : i32
    %c0_i32_1 = arith.constant 0 : i32
    return %arg1, %c0_i32, %c0_i32_0 : i32, i32, i32
  }
  func.func @transform_6(%arg0: i32, %arg1: i32) -> (i32, i32, i32) {
    %c0_i32 = arith.constant 0 : i32
    %c0_i32_0 = arith.constant 0 : i32
    %c0_i32_1 = arith.constant 0 : i32
    return %arg1, %c0_i32, %c0_i32_0 : i32, i32, i32
  }
  func.func @transform_7(%arg0: i32, %arg1: i32) -> (i32, i32, i32) {
    %c0_i32 = arith.constant 0 : i32
    %c0_i32_0 = arith.constant 0 : i32
    %c0_i32_1 = arith.constant 0 : i32
    return %arg1, %c0_i32, %c0_i32_0 : i32, i32, i32
  }
  func.func @transform_8(%arg0: i32, %arg1: i32) -> (i32, i32, i32) {
    %c0_i32 = arith.constant 0 : i32
    %c0_i32_0 = arith.constant 0 : i32
    %c0_i32_1 = arith.constant 0 : i32
    return %arg1, %c0_i32, %c0_i32_0 : i32, i32, i32
  }
  func.func @transform_9(%arg0: i32, %arg1: i32) -> (i32, i32, i32) {
    %c0_i32 = arith.constant 0 : i32
    %c0_i32_0 = arith.constant 0 : i32
    %c0_i32_1 = arith.constant 0 : i32
    return %arg1, %c0_i32, %c0_i32_0 : i32, i32, i32
  }
  func.func @transform_10(%arg0: i32, %arg1: i32) -> (i32, i32, i32) {
    %c0_i32 = arith.constant 0 : i32
    %c0_i32_0 = arith.constant 0 : i32
    %c0_i32_1 = arith.constant 0 : i32
    return %arg1, %c0_i32, %c0_i32_0 : i32, i32, i32
  }
  func.func @transform_11(%arg0: i32, %arg1: i32) -> (i32, i32, i32) {
    %c0_i32 = arith.constant 0 : i32
    %c0_i32_0 = arith.constant 0 : i32
    %c0_i32_1 = arith.constant 0 : i32
    return %arg1, %c0_i32, %c0_i32_0 : i32, i32, i32
  }
  func.func @transform_12(%arg0: i32, %arg1: i32) -> (i32, i32, i32) {
    %c0_i32 = arith.constant 0 : i32
    %c0_i32_0 = arith.constant 0 : i32
    %c0_i32_1 = arith.constant 0 : i32
    return %arg1, %c0_i32, %c0_i32_0 : i32, i32, i32
  }
  func.func @transform_13(%arg0: i32, %arg1: i32) -> (i32, i32, i32) {
    %c0_i32 = arith.constant 0 : i32
    %c0_i32_0 = arith.constant 0 : i32
    %c0_i32_1 = arith.constant 0 : i32
    return %arg1, %c0_i32, %c0_i32_0 : i32, i32, i32
  }
  func.func @transform_14(%arg0: i32, %arg1: i32) -> (i32, i32, i32) {
    %c0_i32 = arith.constant 0 : i32
    %c0_i32_0 = arith.constant 0 : i32
    %c0_i32_1 = arith.constant 0 : i32
    return %arg1, %c0_i32, %c0_i32_0 : i32, i32, i32
  }
  func.func @transform_15(%arg0: i32, %arg1: i32) -> (i32, i32, i32) {
    %c0_i32 = arith.constant 0 : i32
    %c0_i32_0 = arith.constant 0 : i32
    %c0_i32_1 = arith.constant 0 : i32
    return %arg1, %c0_i32, %c0_i32_0 : i32, i32, i32
  }
  func.func @transform_16(%arg0: i32, %arg1: i32) -> (i32, i32) {
    %c0_i32 = arith.constant 0 : i32
    %c0_i32_0 = arith.constant 0 : i32
    %c0_i32_1 = arith.constant 0 : i32
    return %c0_i32, %c0_i32_0 : i32, i32
  }
  func.func @transform_17(%arg0: i32, %arg1: i32) -> (i32, i32) {
    %c0_i32 = arith.constant 0 : i32
    %c0_i32_0 = arith.constant 0 : i32
    %c0_i32_1 = arith.constant 0 : i32
    return %c0_i32, %c0_i32_0 : i32, i32
  }
  func.func @transform_18(%arg0: i32, %arg1: i32) -> (i32, i32) {
    %c0_i32 = arith.constant 0 : i32
    %c0_i32_0 = arith.constant 0 : i32
    return %arg0, %c0_i32 : i32, i32
  }
}

</mosaic_0001>

<bundles_post_ra>
// kernel: tpu_custom_call.1
= control target key start
LH: loop header
LB: loop body
LE: loop exit
PB: predicated region body
PF: predicated region fallthrough
CT: control target
= control target key end

     0   :  { %s5544_s0 = inlined_call_operand.hbm [shape: f32[32,128], index: 0, kind: input, shape index: {}]   ;;  %s5545_s1 = inlined_call_operand.hbm [shape: f32[2,1,16], index: 1, kind: input, shape index: {}]   ;;  %s5546_s2 = inlined_call_operand.hbm [shape: f32[1,128], index: 2, kind: input, shape index: {}]   ;;  %s5547_s3 = inlined_call_operand.hbm [shape: f32[1,128], index: 3, kind: input, shape index: {}]   ;;  %s5548_s4 = inlined_call_operand.hbm [shape: bf16[2,128,384], index: 4, kind: input, shape index: {}]   ;;  %s5549_s5 = inlined_call_operand.vmem [shape: f32[2,1,384], index: 5, kind: input, shape index: {}]   ;;  %s5550_s6 = inlined_call_operand.hbm [shape: bf16[2,128,128], index: 6, kind: input, shape index: {}]   ;;  %s5551_s7 = inlined_call_operand.vmem [shape: f32[2,1,128], index: 7, kind: input, shape index: {}]   ;;  %s5552_s8 = inlined_call_operand.vmem [shape: f32[2,1,128], index: 8, kind: input, shape index: {}]   ;;  %s5553_s9 = inlined_call_operand.vmem [shape: f32[2,1,128], index: 9, kind: input, shape index: {}]   ;;  %s5554_s10 = inlined_call_operand.hbm [shape: bf16[2,128,256], index: 10, kind: input, shape index: {}]   ;;  %s5555_s11 = inlined_call_operand.vmem [shape: f32[2,1,256], index: 11, kind: input, shape index: {}]   ;;  %s5556_s12 = inlined_call_operand.hbm [shape: bf16[2,256,128], index: 12, kind: input, shape index: {}]   ;;  %s5557_s13 = inlined_call_operand.vmem [shape: f32[2,1,128], index: 13, kind: input, shape index: {}]   ;;  %s5558_s14 = inlined_call_operand.vmem [shape: f32[2,1,128], index: 14, kind: input, shape index: {}]   ;;  %s5559_s15 = inlined_call_operand.vmem [shape: f32[2,1,128], index: 15, kind: input, shape index: {}]   ;;  %s5560_s16 = inlined_call_operand.hbm [shape: bf16[128,128], index: 16, kind: input, shape index: {}]   ;;  %s5561_s17 = inlined_call_operand.vmem [shape: f32[1,128], index: 17, kind: input, shape index: {}]   ;;  %s5562_s18 = inlined_call_operand.hbm [shape: f32[2,128], index: 18, kind: output, shape index: {}]  }
   0x1   :  { %5593 = sst [smem:[#allocation28_spill]] %s5544_s0 }
   0x2   :  { %5594 = sst [smem:[#allocation29_spill]] %s5545_s1 }
   0x3   :  { %5595 = sst [smem:[#allocation30_spill]] %s5546_s2 }
   0x4   :  { %5596 = sst [smem:[#allocation31_spill]] %s5547_s3 }
   0x5   :  { %5597 = sst [smem:[#allocation32_spill]] %s5548_s4 }
   0x6   :  { %5598 = sst [smem:[#allocation33_spill]] %s5549_s5 }
   0x7   :  { %5599 = sst [smem:[#allocation34_spill]] %s5550_s6 }
   0x8   :  { %5600 = sst [smem:[#allocation35_spill]] %s5551_s7 }
   0x9   :  { %5601 = sst [smem:[#allocation36_spill]] %s5552_s8 }
   0xa   :  { %5602 = sst [smem:[#allocation37_spill]] %s5553_s9 }
   0xb   :  { %5603 = sst [smem:[#allocation38_spill]] %s5554_s10 }
   0xc   :  { %5604 = sst [smem:[#allocation39_spill]] %s5555_s11 }
   0xd   :  { %5605 = sst [smem:[#allocation40_spill]] %s5556_s12 }
   0xe   :  { %5606 = sst [smem:[#allocation41_spill]] %s5557_s13 }
   0xf   :  { %5607 = sst [smem:[#allocation42_spill]] %s5558_s14 }
  0x10   :  { %5608 = sst [smem:[#allocation43_spill]] %s5559_s15 }
  0x11   :  { %5609 = sst [smem:[#allocation44_spill]] %s5560_s16 }
  0x12   :  { %5610 = sst [smem:[#allocation45_spill]] %s5561_s17 }
  0x13   :  { %5611 = sst [smem:[#allocation46_spill]] %s5562_s18 }
  0x14   :  { %23 = vsyncpa [#allocation4], 0 }
  0x15   :  { %24 = vsyncpa [#allocation7], 0 }
  0x16   :  { %25 = vsyncpa [#allocation10], 0 }
  0x17   :  { %26 = vsyncpa [#allocation5], 0  ;;  %s4631_s27 = smov 0   ;;  %s4633_s28 = smov 0  }
  0x18   :  { %s4635_s29 = smov 0   ;;  %s4637_s30 = smov 0  }
  0x19   :  { %s4639_s0 = smov 0   ;;  %s4641_s19 = smov 0  }
  0x1a LB: > { %5612 = sst [smem:[#allocation23_spill]] %s4495_s29  ;;  %s4660_s1 = sadd.s32 4294967295, %s4507_s19   ;;  %s4507_s19 = sphi %s4641_s19, %s32_s19   ;;  %s4503_s0 = sphi %s4639_s0, %s5687_s0   ;;  %s4499_s30 = sphi %s4637_s30, %s5686_s30   ;;  %s4495_s29 = sphi %s4635_s29, %s5682_s29   ;;  %s4491_s28 = sphi %s4633_s28, %s5685_s28   ;;  %s4487_s27 = sphi %s4631_s27, %s5684_s27  }
  0x1b   : > { %5613 = sst [smem:[#allocation24_spill]] %s4499_s30  ;;  %p158_p0 = scmp.ne.s32.totalorder %s4491_s28, %s4487_s27 }
  0x1c   : > { %5614 = sst [smem:[#allocation25_spill]] %s4507_s19  ;;  %p5567_p1 = scmp.eq.s32.totalorder %s4660_s1, 0 }
  0x1d   : > { %p3398_p2 = scmp.ge.s32.totalorder %s4507_s19, 1  ;;  %p523_p3 = scmp.lt.s32.totalorder %s4507_s19, 3 }
  0x1e   : > { %p4668_p4 = por %p5567_p1, %p158_p0  ;;  %s4509_s22 = smov [#allocation3]  }
  0x1f   : > { %p4672_p5 = pnand %p3398_p2, %p523_p3  ;;  %s538_s2 = sshll.u32 %s4509_s22, 4  ;;  %s539_s2 = int_to_ptr.vmem [resolvable:$true] %s538_s2 }
  0x20   : > { %s5615_s20 = scalar_select %p4668_p4, 1, 0 }
  0x21   : > { %s5616_s21 = scalar_select %p4672_p5, 1, 0 }
  0x22   : > { %p3812_p6 = pneg %p4672_p5  ;;  %s41_s24 = sadd.s32 1, %s4503_s0 }
  0x23   : > { %s5618_s27 = sld [smem:[#allocation28_spill]] }
  0x24   : > { %p4680_p7 = pnand %p3812_p6, %p5567_p1 }
  0x26   : > { %s5617_s23 = scalar_select %p4680_p7, 1, 0 }
  0x27   : > { %p4693_p9 = pneg %p4680_p7 }
  0x29   : > { %s5619_s18 = smov %s5618_s27  ;;  %s4151_s17 = scalar_lea.hbm %s5618_s27, 512 }
  0x2a   : > { %p4152_p8 = scmp.ne.s32.totalorder %s5619_s18, %s4151_s17  ;;  %p4158_p12 = scmp.lt.u32.totalorder %s4151_s17, %s5619_s18 }
  0x2b   : > { %s5620_s22 = scalar_select %p4693_p9, 1, 0 }
  0x2c   : > { %p4154_p10 = pnand %p4693_p9, %p4152_p8 }
  0x2e   : > { %p4155_p11 = pneg %p4154_p10 }
  0x30   : > { %p4160_p13 = pnand %p4158_p12, %p4155_p11 }
  0x32   : > { %4163 = shalt.err (!%p4160_p13)
}
  0x33   : > { %s4164_s25 = scalar_lea.vmem %s539_s2, 512  ;;  %p4172_p6 = scmp.lt.s32.totalorder %s539_s2, %s539_s2 }
  0x34   : > { %p4165_p0 = scmp.ne.s32.totalorder %s539_s2, %s4164_s25  ;;  %p4173_p1 = scmp.lt.s32.totalorder %s4164_s25, %s4164_s25 }
  0x36   : > { %p4167_p2 = pnand %p4165_p0, %p4693_p9  ;;  %p4174_p4 = por %p4173_p1, %p4172_p6 }
  0x38   : > { %p4168_p3 = pneg %p4167_p2 }
  0x3a   : > { %p4175_p5 = pnand %p4174_p4, %p4168_p3 }
  0x3c   : > { %4178 = shalt.err (!%p4175_p5)
}
  0x3d   : > { %s5570_s14 = smov 128   ;;  %s5571_s11 = smov 8  }
  0x3e   : > { %3815 = dma.hbm_to_vmem [thread:$0]  (!%p4680_p7), %s5619_s18, 512, %s539_s2, [#allocation4], %s5570_s14, %s5570_s14, %s5571_s11  }
  0x3f   : > { %p42_p1 = scmp.ge.s32.totalorder %s41_s24, 2  ;;  %s145_s17 = sadd.s32 1, %s4495_s29 }
  0x40   : > { %p152_p4 = scmp.ne.s32.totalorder %s4495_s29, %s4491_s28  ;;  %p153_p5 = scmp.eq.s32.totalorder %s4507_s19, 0 }
  0x41   : > { %s5689_s24 = smov (%p42_p1, %s41_s24), 0  ;;  %p3846_p10 = scmp.lt.s32.totalorder %s4507_s19, 2 }
  0x42   : > { %5621 = sst [smem:[#allocation26_spill]] %s5689_s24  ;;  %p154_p8 = por %p153_p5, %p152_p4 }
  0x43   : > { %s142_s26 = ssub.s32 %s4503_s0, %s5689_s24  ;;  %s606_s27 = sand.u32 1, %s4507_s19  }
  0x44   : > { %p143_p11 = scmp.eq.s32.totalorder %s142_s26, 0  ;;  %s4723_s25 = sand.u32 1, %s4495_s29  }
  0x45   : > { %s3777_s5 = smul.u32 3072, %s4503_s0  ;;  %s5623_s4 = sld [smem:[#allocation32_spill]] }
  0x46   : > { %s4727_s9 = scalar_select %p143_p11, %s4495_s29, %s145_s17  }
  0x47   : > { %s3776_s13 = smul.u32 192, %s4723_s25  ;;  %p4735_p12 = pnand %p3846_p10, %p154_p8 }
  0x48   : > { %5622 = sst [smem:[#allocation27_spill]] %s4727_s9  ;;  %s4741_s17 = scalar_lea.sflag [#allocation4], %s606_s27 }
  0x49   : > { %s5624_s11 = scalar_select %p4735_p12, 1, 0 }
  0x4a   : > { %s610_s26 = scalar_lea.vmem [#allocation11], %s3776_s13  ;;  %p4747_p0 = pneg %p4735_p12 }
  0x4b   : > { %s4733_s14 = scalar_lea.hbm %s5623_s4, %s3777_s5  ;;  %s617_s18 = sshll.u32 %s610_s26, 4  ;;  %s4739_s18 = int_to_ptr.vmem [resolvable:$true] %s617_s18 }
  0x4c   : > { %s4179_s24 = scalar_lea.hbm %s4733_s14, 3072  ;;  %s4184_s13 = scalar_lea.hbm %s5623_s4, 6144 }
  0x4d   : > { %p4180_p13 = scmp.ne.s32.totalorder %s4733_s14, %s4179_s24  ;;  %p4185_p6 = scmp.lt.u32.totalorder %s4733_s14, %s5623_s4 }
  0x4e   : > { %s5625_s5 = scalar_select %p4747_p0, 1, 0 }
  0x4f   : > { %p4182_p2 = pnand %p4747_p0, %p4180_p13  ;;  %p4186_p1 = scmp.lt.u32.totalorder %s4184_s13, %s4179_s24 }
  0x50   : > { %p4188_p5 = scmp.lt.u32.totalorder %s4179_s24, %s4733_s14 }
  0x51   : > { %p4183_p3 = pneg %p4182_p2  ;;  %p4187_p4 = por %p4186_p1, %p4185_p6 }
  0x53   : > { %p4189_p8 = por %p4188_p5, %p4187_p4 }
  0x55   : > { %p4190_p10 = pnand %p4189_p8, %p4183_p3 }
  0x57   : > { %4193 = shalt.err (!%p4190_p10)
}
  0x58   : > { %s4194_s27 = scalar_lea.vmem %s4739_s18, 3072  ;;  %s4512_s2 = smov [#allocation11]  }
  0x59   : > { %p4195_p11 = scmp.ne.s32.totalorder %s4739_s18, %s4194_s27  ;;  %s4199_s15 = sshll.u32 %s4512_s2, 4  ;;  %s4200_s15 = int_to_ptr.vmem [resolvable:$false] %s4199_s15 }
  0x5a   : > { %s4201_s9 = scalar_lea.vmem %s4200_s15, 6144  ;;  %p4202_p7 = scmp.lt.s32.totalorder %s4739_s18, %s4200_s15 }
  0x5b   : > { %p4197_p13 = pnand %p4195_p11, %p4747_p0  ;;  %p4203_p9 = scmp.lt.s32.totalorder %s4201_s9, %s4194_s27 }
  0x5d   : > { %p4198_p2 = pneg %p4197_p13  ;;  %p4204_p6 = por %p4203_p9, %p4202_p7 }
  0x5f   : > { %p4205_p1 = pnand %p4204_p6, %p4198_p2 }
  0x61   : > { %4208 = shalt.err (!%p4205_p1)
}
  0x62   : > { %s4513_s24 = smov 192   ;;  %s4514_s13 = smov 12  }
  0x63   : > { %3831 = dma.hbm_to_vmem [thread:$0]  (!%p4735_p12), %s4733_s14, 3072, %s4739_s18, %s4741_s17, %s4513_s24, %s4513_s24, %s4514_s13  }
  0x64   : > { %s4515_s26 = smov [#allocation6]   ;;  %s5626_s19 = sld [smem:[#allocation29_spill]] }
  0x65   : > { %s554_s4 = sshll.u32 %s4515_s26, 4  ;;  %p5628_p9 = scmp.ne.s32.totalorder %s5620_s22, 0  ;;  %s555_s4 = int_to_ptr.vmem [resolvable:$true] %s554_s4 }
  0x6a   : > { %s5627_s8 = smov %s5626_s19  ;;  %s4209_s15 = scalar_lea.hbm %s5626_s19, 32 }
  0x6b   : > { %p4210_p7 = scmp.ne.s32.totalorder %s5627_s8, %s4209_s15  ;;  %p4216_p5 = scmp.lt.u32.totalorder %s4209_s15, %s5627_s8 }
  0x6d   : > { %p4212_p3 = pnand %p4210_p7, %p5628_p9 }
  0x6f   : > { %p4213_p4 = pneg %p4212_p3 }
  0x71   : > { %p4218_p8 = pnand %p4216_p5, %p4213_p4 }
  0x73   : > { %4221 = shalt.err (!%p4218_p8)
}
  0x74   : > { %s4222_s18 = scalar_lea.vmem %s555_s4, 32  ;;  %p4230_p2 = scmp.lt.s32.totalorder %s555_s4, %s555_s4 }
  0x75   : > { %p4223_p10 = scmp.ne.s32.totalorder %s555_s4, %s4222_s18  ;;  %p4231_p6 = scmp.lt.s32.totalorder %s4222_s18, %s4222_s18 }
  0x77   : > { %p4225_p11 = pnand %p4223_p10, %p5628_p9  ;;  %p4232_p1 = por %p4231_p6, %p4230_p2 }
  0x79   : > { %p4226_p13 = pneg %p4225_p11 }
  0x7b   : > { %p4233_p12 = pnand %p4232_p1, %p4226_p13 }
  0x7d   : > { %4236 = shalt.err (!%p4233_p12)
}
  0x7e   : > { %s4516_s29 = smov 16   ;;  %s4517_s7 = smov 1  }
  0x7f   : > { %p5629_p7 = scmp.ne.s32.totalorder %s5617_s23, 0  ;;  %s3406_s14 = sshll.u32 %s4723_s25, 6 }
  0x80   : > { %s3528_s24 = sshll.u32 %s4503_s0, 10  ;;  %s5630_s6 = sld [smem:[#allocation34_spill]] }
  0x81   : > { %3818 = dma.hbm_to_vmem [thread:$0]  (!%p5629_p7), %s5627_s8, 32, %s555_s4, [#allocation7], %s4516_s29, %s4516_s29, %s4517_s7  }
  0x82   : > { %s638_s15 = scalar_lea.vmem [#allocation12], %s3406_s14  ;;  %s4518_s9 = smov [#allocation8]  }
  0x83   : > { %s645_s27 = sshll.u32 %s638_s15, 4  ;;  %s4798_s18 = sshll.u32 %s4518_s9, 4  ;;  %s4796_s27 = int_to_ptr.vmem [resolvable:$true] %s645_s27  ;;  %s569_s18 = int_to_ptr.vmem [resolvable:$true] %s4798_s18 }
  0x86   : > { %s4794_s2 = scalar_lea.hbm %s5630_s6, %s3528_s24  ;;  %s4242_s7 = scalar_lea.hbm %s5630_s6, 2048 }
  0x87   : > { %s4237_s30 = scalar_lea.hbm %s4794_s2, 1024  ;;  %p4243_p5 = scmp.lt.u32.totalorder %s4794_s2, %s5630_s6 }
  0x88   : > { %p4238_p12 = scmp.ne.s32.totalorder %s4794_s2, %s4237_s30  ;;  %p4244_p8 = scmp.lt.u32.totalorder %s4242_s7, %s4237_s30 }
  0x89   : > { %p4246_p11 = scmp.lt.u32.totalorder %s4237_s30, %s4794_s2 }
  0x8a   : > { %p4240_p3 = pnand %p4238_p12, %p4747_p0  ;;  %p4245_p10 = por %p4244_p8, %p4243_p5 }
  0x8c   : > { %p4241_p4 = pneg %p4240_p3  ;;  %p4247_p13 = por %p4246_p11, %p4245_p10 }
  0x8e   : > { %p4248_p2 = pnand %p4247_p13, %p4241_p4 }
  0x90   : > { %4251 = shalt.err (!%p4248_p2)
}
  0x91   : > { %s4252_s14 = scalar_lea.vmem %s4796_s27, 1024  ;;  %s4519_s13 = smov [#allocation12]  }
  0x92   : > { %p4253_p6 = scmp.ne.s32.totalorder %s4796_s27, %s4252_s14  ;;  %s4257_s26 = sshll.u32 %s4519_s13, 4  ;;  %s4258_s26 = int_to_ptr.vmem [resolvable:$false] %s4257_s26 }
  0x93   : > { %s4259_s15 = scalar_lea.vmem %s4258_s26, 2048  ;;  %p4260_p3 = scmp.lt.s32.totalorder %s4796_s27, %s4258_s26 }
  0x94   : > { %p4255_p1 = pnand %p4253_p6, %p4747_p0  ;;  %p4261_p7 = scmp.lt.s32.totalorder %s4259_s15, %s4252_s14 }
  0x96   : > { %p4256_p12 = pneg %p4255_p1  ;;  %p4262_p5 = por %p4261_p7, %p4260_p3 }
  0x98   : > { %p4263_p8 = pnand %p4262_p5, %p4256_p12 }
  0x9a   : > { %4266 = shalt.err (!%p4263_p8)
}
  0x9b   : > { %s5585_s9 = smov 64   ;;  %s5587_s30 = smov 4  }
  0x9c   : > { %p5631_p4 = scmp.ne.s32.totalorder %s5624_s11, 0  ;;  %s5583_s4 = sshll.u32 %s4723_s25, 7 }
  0x9d   : > { %s5632_s19 = sld [smem:[#allocation30_spill]] }
  0x9e   : > { %3834 = dma.hbm_to_vmem [thread:$0]  (!%p5631_p4), %s4794_s2, 1024, %s4796_s27, %s4741_s17, %s5585_s9, %s5585_s9, %s5587_s30  }
  0xa3   : > { %s5633_s24 = smov %s5632_s19  ;;  %s4267_s14 = scalar_lea.hbm %s5632_s19, 16 }
  0xa4   : > { %p4268_p7 = scmp.ne.s32.totalorder %s5633_s24, %s4267_s14  ;;  %p4274_p13 = scmp.lt.u32.totalorder %s4267_s14, %s5633_s24 }
  0xa6   : > { %p4270_p10 = pnand %p4268_p7, %p5628_p9 }
  0xa8   : > { %p4271_p11 = pneg %p4270_p10 }
  0xaa   : > { %p4276_p2 = pnand %p4274_p13, %p4271_p11 }
  0xac   : > { %4279 = shalt.err (!%p4276_p2)
}
  0xad   : > { %s4280_s2 = scalar_lea.vmem %s569_s18, 16  ;;  %s4287_s27 = scalar_lea.vmem %s569_s18, 32 }
  0xae   : > { %p4281_p6 = scmp.ne.s32.totalorder %s569_s18, %s4280_s2  ;;  %p4288_p3 = scmp.lt.s32.totalorder %s569_s18, %s569_s18 }
  0xaf   : > { %p4289_p5 = scmp.lt.s32.totalorder %s4287_s27, %s4280_s2 }
  0xb0   : > { %p4283_p1 = pnand %p4281_p6, %p5628_p9 }
  0xb1   : > { %p4290_p8 = por %p4289_p5, %p4288_p3 }
  0xb2   : > { %p4284_p12 = pneg %p4283_p1 }
  0xb4   : > { %p4291_p4 = pnand %p4290_p8, %p4284_p12 }
  0xb6   : > { %4294 = shalt.err (!%p4291_p4)
}
  0xb7   : > { %p5634_p7 = scmp.ne.s32.totalorder %s5617_s23, 0  ;;  %s5584_s6 = sshll.u32 %s4503_s0, 11 }
  0xb8   : > { %s5635_s10 = sld [smem:[#allocation38_spill]]  ;;  %s677_s26 = scalar_lea.vmem [#allocation13], %s5583_s4 }
  0xb9   : > { %3821 = dma.hbm_to_vmem [thread:$0]  (!%p5634_p7), %s5633_s24, 16, %s569_s18, [#allocation7]  }
  0xba   : > { %s684_s15 = sshll.u32 %s677_s26, 4  ;;  %s4855_s15 = int_to_ptr.vmem [resolvable:$true] %s684_s15 }
  0xbe   : > { %s4851_s13 = scalar_lea.hbm %s5635_s10, %s5584_s6  ;;  %s4300_s29 = scalar_lea.hbm %s5635_s10, 4096 }
  0xbf   : > { %s4295_s2 = scalar_lea.hbm %s4851_s13, 2048  ;;  %p4301_p13 = scmp.lt.u32.totalorder %s4851_s13, %s5635_s10 }
  0xc0   : > { %p4296_p4 = scmp.ne.s32.totalorder %s4851_s13, %s4295_s2  ;;  %p4302_p2 = scmp.lt.u32.totalorder %s4300_s29, %s4295_s2 }
  0xc1   : > { %p4304_p1 = scmp.lt.u32.totalorder %s4295_s2, %s4851_s13 }
  0xc2   : > { %p4298_p10 = pnand %p4296_p4, %p4747_p0  ;;  %p4303_p6 = por %p4302_p2, %p4301_p13 }
  0xc4   : > { %p4299_p11 = pneg %p4298_p10  ;;  %p4305_p12 = por %p4304_p1, %p4303_p6 }
  0xc6   : > { %p4306_p3 = pnand %p4305_p12, %p4299_p11 }
  0xc8   : > { %4309 = shalt.err (!%p4306_p3)
}
  0xc9   : > { %s4310_s14 = scalar_lea.vmem %s4855_s15, 2048  ;;  %s4522_s26 = smov [#allocation13]  }
  0xca   : > { %p4311_p5 = scmp.ne.s32.totalorder %s4855_s15, %s4310_s14  ;;  %s4315_s18 = sshll.u32 %s4522_s26, 4  ;;  %s4316_s18 = int_to_ptr.vmem [resolvable:$false] %s4315_s18 }
  0xcb   : > { %s4317_s27 = scalar_lea.vmem %s4316_s18, 4096  ;;  %p4318_p10 = scmp.lt.s32.totalorder %s4855_s15, %s4316_s18 }
  0xcc   : > { %p4313_p8 = pnand %p4311_p5, %p4747_p0  ;;  %p4319_p7 = scmp.lt.s32.totalorder %s4317_s27, %s4310_s14 }
  0xce   : > { %p4314_p4 = pneg %p4313_p8  ;;  %p4320_p13 = por %p4319_p7, %p4318_p10 }
  0xd0   : > { %p4321_p2 = pnand %p4320_p13, %p4314_p4 }
  0xd2   : > { %4324 = shalt.err (!%p4321_p2)
}
  0xd3   : > { %p5636_p11 = scmp.ne.s32.totalorder %s5624_s11, 0  ;;  %s5637_s2 = smov 8  }
  0xd4   : > { %s5638_s29 = smov 128   ;;  %s4523_s7 = smov [#allocation9]  }
  0xd5   : > { %3837 = dma.hbm_to_vmem [thread:$0]  (!%p5636_p11), %s4851_s13, 2048, %s4855_s15, %s4741_s17, %s5638_s29, %s5638_s29, %s5637_s2  }
  0xd6   : > { %s579_s19 = sshll.u32 %s4523_s7, 4  ;;  %s4524_s26 = smov [#allocation15]   ;;  %s580_s19 = int_to_ptr.vmem [resolvable:$true] %s579_s19 }
  0xd7   : > { %s589_s4 = sshll.u32 %s4524_s26, 4  ;;  %s5639_s3 = sld [smem:[#allocation31_spill]]  ;;  %s590_s4 = int_to_ptr.vmem [resolvable:$true] %s589_s4 }
  0xdd   : > { %s4325_s27 = scalar_lea.hbm %s5639_s3, 16 }
  0xde   : > { %p4326_p7 = scmp.ne.s32.totalorder %s5639_s3, %s4325_s27  ;;  %p4332_p12 = scmp.lt.u32.totalorder %s4325_s27, %s5639_s3 }
  0xe0   : > { %p4328_p6 = pnand %p4326_p7, %p5628_p9 }
  0xe2   : > { %p4329_p1 = pneg %p4328_p6 }
  0xe4   : > { %p4334_p3 = pnand %p4332_p12, %p4329_p1 }
  0xe6   : > { %4337 = shalt.err (!%p4334_p3)
}
  0xe7   : > { %s4338_s13 = scalar_lea.vmem %s580_s19, 16  ;;  %s4345_s15 = scalar_lea.vmem %s580_s19, 32 }
  0xe8   : > { %p4339_p5 = scmp.ne.s32.totalorder %s580_s19, %s4338_s13  ;;  %p4346_p10 = scmp.lt.s32.totalorder %s580_s19, %s580_s19 }
  0xe9   : > { %p4347_p13 = scmp.lt.s32.totalorder %s4345_s15, %s4338_s13 }
  0xea   : > { %p4341_p8 = pnand %p4339_p5, %p5628_p9 }
  0xeb   : > { %p4348_p2 = por %p4347_p13, %p4346_p10 }
  0xec   : > { %p4342_p4 = pneg %p4341_p8 }
  0xee   : > { %p4349_p11 = pnand %p4348_p2, %p4342_p4 }
  0xf0   : > { %4352 = shalt.err (!%p4349_p11)
}
  0xf1   : > { %p5640_p7 = scmp.ne.s32.totalorder %s5617_s23, 0  ;;  %s5641_s16 = sld [smem:[#allocation44_spill]] }
  0xf3   : > { %3824 = dma.hbm_to_vmem [thread:$0]  (!%p5640_p7), %s5639_s3, 16, %s580_s19, [#allocation10]  }
  0xf7   : > { %s4353_s2 = scalar_lea.hbm %s5641_s16, 1024 }
  0xf8   : > { %p4354_p6 = scmp.ne.s32.totalorder %s5641_s16, %s4353_s2  ;;  %p4360_p11 = scmp.lt.u32.totalorder %s4353_s2, %s5641_s16 }
  0xfa   : > { %p4356_p1 = pnand %p4354_p6, %p5628_p9 }
  0xfc   : > { %p4357_p12 = pneg %p4356_p1 }
  0xfe   : > { %p4362_p3 = pnand %p4360_p11, %p4357_p12 }
 0x100   : > { %4365 = shalt.err (!%p4362_p3)
}
 0x101   : > { %s4366_s14 = scalar_lea.vmem %s590_s4, 1024  ;;  %p4374_p10 = scmp.lt.s32.totalorder %s590_s4, %s590_s4 }
 0x102   : > { %p4367_p5 = scmp.ne.s32.totalorder %s590_s4, %s4366_s14  ;;  %p4375_p13 = scmp.lt.s32.totalorder %s4366_s14, %s4366_s14 }
 0x104   : > { %p4369_p8 = pnand %p4367_p5, %p5628_p9  ;;  %p4376_p2 = por %p4375_p13, %p4374_p10 }
 0x106   : > { %p4370_p4 = pneg %p4369_p8 }
 0x108   : > { %p4377_p0 = pnand %p4376_p2, %p4370_p4 }
 0x10a   : > { %4380 = shalt.err (!%p4377_p0)
}
 0x10b   : > { %s5642_s19 = smov 4   ;;  %s5643_s27 = smov 64  }
 0x10c   : > { %3827 = dma.hbm_to_vmem [thread:$0]  (!%p5640_p7), %s5641_s16, 1024, %s590_s4, [#allocation7], %s5643_s27, %s5643_s27, %s5642_s19  }
 0x10d   : > { %s5644_s22 = sshll.u32 %s4503_s0, 11  ;;  %s5645_s12 = sld [smem:[#allocation40_spill]] }
 0x10e   : > { %s5646_s30 = sshll.u32 %s4723_s25, 7  ;;  %p5647_p9 = scmp.ne.s32.totalorder %s5625_s5, 0 }
 0x10f   : > { %s705_s23 = scalar_lea.vmem [#allocation14], %s5646_s30 }
 0x110   : > { %s712_s2 = sshll.u32 %s705_s23, 4  ;;  %s4930_s2 = int_to_ptr.vmem [resolvable:$true] %s712_s2 }
 0x113   : > { %s4926_s8 = scalar_lea.hbm %s5645_s12, %s5644_s22  ;;  %s4386_s26 = scalar_lea.hbm %s5645_s12, 4096 }
 0x114   : > { %s4381_s29 = scalar_lea.hbm %s4926_s8, 2048  ;;  %p4387_p1 = scmp.lt.u32.totalorder %s4926_s8, %s5645_s12 }
 0x115   : > { %p4382_p0 = scmp.ne.s32.totalorder %s4926_s8, %s4381_s29  ;;  %p4388_p12 = scmp.lt.u32.totalorder %s4386_s26, %s4381_s29 }
 0x116   : > { %p4390_p3 = scmp.lt.u32.totalorder %s4381_s29, %s4926_s8 }
 0x117   : > { %p4384_p6 = pnand %p4382_p0, %p5647_p9  ;;  %p4389_p11 = por %p4388_p12, %p4387_p1 }
 0x119   : > { %p4385_p7 = pneg %p4384_p6  ;;  %p4391_p5 = por %p4390_p3, %p4389_p11 }
 0x11b   : > { %p4392_p8 = pnand %p4391_p5, %p4385_p7 }
 0x11d   : > { %4395 = shalt.err (!%p4392_p8)
}
 0x11e   : > { %s4396_s25 = scalar_lea.vmem %s4930_s2, 2048  ;;  %s4525_s13 = smov [#allocation14]  }
 0x11f   : > { %p4397_p4 = scmp.ne.s32.totalorder %s4930_s2, %s4396_s25  ;;  %s4401_s15 = sshll.u32 %s4525_s13, 4  ;;  %s4402_s15 = int_to_ptr.vmem [resolvable:$false] %s4401_s15 }
 0x120   : > { %s4403_s22 = scalar_lea.vmem %s4402_s15, 4096  ;;  %p4404_p2 = scmp.lt.s32.totalorder %s4930_s2, %s4402_s15 }
 0x121   : > { %p4399_p10 = pnand %p4397_p4, %p5647_p9  ;;  %p4405_p0 = scmp.lt.s32.totalorder %s4403_s22, %s4396_s25 }
 0x123   : > { %p4400_p13 = pneg %p4399_p10  ;;  %p4406_p6 = por %p4405_p0, %p4404_p2 }
 0x125   : > { %p4407_p1 = pnand %p4406_p6, %p4400_p13 }
 0x127   : > { %4410 = shalt.err (!%p4407_p1)
}
 0x128   : > { %p5648_p7 = scmp.ne.s32.totalorder %s5624_s11, 0  ;;  %p5649_p9 = scmp.ne.s32.totalorder %s5616_s21, 0 }
 0x129   : > { %p5650_p12 = scmp.eq.s32.totalorder (!%p5649_p9), %s4660_s1, 0 }
 0x12a   : > { %3840 = dma.hbm_to_vmem [thread:$0]  (!%p5648_p7), %s4926_s8, 2048, %s4930_s2, %s4741_s17, %s5643_s27, %s5643_s27, %s5642_s19  }
 0x12b   : > { %742 = sbr.rel (%p5649_p9) target bundleno = 3590 (0xe06), region = 92 }
 0x132   : > { %4462 = dma.done.wait (%p5650_p12), [#allocation4], 512   ;;  %p5651_p11 = pmov %p5650_p12 }
 0x134   : > { %4464 = vsyncadd (%p5651_p11), [#allocation4], 4294966784  ;;  %p5652_p3 = pmov %p5651_p11 }
 0x136   : > { %4466 = dma.done.wait (%p5652_p3), [#allocation7], 48   ;;  %p5653_p5 = pmov %p5652_p3 }
 0x137   : > { %p5654_p8 = pmov %p5652_p3 }
 0x138   : > { %4468 = vsyncadd (%p5653_p5), [#allocation7], 4294967248 }
 0x139   : > { %4470 = dma.done.wait (%p5654_p8), [#allocation10], 16   ;;  %p5655_p4 = pmov %p5652_p3 }
 0x13a   : > { %s760_s21 = sand.u32 1, %s4660_s1   ;;  %s762_s11 = sand.u32 1, %s4491_s28  }
 0x13b   : > { %4472 = vsyncadd (%p5655_p4), [#allocation10], 4294967280  ;;  %s3778_s17 = smul.u32 192, %s762_s11  ;;  %s761_s5 = scalar_lea.sflag [#allocation4], %s760_s21 }
 0x13c   : > { %p5656_p10 = scmp.ne.s32.totalorder %s5615_s20, 0 }
 0x13d   : > { %s4973_s19 = scalar_lea.vmem [#allocation11], %s3778_s17 }
 0x13e   : > { %4474 = dma.done.wait (%p5656_p10), %s761_s5, 8192  }
 0x13f   : > { %4476 = vsyncadd (%p5656_p10), %s761_s5, 4294959104  ;;  %s3420_s27 = sshll.u32 %s762_s11, 6  ;;  %s3421_s9 = sshll.u32 %s762_s11, 7 }
 0x140   : > { %s4979_s6 = scalar_lea.vmem [#allocation12], %s3420_s27  ;;  %s4981_s8 = scalar_lea.vmem [#allocation13], %s3421_s9 }
 0x141   : > { %s4983_s30 = scalar_lea.vmem [#allocation14], %s3421_s9  ;;  %p5657_p13 = pmov %p5652_p3 }
 0x142   : > { %p5658_p2 = pmov %p5652_p3 }
 0x143   : > { %4478 = dma.done.wait (%p5657_p13), [#allocation7], 1024  }
 0x144   : > { %4480 = vsyncadd (%p5658_p2), [#allocation7], 4294966272  ;;  %s5659_s23 = sld [smem:[#allocation24_spill]]  ;;  %s5663_s27 = sld [smem:[#allocation33_spill]] }
 0x145   : > { %s5660_s7 = sld [smem:[#allocation35_spill]]  ;;  %s5664_s16 = sld [smem:[#allocation39_spill]] }
 0x146   : > { %s5666_s13 = sld [smem:[#allocation42_spill]]  ;;  %s5667_s11 = sld [smem:[#allocation43_spill]] }
 0x14a   : > { %p886_p0 = scmp.lt.s32.totalorder %s5659_s23, 1  ;;  %p3425_p6 = scmp.ne.s32.totalorder %s5659_s23, 0 }
 0x14b   : > { %v917_v0 = vld [vmem:[#allocation3] sm:$0xff] (!%p3425_p6)  ;;  %v919_v1 = vld [vmem:[#allocation3 + $0x10] sm:$0xff] (!%p3425_p6)  ;;  %v918_v2 = vld [vmem:[#allocation3 + $0x8] sm:$0xff] (!%p3425_p6) }
 0x14c   : > { %s4991_s2 = scalar_select %p886_p0, %s5659_s23, 1 }
 0x14d   : > { %923 = vadd.xlane.f32.xlu0 (!%p3425_p6), %v917_v0  ;;  %927 = vadd.xlane.f32.xlu1 (!%p3425_p6), %v919_v1  ;;  %v920_v3 = vld [vmem:[#allocation3 + $0x18] sm:$0xff] (!%p3425_p6)  ;;  %v3426_v33 = vld [vmem:[#allocation8] ss:$0 sm:$0xff] (!%p3425_p6)  ;;  %v3427_v35 = vld [vmem:[#allocation9] ss:$0 sm:$0xff] (!%p3425_p6) }
 0x14e   : > { %s3779_s20 = smul.u32 3, %s4991_s2  ;;  %s892_s26 = scalar_lea.vmem %s5660_s7, %s4991_s2 }
 0x14f   : > { %s3424_s3 = sshll.u32 %s4991_s2, 1  ;;  %s5665_s7 = sld [smem:[#allocation41_spill]] }
 0x150   : > { %s5009_s9 = scalar_lea.vmem %s5663_s27, %s3779_s20  ;;  %s5015_s24 = scalar_lea.vmem %s5664_s16, %s3424_s3 }
 0x151   : > { %s908_s15 = scalar_lea.vmem %s5666_s13, %s4991_s2  ;;  %s911_s17 = scalar_lea.vmem %s5667_s11, %s4991_s2  ;;  %925 = vadd.xlane.f32.xlu0 (!%p3425_p6), %v918_v2  ;;  %929 = vadd.xlane.f32.xlu1 (!%p3425_p6), %v920_v3 }
 0x152   : > { %916 = sbr.rel (%p3425_p6) target bundleno = 653 (0x28d), region = 132 }
 0x155   : > { %s905_s18 = scalar_lea.vmem %s5665_s7, %s4991_s2 }
 0x1da   : > { %v924_v4 = vpop.xlane.xlu0 %923  ;;  %v928_v5 = vpop.xlane.xlu1 %927 }
 0x1db   : > { %v932_v6 = vmul.f32 0.0078125, %v924_v4  ;;  %v934_v7 = vmul.f32 0.0078125, %v928_v5 }
 0x1dd   : > { %v936_v8 = vsub.f32 %v917_v0, %v932_v6  ;;  %v938_v9 = vsub.f32 %v919_v1, %v934_v7 }
 0x1de   : > { %v926_v10 = vpop.xlane.xlu0 %925  ;;  %v930_v11 = vpop.xlane.xlu1 %929 }
 0x1df   : > { %v933_v12 = vmul.f32 0.0078125, %v926_v10  ;;  %v940_v13 = vmul.f32 %v936_v8, %v936_v8  ;;  %v935_v14 = vmul.f32 0.0078125, %v930_v11  ;;  %v942_v17 = vmul.f32 %v938_v9, %v938_v9 }
 0x1e1   : > { %v937_v15 = vsub.f32 %v918_v2, %v933_v12  ;;  %944 = vadd.xlane.f32.xlu0 %v940_v13  ;;  %v939_v16 = vsub.f32 %v920_v3, %v935_v14 }
 0x1e3   : > { %v941_v18 = vmul.f32 %v937_v15, %v937_v15  ;;  %v943_v19 = vmul.f32 %v939_v16, %v939_v16 }
 0x1e5   : > { %948 = vadd.xlane.f32.xlu0 %v942_v17  ;;  %946 = vadd.xlane.f32.xlu1 %v941_v18 }
 0x1e9   : > { %950 = vadd.xlane.f32.xlu1 %v943_v19 }
 0x26e   : > { %v945_v20 = vpop.xlane.xlu0 %944 }
 0x26f   : > { %v952_v21 = vmul.f32 0.0078125, %v945_v20 }
 0x271   : > { %v956_v22 = vadd.f32 1e-12, %v952_v21 }
 0x272   : > { %v947_v23 = vpop.xlane.xlu1 %946  ;;  %v949_v24 = vpop.xlane.xlu0 %948 }
 0x273   : > { %3925 = vrsqrt.f32 %v956_v22  ;;  %v953_v25 = vmul.f32 0.0078125, %v947_v23  ;;  %v954_v26 = vmul.f32 0.0078125, %v949_v24 }
 0x275   : > { %v957_v27 = vadd.f32 1e-12, %v953_v25  ;;  %v958_v28 = vadd.f32 1e-12, %v954_v26 }
 0x276   : > { %v951_v29 = vpop.xlane.xlu1 %950 }
 0x277   : > { %3927 = vrsqrt.f32 %v957_v27  ;;  %v955_v30 = vmul.f32 0.0078125, %v951_v29 }
 0x278   : > { %3929 = vrsqrt.f32 %v958_v28 }
 0x279   : > { %v959_v31 = vadd.f32 1e-12, %v955_v30 }
 0x27b   : > { %3931 = vrsqrt.f32 %v959_v31 }
 0x27d   : > { %v3926_v32 = vpop.eup %3925 }
 0x27e   : > { %v964_v34 = vmul.f32 %v3926_v32, %v936_v8 }
 0x280   : > { %v974_v36 = vmul.f32 %v3426_v33, %v964_v34 }
 0x281   : > { %v3928_v37 = vpop.eup %3927 }
 0x282   : > { %v3930_v38 = vpop.eup %3929  ;;  %v984_v39 = vadd.f32 %v3427_v35, %v974_v36  ;;  %v965_v40 = vmul.f32 %v3928_v37, %v937_v15 }
 0x283   : > { %v966_v41 = vmul.f32 %v3930_v38, %v938_v9 }
 0x284   : > { %988 = vst [vmem:[#allocation2] sm:$0xff] %v984_v39  ;;  %v975_v42 = vmul.f32 %v3426_v33, %v965_v40 }
 0x285   : > { %v3932_v43 = vpop.eup %3931  ;;  %v976_v44 = vmul.f32 %v3426_v33, %v966_v41 }
 0x286   : > { %v985_v45 = vadd.f32 %v3427_v35, %v975_v42  ;;  %v967_v46 = vmul.f32 %v3932_v43, %v939_v16 }
 0x287   : > { %v986_v47 = vadd.f32 %v3427_v35, %v976_v44 }
 0x288   : > { %989 = vst [vmem:[#allocation2 + $0x8] sm:$0xff] %v985_v45  ;;  %v977_v48 = vmul.f32 %v3426_v33, %v967_v46 }
 0x289   : > { %990 = vst [vmem:[#allocation2 + $0x10] sm:$0xff] %v986_v47 }
 0x28a   : > { %v987_v49 = vadd.f32 %v3427_v35, %v977_v48 }
 0x28c   : > { %991 = vst [vmem:[#allocation2 + $0x18] sm:$0xff] %v987_v49 }
 0x28d PF: > { %v3963_v50 = vld [vmem:[%s4973_s19 + $0x4] ss:$12 sps:$4 sm:$0xff]   ;;  %v3965_v51 = vld [vmem:[%s4973_s19] ss:$12 sps:$4 sm:$0xff]   ;;  %v4526_v52 = vmov 0   ;;  %v4527_v9 = vmov 0.0   ;;  %v1032_v18 = vlaneseq }
 0x28e   : > { %1207 = vmatprep.mubr.bf16.mxu0 %v4526_v52  ;;  %1175 = vmatprep.subr.bf16.mxu0 %v3963_v50  ;;  %v3966_v53 = vld [vmem:[%s4973_s19 + $0x1c] ss:$12 sps:$4 sm:$0xff]   ;;  %v3968_v54 = vld [vmem:[%s4973_s19 + $0x18] ss:$12 sps:$4 sm:$0xff]   ;;  %v3969_v55 = vld [vmem:[%s4973_s19 + $0x34] ss:$12 sps:$4 sm:$0xff]  }
 0x28f   : > { %1176 = vmatpush1.bf16.msra.mxu0 %v3965_v51  ;;  %v3971_v56 = vld [vmem:[%s4973_s19 + $0x30] ss:$12 sps:$4 sm:$0xff]   ;;  %v3972_v57 = vld [vmem:[%s4973_s19 + $0x4c] ss:$12 sps:$4 sm:$0xff]   ;;  %v3974_v59 = vld [vmem:[%s4973_s19 + $0x48] ss:$12 sps:$4 sm:$0xff]  }
 0x290   : > { %1177 = vmatprep.subr.bf16.mxu0 %v3966_v53  ;;  %v992_v58 = vld [vmem:[#allocation2] sm:$0xff]  ;;  %v993_v60 = vld [vmem:[#allocation2 + $0x8] sm:$0xff]  ;;  %v994_v6 = vld [vmem:[#allocation2 + $0x10] sm:$0xff]  ;;  %vm4528_vm0 = vmmov 0   ;;  %v5062_v19 = vshrl.u32 %v1032_v18, 7  ;;  %vm1292_vm1 = vcmask 261120  }
 0x291   : > { %v3975_v61 = vld [vmem:[%s4973_s19 + $0x64] ss:$12 sps:$4 sm:$0xff]   ;;  %v1028_v62 = vpack.c.bf16 %v993_v60, %v992_v58  ;;  %v3977_v63 = vld [vmem:[%s4973_s19 + $0x60] ss:$12 sps:$4 sm:$0xff]   ;;  %v3978_v0 = vld [vmem:[%s4973_s19 + $0x7c] ss:$12 sps:$4 sm:$0xff]  }
 0x292   : > { %v3980_v1 = vld [vmem:[%s4973_s19 + $0x78] ss:$12 sps:$4 sm:$0xff]   ;;  %v3981_v2 = vld [vmem:[%s4973_s19 + $0x94] ss:$12 sps:$4 sm:$0xff]   ;;  %v3983_v3 = vld [vmem:[%s4973_s19 + $0x90] ss:$12 sps:$4 sm:$0xff]  }
 0x293   : > { %1178 = vmatpush1.bf16.msra.mxu0 %v3968_v54  ;;  %3636 = vmatprep.mubr.bf16.mxu1 %v1028_v62  ;;  %v3984_v4 = vld [vmem:[%s4973_s19 + $0xac] ss:$12 sps:$4 sm:$0xff]   ;;  %v3986_v5 = vld [vmem:[%s4973_s19 + $0xa8] ss:$12 sps:$4 sm:$0xff]   ;;  %v3990_v13 = vld [vmem:[%s4973_s19 + $0x50] ss:$12 sps:$4 sm:$0xff]  }
 0x294   : > { %1179 = vmatprep.subr.bf16.mxu0 %v3969_v55  ;;  %v995_v7 = vld [vmem:[#allocation2 + $0x18] sm:$0xff]  ;;  %v3988_v11 = vld [vmem:[%s4973_s19 + $0x20] ss:$12 sps:$4 sm:$0xff]   ;;  %v5065_v20 = vsub.s32 0, %v5062_v19  ;;  %v5068_v21 = vld [vmem:[%s5009_s9] sm:$0x7] }
 0x295   : > { %v1029_v8 = vpack.c.bf16 %v995_v7, %v994_v6  ;;  %v3987_v10 = vld [vmem:[%s4973_s19 + $0x8] ss:$12 sps:$4 sm:$0xff]   ;;  %v3989_v12 = vld [vmem:[%s4973_s19 + $0x38] ss:$12 sps:$4 sm:$0xff]   ;;  %v3992_v15 = vld [vmem:[%s4973_s19 + $0x80] ss:$12 sps:$4 sm:$0xff]  }
 0x296   : > { %3620 = vmatprep.subr.bf16.mxu1 %v3987_v10  ;;  %v3991_v14 = vld [vmem:[%s4973_s19 + $0x68] ss:$12 sps:$4 sm:$0xff]   ;;  %v3993_v16 = vld [vmem:[%s4973_s19 + $0x98] ss:$12 sps:$4 sm:$0xff]   ;;  %v3994_v17 = vld [vmem:[%s4973_s19 + $0xb0] ss:$12 sps:$4 sm:$0xff]   ;;  %v1035_v23 = vrot.slane %v5068_v21, %v5065_v20 }
 0x297   : > { %1180 = vmatpush1.bf16.msra.mxu0 %v3971_v56  ;;  %3621 = vmatpush3.bf16.msra.mxu1 %v3987_v10  ;;  %v1038_v22 = vsub.s32 1, %v5062_v19  ;;  %s4529_s3 = smov 64   ;;  %s4530_s10 = smov 96   ;;  %v1042_v54 = vsub.s32 2, %v5062_v19  ;;  %vm1340_vm3 = vcmask 130048   ;;  %vm1800_vm5 = vcmask 523264  }
 0x298   : > { %1181 = vmatprep.subr.bf16.mxu0 %v3972_v57  ;;  %3622 = vmatprep.subr.bf16.mxu1 %v3988_v11  ;;  %s4531_s12 = smov 32   ;;  %vm1803_vm6 = vcmask 785408   ;;  %s5669_s20 = sld [smem:[#allocation36_spill]] }
 0x299   : > { %v1039_v25 = vrot.slane %v5068_v21, %v1038_v22  ;;  %v1043_v56 = vrot.slane %v5068_v21, %v1042_v54  ;;  %s5671_s5 = sld [smem:[#allocation37_spill]] }
 0x29b   : > { %1182 = vmatpush1.bf16.msra.mxu0 %v3974_v59  ;;  %3623 = vmatpush3.bf16.msra.mxu1 %v3988_v11 }
 0x29c   : > { %1183 = vmatprep.subr.bf16.mxu0 %v3975_v61  ;;  %3624 = vmatprep.subr.bf16.mxu1 %v3989_v12 }
 0x29f   : > { %1184 = vmatpush1.bf16.msra.mxu0 %v3977_v63  ;;  %3625 = vmatpush3.bf16.msra.mxu1 %v3989_v12  ;;  %s5672_s27 = scalar_lea.vmem %s5671_s5, %s4991_s2 }
 0x2a0   : > { %1185 = vmatprep.subr.bf16.mxu0 %v3978_v0  ;;  %3626 = vmatprep.subr.bf16.mxu1 %v3990_v13 }
 0x2a3   : > { %1186 = vmatpush1.bf16.msra.mxu0 %v3980_v1  ;;  %3627 = vmatpush3.bf16.msra.mxu1 %v3990_v13 }
 0x2a4   : > { %1187 = vmatprep.subr.bf16.mxu0 %v3981_v2  ;;  %3628 = vmatprep.subr.bf16.mxu1 %v3991_v14 }
 0x2a7   : > { %1188 = vmatpush1.bf16.msra.mxu0 %v3983_v3  ;;  %3629 = vmatpush3.bf16.msra.mxu1 %v3991_v14 }
 0x2a8   : > { %1189 = vmatprep.subr.bf16.mxu0 %v3984_v4  ;;  %3630 = vmatprep.subr.bf16.mxu1 %v3992_v15 }
 0x2ab   : > { %1190 = vmatpush1.bf16.msra.mxu0 %v3986_v5  ;;  %3631 = vmatpush3.bf16.msra.mxu1 %v3992_v15  ;;  %v1283_v15 = vld [vmem:[#allocation6] sm:$0x1] }
 0x2ac   : > { %3640 = vmatprep.subr.bf16.mxu0 %v4527_v9  ;;  %3632 = vmatprep.subr.bf16.mxu1 %v3993_v16  ;;  %vm1284_vm2 = vcmp.gt.f32.partialorder %v1283_v15, 0.0 }
 0x2ae   : > { %1208 = vmatmul.mubr.bf16.vlgmr.msra.gmra.mrb[0].mxu0 %v1028_v62 }
 0x2af   : > { %1217 = vmatprep.mubr.bf16.mxu0 %v4526_v52  ;;  %3633 = vmatpush3.bf16.msra.mxu1 %v3993_v16  ;;  %v4532_v16 = vmov -1e+09  }
 0x2b0   : > { %3634 = vmatprep.subr.bf16.mxu1 %v3994_v17 }
 0x2b3   : > { %3635 = vmatpush3.bf16.msra.mxu1 %v3994_v17  ;;  %v1285_v17 = vsel %vm1284_vm2, 0.0, %v4532_v16 }
 0x2b4   : > { %3652 = vmatprep.subr.bf16.mxu1 %v4527_v9  ;;  %v1290_v18 = vrot.slane %v1285_v17, %v5065_v20 }
 0x2b6   : > { %1218 = vmatmul.mubr.bf16.gmra.mrb[4].mxu0 %v1029_v8  ;;  %3637 = vmatmul.mubr.bf16.vlgmr.msra.gmra.mrb[0].mxu1 %v1029_v8 }
 0x2b7   : > { %3642 = vmatprep.mubr.msk.bf16.mxu0 %vm4528_vm0, %v4527_v9  ;;  %3654 = vmatprep.mubr.msk.bf16.mxu1 %vm4528_vm0, %v4527_v9 }
 0x381   : > { %v1209_v24 = vpop.f32.mrb[0].mxu0 }
 0x382   : > { %v1211_v26 = vpop.f32.mrb[1].mxu0  ;;  %v1210_v28 = vadd.f32 %v1209_v24, %v1035_v23 }
 0x383   : > { %v1213_v27 = vpop.f32.mrb[2].mxu0  ;;  %v1212_v31 = vadd.f32 %v1211_v26, %v1039_v25 }
 0x384   : > { %v1214_v29 = vadd.f32 %v1213_v27, %v1035_v23  ;;  %v1215_v30 = vpop.f32.mrb[3].mxu0 }
 0x385   : > { %v1216_v32 = vadd.f32 %v1215_v30, %v1039_v25 }
 0x386   : > { %v1277_v33 = vpack.c.bf16 %v1214_v29, %v1210_v28 }
 0x387   : > { %v1279_v34 = vpack.c.bf16 %v1216_v32, %v1212_v31 }
 0x389   : > { %1534 = vrot.lane.b32.xlu1 %v1279_v34, %s4529_s3  ;;  %1412 = vrot.lane.b32.xlu0 %v1279_v34, %s4530_s10  ;;  %v1297_v35 = vsel %vm1292_vm1, %v1279_v34, 0  ;;  %v1219_v36 = vpop.f32.mrb[4].mxu0  ;;  %v3638_v57 = vpop.f32.mrb[0].mxu1 }
 0x38a   : > { %3641 = vmatpush3.bf16.xpose.msra.mxu0 %v1297_v35  ;;  %v1220_v37 = vadd.f32 %v1219_v36, %v1035_v23  ;;  %v1221_v38 = vpop.f32.mrb[5].mxu0  ;;  %v1271_v59 = vadd.f32 %v3638_v57, %v1043_v56  ;;  %v1262_v60 = vpop.f32.mrb[1].mxu1 }
 0x38b   : > { %v1222_v39 = vadd.f32 %v1221_v38, %v1039_v25  ;;  %v1223_v40 = vpop.f32.mrb[6].mxu0  ;;  %3646 = vmatprep.subr.bf16.mxu0 %v4527_v9  ;;  %v1263_v62 = vadd.f32 %v1262_v60, %v1043_v56  ;;  %v3639_v63 = vpop.f32.mrb[2].mxu1 }
 0x38c   : > { %v1224_v41 = vadd.f32 %v1223_v40, %v1035_v23  ;;  %v1225_v42 = vpop.f32.mrb[7].mxu0  ;;  %v1274_v0 = vadd.f32 %v3639_v63, %v1043_v56  ;;  %v1265_v1 = vpop.f32.mrb[3].mxu1 }
 0x38d   : > { %1532 = vrot.lane.b32.xlu1 %v1277_v33, %s4529_s3  ;;  %1409 = vrot.lane.b32.xlu0 %v1277_v33, %s4530_s10  ;;  %v1226_v43 = vadd.f32 %v1225_v42, %v1039_v25  ;;  %v1266_v2 = vadd.f32 %v1265_v1, %v1043_v56 }
 0x38e   : > { %v1278_v44 = vpack.c.bf16 %v1224_v41, %v1220_v37  ;;  %v5112_v4 = vpack.c.bf16 %v1274_v0, %v1271_v59 }
 0x38f   : > { %v1280_v45 = vpack.c.bf16 %v1226_v43, %v1222_v39  ;;  %v5114_v5 = vpack.c.bf16 %v1266_v2, %v1263_v62 }
 0x391   : > { %1653 = vrot.lane.b32.xlu1 %v1277_v33, %s4531_s12  ;;  %1655 = vrot.lane.b32.xlu0 %v1279_v34, %s4531_s12  ;;  %v1820_v61 = vsel %vm1292_vm1, %v1280_v45, 0 }
 0x392   : > { %3643 = vmatmul.mubr.msk.bf16.vlgmr.msra.gmra.mrb[8].mxu0 %vm1292_vm1, %v1277_v33 }
 0x393   : > { %3648 = vmatprep.mubr.msk.bf16.mxu0 %vm4528_vm0, %v4527_v9  ;;  %3647 = vmatpush3.bf16.msra.mxu0 %v5114_v5 }
 0x394   : > { %3658 = vmatprep.subr.bf16.mxu0 %v4527_v9 }
 0x395   : > { %1934 = vrot.lane.b32.xlu0 %v1280_v45, %s4530_s10  ;;  %1931 = vrot.lane.b32.xlu1 %v1278_v44, %s4530_s10 }
 0x399   : > { %2056 = vrot.lane.b32.xlu0 %v1280_v45, %s4529_s3  ;;  %2054 = vrot.lane.b32.xlu1 %v1278_v44, %s4529_s3 }
 0x39d   : > { %2177 = vrot.lane.b32.xlu0 %v1280_v45, %s4531_s12  ;;  %2175 = vrot.lane.b32.xlu1 %v1278_v44, %s4531_s12  ;;  %v1807_v45 = vld [vmem:[#allocation6 + $0x1] sm:$0x1] }
 0x39e   : > { %vm1808_vm4 = vcmp.gt.f32.partialorder %v1807_v45, 0.0 }
 0x3fb   : > { %v1413_v46 = vpop.permute.xlu0 %1412  ;;  %v1535_v48 = vpop.permute.xlu1 %1534 }
 0x3fc   : > { %v1418_v47 = vsel %vm1292_vm1, %v1413_v46, 0  ;;  %v1540_v50 = vsel %vm1292_vm1, %v1535_v48, 0 }
 0x3fd   : > { %3653 = vmatpush3.bf16.xpose.msra.mxu1 %v1418_v47 }
 0x3fe   : > { %3664 = vmatprep.subr.bf16.mxu1 %v4527_v9 }
 0x3ff   : > { %v1410_v49 = vpop.permute.xlu0 %1409  ;;  %v1533_v53 = vpop.permute.xlu1 %1532 }
 0x403   : > { %v1656_v51 = vpop.permute.xlu0 %1655  ;;  %v1654_v58 = vpop.permute.xlu1 %1653 }
 0x404   : > { %3655 = vmatmul.mubr.msk.bf16.vlgmr.msra.gmra.mrb[4].mxu1 %vm1292_vm1, %v1410_v49  ;;  %v1661_v55 = vsel %vm1292_vm1, %v1656_v51, 0 }
 0x405   : > { %3665 = vmatpush3.bf16.xpose.msra.mxu1 %v1540_v50  ;;  %3666 = vmatprep.mubr.msk.bf16.mxu1 %vm4528_vm0, %v4527_v9  ;;  %v1809_v50 = vsel %vm1808_vm4, 0.0, %v4532_v16 }
 0x406   : > { %3676 = vmatprep.subr.bf16.mxu1 %v4527_v9  ;;  %v1814_v56 = vrot.slane %v1809_v50, %v5065_v20 }
 0x407   : > { %v1935_v3 = vpop.permute.xlu0 %1934  ;;  %v1932_v8 = vpop.permute.xlu1 %1931 }
 0x408   : > { %v1940_v6 = vsel %vm1292_vm1, %v1935_v3, 0 }
 0x40b   : > { %v2057_v7 = vpop.permute.xlu0 %2056  ;;  %v2055_v12 = vpop.permute.xlu1 %2054 }
 0x40c   : > { %3667 = vmatmul.mubr.msk.bf16.vlgmr.msra.gmra.mrb[8].mxu1 %vm1292_vm1, %v1533_v53  ;;  %v2062_v10 = vsel %vm1292_vm1, %v2057_v7, 0 }
 0x40d   : > { %3677 = vmatpush3.bf16.xpose.msra.mxu1 %v1661_v55  ;;  %3678 = vmatprep.mubr.msk.bf16.mxu1 %vm4528_vm0, %v4527_v9 }
 0x40e   : > { %3688 = vmatprep.subr.bf16.mxu1 %v4527_v9 }
 0x40f   : > { %v2178_v11 = vpop.permute.xlu0 %2177  ;;  %v2176_v14 = vpop.permute.xlu1 %2175 }
 0x410   : > { %v2183_v13 = vsel %vm1292_vm1, %v2178_v11, 0 }
 0x414   : > { %3679 = vmatmul.mubr.msk.bf16.vlgmr.msra.gmra.mrb[12].mxu1 %vm1292_vm1, %v1654_v58 }
 0x415   : > { %3689 = vmatpush3.bf16.xpose.msra.mxu1 %v1820_v61  ;;  %3690 = vmatprep.mubr.msk.bf16.mxu1 %vm4528_vm0, %v4527_v9 }
 0x416   : > { %3700 = vmatprep.subr.bf16.mxu1 %v4527_v9 }
 0x41c   : > { %3691 = vmatmul.mubr.msk.bf16.vlgmr.msra.gmra.mrb[16].mxu1 %vm1292_vm1, %v1278_v44 }
 0x41d   : > { %3701 = vmatpush3.bf16.xpose.msra.mxu1 %v1940_v6  ;;  %3702 = vmatprep.mubr.msk.bf16.mxu1 %vm4528_vm0, %v4527_v9 }
 0x41e   : > { %3712 = vmatprep.subr.bf16.mxu1 %v4527_v9 }
 0x424   : > { %3703 = vmatmul.mubr.msk.bf16.vlgmr.msra.gmra.mrb[20].mxu1 %vm1292_vm1, %v1932_v8 }
 0x425   : > { %3713 = vmatpush3.bf16.xpose.msra.mxu1 %v2062_v10  ;;  %3714 = vmatprep.mubr.msk.bf16.mxu1 %vm4528_vm0, %v4527_v9 }
 0x426   : > { %3724 = vmatprep.subr.bf16.mxu1 %v4527_v9 }
 0x42c   : > { %3715 = vmatmul.mubr.msk.bf16.vlgmr.msra.gmra.mrb[24].mxu1 %vm1292_vm1, %v2055_v12 }
 0x42d   : > { %3725 = vmatpush3.bf16.xpose.msra.mxu1 %v2183_v13  ;;  %3726 = vmatprep.mubr.msk.bf16.mxu1 %vm4528_vm0, %v4527_v9 }
 0x434   : > { %3727 = vmatmul.mubr.msk.bf16.vlgmr.msra.gmra.mrb[28].mxu1 %vm1292_vm1, %v2176_v14 }
 0x465   : > { %v1333_v21 = vpop.f32.mrb[8].mxu0 }
 0x466   : > { %v5134_v23 = vadd.f32 %v1333_v21, %v1290_v18  ;;  %v3644_v24 = vpop.f32.mrb[9].mxu0 }
 0x467   : > { %v1336_v25 = vpop.f32.mrb[10].mxu0 }
 0x468   : > { %v1337_v26 = vadd.f32 %v1336_v25, %v1290_v18  ;;  %v3645_v27 = vpop.f32.mrb[11].mxu0  ;;  %v1341_v28 = vsel %vm1340_vm3, %v5134_v23, -inf }
 0x469   : > { %1342 = vmax.xlane.f32.xlu0 %v1341_v28 }
 0x46a   : > { %v1344_v29 = vsel %vm1340_vm3, %v1337_v26, -inf }
 0x46b   : > { %1345 = vmax.xlane.f32.xlu1 %v1344_v29 }
 0x4d7   : > { %v1454_v30 = vpop.f32.mrb[4].mxu1 }
 0x4d8   : > { %v5139_v31 = vadd.f32 %v1454_v30, %v1290_v18  ;;  %v3656_v32 = vpop.f32.mrb[5].mxu1 }
 0x4d9   : > { %v1457_v33 = vpop.f32.mrb[6].mxu1 }
 0x4da   : > { %v5141_v34 = vadd.f32 %v1457_v33, %v1290_v18  ;;  %v3657_v35 = vpop.f32.mrb[7].mxu1  ;;  %v1461_v36 = vsel %vm1340_vm3, %v5139_v31, -inf }
 0x4db   : > { %1462 = vmax.xlane.f32.xlu0 %v1461_v36 }
 0x4dc   : > { %v1464_v37 = vsel %vm1340_vm3, %v5141_v34, -inf }
 0x4df   : > { %v1576_v38 = vpop.f32.mrb[8].mxu1  ;;  %1465 = vmax.xlane.f32.xlu0 %v1464_v37 }
 0x4e0   : > { %v5147_v39 = vadd.f32 %v1576_v38, %v1290_v18  ;;  %v3668_v40 = vpop.f32.mrb[9].mxu1 }
 0x4e1   : > { %v1579_v41 = vpop.f32.mrb[10].mxu1 }
 0x4e2   : > { %v5149_v42 = vadd.f32 %v1579_v41, %v1290_v18  ;;  %v3669_v43 = vpop.f32.mrb[11].mxu1  ;;  %v1583_v44 = vsel %vm1340_vm3, %v5147_v39, -inf }
 0x4e3   : > { %1584 = vmax.xlane.f32.xlu1 %v1583_v44 }
 0x4e4   : > { %v1586_v46 = vsel %vm1340_vm3, %v5149_v42, -inf }
 0x4e5   : > { %1587 = vmax.xlane.f32.xlu0 %v1586_v46 }
 0x4e7   : > { %v1697_v47 = vpop.f32.mrb[12].mxu1 }
 0x4e8   : > { %v5155_v48 = vadd.f32 %v1697_v47, %v1290_v18  ;;  %v3680_v49 = vpop.f32.mrb[13].mxu1 }
 0x4e9   : > { %v1700_v51 = vpop.f32.mrb[14].mxu1 }
 0x4ea   : > { %v5157_v53 = vadd.f32 %v1700_v51, %v1290_v18  ;;  %v3681_v54 = vpop.f32.mrb[15].mxu1  ;;  %v1704_v55 = vsel %vm1340_vm3, %v5155_v48, -inf }
 0x4eb   : > { %1705 = vmax.xlane.f32.xlu1 %v1704_v55 }
 0x4ec   : > { %v1707_v57 = vsel %vm1340_vm3, %v5157_v53, -inf }
 0x4ed   : > { %1708 = vmax.xlane.f32.xlu0 %v1707_v57 }
 0x4ef   : > { %v1856_v58 = vpop.f32.mrb[16].mxu1 }
 0x4f0   : > { %v5164_v59 = vadd.f32 %v1856_v58, %v1814_v56  ;;  %v3692_v60 = vpop.f32.mrb[17].mxu1 }
 0x4f1   : > { %v1859_v61 = vpop.f32.mrb[18].mxu1 }
 0x4f2   : > { %v5166_v62 = vadd.f32 %v1859_v61, %v1814_v56  ;;  %v3693_v63 = vpop.f32.mrb[19].mxu1  ;;  %v1863_v40 = vsel %vm1340_vm3, %v5164_v59, -inf }
 0x4f4   : > { %v1866_v0 = vsel %vm1340_vm3, %v5166_v62, -inf }
 0x4f5   : > { %1867 = vmax.xlane.f32.xlu0 %v1866_v0 }
 0x4f6   : > { %v1343_v36 = vpop.xlane.xlu0 %1342 }
 0x4f7   : > { %v1976_v1 = vpop.f32.mrb[20].mxu1  ;;  %v1347_v37 = vsub.f32 %v5134_v23, %v1343_v36 }
 0x4f8   : > { %v5170_v2 = vadd.f32 %v1976_v1, %v1814_v56  ;;  %v1346_v3 = vpop.xlane.xlu1 %1345  ;;  %v3704_v6 = vpop.f32.mrb[21].mxu1 }
 0x4f9   : > { %v1348_v7 = vsub.f32 %v1337_v26, %v1346_v3  ;;  %v1979_v8 = vpop.f32.mrb[22].mxu1  ;;  %v1349_v38 = vmul.f32 1.442695, %v1347_v37 }
 0x4fa   : > { %v5172_v10 = vadd.f32 %v1979_v8, %v1814_v56  ;;  %v3705_v11 = vpop.f32.mrb[23].mxu1  ;;  %v1983_v41 = vsel %vm1340_vm3, %v5170_v2, -inf }
 0x4fb   : > { %v1351_v12 = vmul.f32 1.442695, %v1348_v7 }
 0x4fc   : > { %1485 = vrot.lane.b32.xlu1 %v5114_v5, %s4530_s10  ;;  %v1986_v13 = vsel %vm1340_vm3, %v5172_v10, -inf }
 0x4fd   : > { %4043 = vpow2.f32 %v1351_v12  ;;  %1987 = vmax.xlane.f32.xlu0 %v1986_v13 }
 0x4fe   : > { %4045 = vpow2.f32 %v1349_v38 }
 0x4ff   : > { %v2098_v14 = vpop.f32.mrb[24].mxu1 }
 0x500   : > { %v5178_v15 = vadd.f32 %v2098_v14, %v1814_v56  ;;  %v3716_v16 = vpop.f32.mrb[25].mxu1 }
 0x501   : > { %v2101_v17 = vpop.f32.mrb[26].mxu1 }
 0x502   : > { %v5180_v18 = vadd.f32 %v2101_v17, %v1814_v56  ;;  %v3717_v21 = vpop.f32.mrb[27].mxu1  ;;  %v2105_v43 = vsel %vm1340_vm3, %v5178_v15, -inf }
 0x504   : > { %v2108_v24 = vsel %vm1340_vm3, %v5180_v18, -inf }
 0x505   : > { %2109 = vmax.xlane.f32.xlu0 %v2108_v24 }
 0x507   : > { %v5184_v25 = vpop.eup %4043  ;;  %v2219_v26 = vpop.f32.mrb[28].mxu1 }
 0x508   : > { %v5186_v27 = vadd.f32 %v2219_v26, %v1814_v56  ;;  %v3728_v28 = vpop.f32.mrb[29].mxu1  ;;  %v1356_v29 = vsel %vm1340_vm3, %v5184_v25, 0.0  ;;  %v5201_v44 = vpop.eup %4045 }
 0x509   : > { %v2222_v30 = vpop.f32.mrb[30].mxu1  ;;  %1357 = vadd.xlane.f32.xlu0 %v1356_v29  ;;  %v1353_v45 = vsel %vm1340_vm3, %v5201_v44, 0.0 }
 0x50a   : > { %v5190_v32 = vadd.f32 %v2222_v30, %v1814_v56  ;;  %v3729_v33 = vpop.f32.mrb[31].mxu1  ;;  %v2226_v23 = vsel %vm1340_vm3, %v5186_v27, -inf }
 0x50c   : > { %v2229_v35 = vsel %vm1340_vm3, %v5190_v32, -inf }
 0x50d   : > { %2230 = vmax.xlane.f32.xlu0 %v2229_v35 }
 0x520   : > { %1864 = vmax.xlane.f32.xlu1 %v1863_v40 }
 0x524   : > { %1984 = vmax.xlane.f32.xlu1 %v1983_v41 }
 0x528   : > { %2106 = vmax.xlane.f32.xlu1 %v2105_v43 }
 0x52c   : > { %1354 = vadd.xlane.f32.xlu1 %v1353_v45 }
 0x530   : > { %2227 = vmax.xlane.f32.xlu1 %v2226_v23 }
 0x568   : > { %v1463_v46 = vpop.xlane.xlu0 %1462 }
 0x569   : > { %v1467_v47 = vsub.f32 %v5139_v31, %v1463_v46 }
 0x56b   : > { %v1469_v49 = vmul.f32 1.442695, %v1467_v47 }
 0x56c   : > { %v1466_v50 = vpop.xlane.xlu0 %1465 }
 0x56d   : > { %4047 = vpow2.f32 %v1469_v49  ;;  %v1468_v51 = vsub.f32 %v5141_v34, %v1466_v50 }
 0x56f   : > { %v1471_v54 = vmul.f32 1.442695, %v1468_v51 }
 0x570   : > { %v1585_v31 = vpop.xlane.xlu1 %1584 }
 0x571   : > { %4049 = vpow2.f32 %v1471_v54  ;;  %v1589_v34 = vsub.f32 %v5147_v39, %v1585_v31 }
 0x572   : > { %v1588_v60 = vpop.xlane.xlu0 %1587 }
 0x573   : > { %v1590_v63 = vsub.f32 %v5149_v42, %v1588_v60  ;;  %v1591_v0 = vmul.f32 1.442695, %v1589_v34 }
 0x575   : > { %v1593_v6 = vmul.f32 1.442695, %v1590_v63  ;;  %4051 = vpow2.f32 %v1591_v0 }
 0x577   : > { %v5209_v55 = vpop.eup %4047  ;;  %4053 = vpow2.f32 %v1593_v6 }
 0x578   : > { %v1473_v56 = vsel %vm1340_vm3, %v5209_v55, 0.0  ;;  %v1706_v61 = vpop.xlane.xlu1 %1705 }
 0x579   : > { %1474 = vadd.xlane.f32.xlu1 %v1473_v56  ;;  %v1710_v1 = vsub.f32 %v5155_v48, %v1706_v61 }
 0x57a   : > { %v1709_v3 = vpop.xlane.xlu0 %1708 }
 0x57b   : > { %v5213_v57 = vpop.eup %4049  ;;  %v1712_v7 = vmul.f32 1.442695, %v1710_v1  ;;  %v1711_v8 = vsub.f32 %v5157_v53, %v1709_v3 }
 0x57c   : > { %v1476_v58 = vsel %vm1340_vm3, %v5213_v57, 0.0  ;;  %v5226_v13 = vpop.permute.xlu1 %1485 }
 0x57d   : > { %1477 = vadd.xlane.f32.xlu0 %v1476_v58  ;;  %4055 = vpow2.f32 %v1712_v7 }
 0x57f   : > { %v5228_v14 = vpop.eup %4051 }
 0x580   : > { %v1595_v53 = vsel %vm1340_vm3, %v5228_v14, 0.0 }
 0x581   : > { %v5230_v48 = vpop.eup %4053 }
 0x582   : > { %v1868_v11 = vpop.xlane.xlu0 %1867  ;;  %v1598_v29 = vsel %vm1340_vm3, %v5230_v48, 0.0 }
 0x583   : > { %v1870_v12 = vsub.f32 %v5166_v62, %v1868_v11 }
 0x585   : > { %v1873_v39 = vmul.f32 1.442695, %v1870_v12 }
 0x587   : > { %v5234_v21 = vpop.eup %4055 }
 0x588   : > { %v1716_v30 = vsel %vm1340_vm3, %v5234_v21, 0.0 }
 0x58a   : > { %1727 = vrot.lane.b32.xlu1 %v5114_v5, %s4531_s12  ;;  %v1988_v42 = vpop.xlane.xlu0 %1987 }
 0x58b   : > { %v1990_v62 = vsub.f32 %v5172_v10, %v1988_v42 }
 0x592   : > { %v2110_v16 = vpop.xlane.xlu0 %2109 }
 0x593   : > { %1606 = vrot.lane.b32.xlu0 %v5114_v5, %s4529_s3  ;;  %v1714_v5 = vmul.f32 1.442695, %v1711_v8  ;;  %v2112_v37 = vsub.f32 %v5180_v18, %v2110_v16 }
 0x595   : > { %4057 = vpow2.f32 %v1714_v5  ;;  %v2115_v43 = vmul.f32 1.442695, %v2112_v37 }
 0x596   : > { %4059 = vpow2.f32 %v1873_v39  ;;  %v1358_v36 = vpop.xlane.xlu0 %1357 }
 0x59a   : > { %v2231_v45 = vpop.xlane.xlu0 %2230 }
 0x59b   : > { %v2233_v46 = vsub.f32 %v5190_v32, %v2231_v45 }
 0x59d   : > { %v2236_v54 = vmul.f32 1.442695, %v2233_v46 }
 0x59f   : > { %v5242_v33 = vpop.eup %4057 }
 0x5a0   : > { %v1719_v40 = vsel %vm1340_vm3, %v5242_v33, 0.0  ;;  %v5248_v41 = vpop.eup %4059 }
 0x5a1   : > { %v1878_v23 = vsel %vm1340_vm3, %v5248_v41, 0.0 }
 0x5ad   : > { %v1865_v17 = vpop.xlane.xlu1 %1864 }
 0x5ae   : > { %v1869_v24 = vsub.f32 %v5164_v59, %v1865_v17  ;;  %1596 = vadd.xlane.f32.xlu1 %v1595_v53  ;;  %v1993_v59 = vmul.f32 1.442695, %v1990_v62 }
 0x5b0   : > { %v1871_v26 = vmul.f32 1.442695, %v1869_v24 }
 0x5b1   : > { %v1985_v28 = vpop.xlane.xlu1 %1984 }
 0x5b2   : > { %4061 = vpow2.f32 %v1871_v26  ;;  %v1989_v35 = vsub.f32 %v5170_v2, %v1985_v28  ;;  %1599 = vadd.xlane.f32.xlu0 %v1598_v29  ;;  %1717 = vadd.xlane.f32.xlu1 %v1716_v30 }
 0x5b4   : > { %v1991_v10 = vmul.f32 1.442695, %v1989_v35 }
 0x5b5   : > { %v2107_v38 = vpop.xlane.xlu1 %2106 }
 0x5b6   : > { %4063 = vpow2.f32 %v1991_v10  ;;  %1720 = vadd.xlane.f32.xlu0 %v1719_v40  ;;  %v2111_v7 = vsub.f32 %v5178_v15, %v2107_v38 }
 0x5b7   : > { %4065 = vpow2.f32 %v1993_v59 }
 0x5b8   : > { %4067 = vrcp.f32 %v1358_v36  ;;  %v2113_v8 = vmul.f32 1.442695, %v2111_v7 }
 0x5b9   : > { %v1355_v2 = vpop.xlane.xlu1 %1354 }
 0x5ba   : > { %1879 = vadd.xlane.f32.xlu0 %v1878_v23  ;;  %4069 = vrcp.f32 %v1355_v2 }
 0x5bb   : > { %4071 = vpow2.f32 %v2115_v43 }
 0x5bc   : > { %v5252_v18 = vpop.eup %4061 }
 0x5bd   : > { %v2228_v47 = vpop.xlane.xlu1 %2227  ;;  %v1875_v49 = vsel %vm1340_vm3, %v5252_v18, 0.0 }
 0x5be   : > { %v2232_v50 = vsub.f32 %v5186_v27, %v2228_v47  ;;  %1876 = vadd.xlane.f32.xlu1 %v1875_v49 }
 0x5c0   : > { %v5258_v51 = vpop.eup %4063  ;;  %v2234_v56 = vmul.f32 1.442695, %v2232_v50 }
 0x5c1   : > { %v1995_v58 = vsel %vm1340_vm3, %v5258_v51, 0.0  ;;  %v5262_v31 = vpop.eup %4065 }
 0x5c2   : > { %4073 = vpow2.f32 %v2234_v56  ;;  %1996 = vadd.xlane.f32.xlu0 %v1995_v58  ;;  %v4068_v34 = vpop.eup %4067  ;;  %v1998_v60 = vsel %vm1340_vm3, %v5262_v31, 0.0 }
 0x5c3   : > { %4075 = vpow2.f32 %v2236_v54  ;;  %v1362_v27 = vmul.f32 %v4068_v34, %v5184_v25 }
 0x5c4   : > { %v4070_v32 = vpop.eup %4069  ;;  %4077 = vpow2.f32 %v2113_v8 }
 0x5c5   : > { %v5266_v61 = vpop.eup %4071  ;;  %v1361_v63 = vmul.f32 %v4070_v32, %v5201_v44 }
 0x5c6   : > { %1999 = vadd.xlane.f32.xlu0 %v1998_v60  ;;  %v2120_v1 = vsel %vm1340_vm3, %v5266_v61, 0.0 }
 0x5c7   : > { %v1363_v0 = vpack.c.bf16 %v1362_v27, %v1361_v63 }
 0x5c9   : > { %3649 = vmatmul.mubr.msk.bf16.vlgmr.msra.gmra.mrb[12].mxu0 %vm1340_vm3, %v1363_v0 }
 0x5ca   : > { %2121 = vadd.xlane.f32.xlu0 %v2120_v1  ;;  %3659 = vmatpush3.bf16.msra.mxu0 %v5226_v13 }
 0x5cb   : > { %3660 = vmatprep.mubr.msk.bf16.mxu0 %vm4528_vm0, %v4527_v9  ;;  %3670 = vmatprep.subr.bf16.mxu0 %v4527_v9 }
 0x5cc   : > { %v5276_v3 = vpop.eup %4073 }
 0x5cd   : > { %v2238_v25 = vsel %vm1340_vm3, %v5276_v3, 0.0  ;;  %v5281_v44 = vpop.eup %4075 }
 0x5ce   : > { %2239 = vadd.xlane.f32.xlu0 %v2238_v25  ;;  %v2241_v6 = vsel %vm1340_vm3, %v5281_v44, 0.0  ;;  %v5290_v11 = vpop.eup %4077 }
 0x5cf   : > { %2007 = vrot.lane.b32.xlu1 %v5112_v4, %s4530_s10  ;;  %v2117_v5 = vsel %vm1340_vm3, %v5290_v11, 0.0 }
 0x5d2   : > { %2242 = vadd.xlane.f32.xlu0 %v2241_v6 }
 0x5e8   : > { %2128 = vrot.lane.b32.xlu0 %v5112_v4, %s4529_s3 }
 0x5f3   : > { %2118 = vadd.xlane.f32.xlu1 %v2117_v5 }
 0x604   : > { %2249 = vrot.lane.b32.xlu1 %v5112_v4, %s4531_s12 }
 0x606   : > { %v1475_v12 = vpop.xlane.xlu1 %1474 }
 0x607   : > { %4079 = vrcp.f32 %v1475_v12 }
 0x60a   : > { %v1478_v39 = vpop.xlane.xlu0 %1477  ;;  %v1728_v24 = vpop.permute.xlu1 %1727 }
 0x60b   : > { %4081 = vrcp.f32 %v1478_v39 }
 0x60e   : > { %v1607_v53 = vpop.permute.xlu0 %1606 }
 0x611   : > { %v4080_v13 = vpop.eup %4079 }
 0x612   : > { %v1481_v42 = vmul.f32 %v4080_v13, %v5209_v55 }
 0x615   : > { %v4082_v15 = vpop.eup %4081 }
 0x616   : > { %v1482_v16 = vmul.f32 %v4082_v15, %v5213_v57 }
 0x618   : > { %v1483_v17 = vpack.c.bf16 %v1482_v16, %v1481_v42 }
 0x61a   : > { %3661 = vmatmul.mubr.msk.bf16.vlgmr.msra.gmra.mrb[16].mxu0 %vm1340_vm3, %v1483_v17 }
 0x61b   : > { %3671 = vmatpush3.bf16.msra.mxu0 %v1607_v53  ;;  %3672 = vmatprep.mubr.msk.bf16.mxu0 %vm4528_vm0, %v4527_v9 }
 0x61c   : > { %3682 = vmatprep.subr.bf16.mxu0 %v4527_v9 }
 0x63b   : > { %v1597_v62 = vpop.xlane.xlu1 %1596 }
 0x63c   : > { %4083 = vrcp.f32 %v1597_v62 }
 0x63f   : > { %v1600_v26 = vpop.xlane.xlu0 %1599  ;;  %v1718_v28 = vpop.xlane.xlu1 %1717 }
 0x640   : > { %4085 = vrcp.f32 %v1600_v26 }
 0x643   : > { %v1721_v29 = vpop.xlane.xlu0 %1720 }
 0x644   : > { %4087 = vrcp.f32 %v1721_v29 }
 0x645   : > { %4089 = vrcp.f32 %v1718_v28 }
 0x646   : > { %v4084_v55 = vpop.eup %4083 }
 0x647   : > { %v1603_v30 = vmul.f32 %v4084_v55, %v5228_v14  ;;  %v1880_v36 = vpop.xlane.xlu0 %1879 }
 0x64a   : > { %v4086_v57 = vpop.eup %4085 }
 0x64b   : > { %v1604_v35 = vmul.f32 %v4086_v57, %v5230_v48  ;;  %v1877_v59 = vpop.xlane.xlu1 %1876 }
 0x64c   : > { %4091 = vrcp.f32 %v1877_v59 }
 0x64d   : > { %v1605_v37 = vpack.c.bf16 %v1604_v35, %v1603_v30  ;;  %4093 = vrcp.f32 %v1880_v36  ;;  %v3995_v35 = vld [vmem:[%s4979_s6] sm:$0xff]   ;;  %v3996_v36 = vld [vmem:[%s4979_s6 + $0x8] sm:$0xff]  }
 0x64e   : > { %v4088_v10 = vpop.eup %4087  ;;  %3736 = vmatprep.subr.bf16.mxu1 %v3995_v35 }
 0x64f   : > { %v1997_v38 = vpop.xlane.xlu0 %1996  ;;  %3673 = vmatmul.mubr.msk.bf16.vlgmr.msra.gmra.mrb[20].mxu0 %vm1340_vm3, %v1605_v37  ;;  %v4090_v40 = vpop.eup %4089  ;;  %v1725_v43 = vmul.f32 %v4088_v10, %v5242_v33  ;;  %3737 = vmatpush3.bf16.msra.mxu1 %v3995_v35  ;;  %v3997_v37 = vld [vmem:[%s4979_s6 + $0x10] sm:$0xff]  }
 0x650   : > { %3683 = vmatpush3.bf16.msra.mxu0 %v1728_v24  ;;  %3684 = vmatprep.mubr.msk.bf16.mxu0 %vm4528_vm0, %v4527_v9  ;;  %v1724_v14 = vmul.f32 %v4090_v40, %v5234_v21  ;;  %v2008_v54 = vpop.permute.xlu1 %2007 }
 0x651   : > { %3694 = vmatprep.subr.bf16.mxu0 %v4527_v9  ;;  %3738 = vmatprep.subr.bf16.mxu1 %v3996_v36 }
 0x652   : > { %v1726_v45 = vpack.c.bf16 %v1725_v43, %v1724_v14  ;;  %v3998_v43 = vld [vmem:[%s4979_s6 + $0x18] sm:$0xff]  }
 0x653   : > { %v2000_v48 = vpop.xlane.xlu0 %1999  ;;  %3739 = vmatpush3.bf16.msra.mxu1 %v3996_v36 }
 0x654   : > { %4095 = vrcp.f32 %v2000_v48  ;;  %3740 = vmatprep.subr.bf16.mxu1 %v3997_v37 }
 0x655   : > { %4097 = vrcp.f32 %v1997_v38 }
 0x656   : > { %v4092_v2 = vpop.eup %4091 }
 0x657   : > { %v2122_v23 = vpop.xlane.xlu0 %2121  ;;  %3685 = vmatmul.mubr.msk.bf16.vlgmr.msra.gmra.mrb[24].mxu0 %vm1340_vm3, %v1726_v45  ;;  %v4094_v46 = vpop.eup %4093  ;;  %v1883_v33 = vmul.f32 %v4092_v2, %v5252_v18  ;;  %3741 = vmatpush3.bf16.msra.mxu1 %v3997_v37  ;;  %v3999_v45 = vld [vmem:[%s4979_s6 + $0x20] sm:$0xff]   ;;  %v4000_v2 = vld [vmem:[%s4979_s6 + $0x28] sm:$0xff]  }
 0x658   : > { %3695 = vmatpush3.bf16.msra.mxu0 %v5112_v4  ;;  %3696 = vmatprep.mubr.msk.bf16.mxu0 %vm4528_vm0, %v4527_v9  ;;  %v1884_v21 = vmul.f32 %v4094_v46, %v5248_v41  ;;  %4099 = vrcp.f32 %v2122_v23  ;;  %v4001_v23 = vld [vmem:[%s4979_s6 + $0x30] sm:$0xff]  }
 0x659   : > { %3706 = vmatprep.subr.bf16.mxu0 %v4527_v9  ;;  %3742 = vmatprep.subr.bf16.mxu1 %v3998_v43 }
 0x65a   : > { %v1885_v49 = vpack.c.bf16 %v1884_v21, %v1883_v33  ;;  %v4002_v21 = vld [vmem:[%s4979_s6 + $0x38] sm:$0xff]  }
 0x65b   : > { %v2240_v47 = vpop.xlane.xlu0 %2239  ;;  %3743 = vmatpush3.bf16.msra.mxu1 %v3998_v43 }
 0x65c   : > { %3744 = vmatprep.subr.bf16.mxu1 %v3999_v45 }
 0x65e   : > { %v4096_v50 = vpop.eup %4095 }
 0x65f   : > { %3697 = vmatmul.mubr.msk.bf16.vlgmr.msra.gmra.mrb[28].mxu0 %vm1340_vm3, %v1885_v49  ;;  %v4098_v56 = vpop.eup %4097  ;;  %v2004_v4 = vmul.f32 %v4096_v50, %v5262_v31  ;;  %v2243_v58 = vpop.xlane.xlu0 %2242  ;;  %3745 = vmatpush3.bf16.msra.mxu1 %v3999_v45 }
 0x660   : > { %3707 = vmatpush3.bf16.msra.mxu0 %v2008_v54  ;;  %3708 = vmatprep.mubr.msk.bf16.mxu0 %vm4528_vm0, %v4527_v9  ;;  %v2003_v18 = vmul.f32 %v4098_v56, %v5258_v51 }
 0x661   : > { %3718 = vmatprep.subr.bf16.mxu0 %v4527_v9  ;;  %3746 = vmatprep.subr.bf16.mxu1 %v4000_v2 }
 0x662   : > { %v2005_v34 = vpack.c.bf16 %v2004_v4, %v2003_v18  ;;  %v4100_v31 = vpop.eup %4099 }
 0x663   : > { %v2129_v41 = vpop.permute.xlu0 %2128  ;;  %v2126_v27 = vmul.f32 %v4100_v31, %v5266_v61  ;;  %3747 = vmatpush3.bf16.msra.mxu1 %v4000_v2  ;;  %v4142_v2 = vld [vmem:[#allocation2 + $0x18] sm:$0xff] }
 0x664   : > { %3748 = vmatprep.subr.bf16.mxu1 %v4001_v23 }
 0x667   : > { %3709 = vmatmul.mubr.msk.bf16.vlgmr.msra.gmra.mrb[32].mxu0 %vm1340_vm3, %v2005_v34  ;;  %3749 = vmatpush3.bf16.msra.mxu1 %v4001_v23 }
 0x668   : > { %3719 = vmatpush3.bf16.msra.mxu0 %v2129_v41  ;;  %3720 = vmatprep.mubr.msk.bf16.mxu0 %vm4528_vm0, %v4527_v9 }
 0x669   : > { %3730 = vmatprep.subr.bf16.mxu0 %v4527_v9  ;;  %3750 = vmatprep.subr.bf16.mxu1 %v4002_v21 }
 0x66b   : > { %3751 = vmatpush3.bf16.msra.mxu1 %v4002_v21  ;;  %v4008_v21 = vld [vmem:[%s4981_s8 + $0x14] ss:$8 sps:$4 sm:$0xff]  }
 0x680   : > { %v2119_v32 = vpop.xlane.xlu1 %2118 }
 0x681   : > { %4101 = vrcp.f32 %v2119_v32 }
 0x682   : > { %4103 = vrcp.f32 %v2243_v58 }
 0x683   : > { %4105 = vrcp.f32 %v2240_v47 }
 0x684   : > { %v2250_v1 = vpop.permute.xlu1 %2249 }
 0x68b   : > { %v4102_v60 = vpop.eup %4101 }
 0x68c   : > { %v2125_v51 = vmul.f32 %v4102_v60, %v5290_v11  ;;  %v4104_v0 = vpop.eup %4103 }
 0x68d   : > { %v4106_v25 = vpop.eup %4105  ;;  %v2247_v6 = vmul.f32 %v4104_v0, %v5281_v44 }
 0x68e   : > { %v2127_v63 = vpack.c.bf16 %v2126_v27, %v2125_v51  ;;  %v2246_v7 = vmul.f32 %v4106_v25, %v5276_v3 }
 0x690   : > { %3721 = vmatmul.mubr.msk.bf16.vlgmr.msra.gmra.mrb[36].mxu0 %vm1340_vm3, %v2127_v63  ;;  %v2248_v8 = vpack.c.bf16 %v2247_v6, %v2246_v7 }
 0x691   : > { %3731 = vmatpush3.bf16.msra.mxu0 %v2250_v1  ;;  %3732 = vmatprep.mubr.msk.bf16.mxu0 %vm4528_vm0, %v4527_v9 }
 0x698   : > { %3733 = vmatmul.mubr.msk.bf16.vlgmr.msra.gmra.mrb[40].mxu0 %vm1340_vm3, %v2248_v8 }
 0x699   : > { %2661 = vmatprep.mubr.bf16.mxu0 %v4526_v52 }
 0x69c   : > { %v5336_v61 = vpop.f32.mrb[12].mxu0 }
 0x69d   : > { %v3650_v11 = vpop.f32.mrb[13].mxu0 }
 0x69e   : > { %v5338_v5 = vpop.f32.mrb[14].mxu0 }
 0x69f   : > { %v3651_v12 = vpop.f32.mrb[15].mxu0 }
 0x6ed   : > { %v1525_v39 = vpop.f32.mrb[16].mxu0 }
 0x6ee   : > { %v3662_v13 = vpop.f32.mrb[17].mxu0 }
 0x6ef   : > { %v1528_v15 = vpop.f32.mrb[18].mxu0 }
 0x6f0   : > { %v3933_v42 = vpack.i.bf16 %v1528_v15, %v1525_v39  ;;  %v3663_v9 = vpop.f32.mrb[19].mxu0 }
 0x6f2   : > { %3934 = vrot.lane.b32.xlu1 %v3933_v42, %s4531_s12 }
 0x722   : > { %v1646_v3 = vpop.f32.mrb[20].mxu0 }
 0x723   : > { %v3674_v44 = vpop.f32.mrb[21].mxu0 }
 0x724   : > { %v1649_v16 = vpop.f32.mrb[22].mxu0 }
 0x725   : > { %v3938_v17 = vpack.i.bf16 %v1649_v16, %v1646_v3  ;;  %v3675_v53 = vpop.f32.mrb[23].mxu0 }
 0x727   : > { %3939 = vrot.lane.b32.xlu1 %v3938_v17, %s4529_s3 }
 0x72a   : > { %v1767_v24 = vpop.f32.mrb[24].mxu0 }
 0x72b   : > { %v3686_v62 = vpop.f32.mrb[25].mxu0 }
 0x72c   : > { %v1770_v26 = vpop.f32.mrb[26].mxu0 }
 0x72d   : > { %v3943_v28 = vpack.i.bf16 %v1770_v26, %v1767_v24  ;;  %v3687_v29 = vpop.f32.mrb[27].mxu0 }
 0x72e   : > { %v3468_v29 = vld [vmem:[%s892_s26] ss:$0 sm:$0xff]  ;;  %s5670_s26 = scalar_lea.vmem %s5669_s20, %s4991_s2 }
 0x72f   : > { %3944 = vrot.lane.b32.xlu1 %v3943_v28, %s4530_s10 }
 0x732   : > { %v5343_v55 = vpop.f32.mrb[28].mxu0 }
 0x733   : > { %v3698_v57 = vpop.f32.mrb[29].mxu0 }
 0x734   : > { %v5345_v30 = vpop.f32.mrb[30].mxu0 }
 0x735   : > { %v3699_v59 = vpop.f32.mrb[31].mxu0 }
 0x73a   : > { %v2047_v10 = vpop.f32.mrb[32].mxu0 }
 0x73b   : > { %v3710_v38 = vpop.f32.mrb[33].mxu0 }
 0x73c   : > { %v2050_v40 = vpop.f32.mrb[34].mxu0 }
 0x73d   : > { %v3948_v14 = vpack.i.bf16 %v2050_v40, %v2047_v10  ;;  %v3711_v48 = vpop.f32.mrb[35].mxu0  ;;  %v4139_v10 = vld [vmem:[#allocation2] sm:$0xff]  ;;  %v4140_v40 = vld [vmem:[#allocation2 + $0x8] sm:$0xff] }
 0x73e   : > { %v4141_v48 = vld [vmem:[#allocation2 + $0x10] sm:$0xff] }
 0x73f   : > { %3949 = vrot.lane.b32.xlu1 %v3948_v14, %s4531_s12 }
 0x763   : > { %v2168_v46 = vpop.f32.mrb[36].mxu0 }
 0x764   : > { %v3722_v33 = vpop.f32.mrb[37].mxu0  ;;  %v3935_v34 = vpop.permute.xlu1 %3934 }
 0x765   : > { %v2171_v47 = vpop.f32.mrb[38].mxu0  ;;  %v3937_v32 = vunpack.i.h.bf16 %v3935_v34  ;;  %v3936_v31 = vunpack.i.l.bf16 %v3935_v34  ;;  %v4005_v33 = vld [vmem:[%s4981_s8 + $0x4] ss:$8 sps:$4 sm:$0xff]  }
 0x766   : > { %v3953_v49 = vpack.i.bf16 %v2171_v47, %v2168_v46  ;;  %v3723_v50 = vpop.f32.mrb[39].mxu0  ;;  %v4003_v46 = vld [vmem:[%s4981_s8] ss:$8 sps:$4 sm:$0xff]   ;;  %2629 = vmatprep.subr.bf16.mxu0 %v4005_v33  ;;  %v4006_v47 = vld [vmem:[%s4981_s8 + $0x10] ss:$8 sps:$4 sm:$0xff]  }
 0x767   : > { %v1799_v63 = vsel %vm1292_vm1, %v5338_v5, %v3937_v32  ;;  %v1798_v0 = vsel %vm1292_vm1, %v5336_v61, %v3936_v31  ;;  %2630 = vmatpush1.bf16.msra.mxu0 %v4003_v46 }
 0x768   : > { %3954 = vrot.lane.b32.xlu0 %v3953_v49, %s4529_s3  ;;  %2631 = vmatprep.subr.bf16.mxu0 %v4008_v21 }
 0x76b   : > { %v2289_v54 = vpop.f32.mrb[40].mxu0  ;;  %2632 = vmatpush1.bf16.msra.mxu0 %v4006_v47 }
 0x76c   : > { %v3734_v56 = vpop.f32.mrb[41].mxu0 }
 0x76d   : > { %v2292_v4 = vpop.f32.mrb[42].mxu0 }
 0x76e   : > { %v3958_v58 = vpack.i.bf16 %v2292_v4, %v2289_v54  ;;  %v3735_v18 = vpop.f32.mrb[43].mxu0 }
 0x770   : > { %3959 = vrot.lane.b32.xlu1 %v3958_v58, %s4530_s10 }
 0x799   : > { %v3940_v41 = vpop.permute.xlu1 %3939 }
 0x79a   : > { %v3942_v60 = vunpack.i.h.bf16 %v3940_v41  ;;  %v3941_v27 = vunpack.i.l.bf16 %v3940_v41 }
 0x79c   : > { %v1802_v6 = vsel %vm1800_vm5, %v1799_v63, %v3942_v60  ;;  %v1801_v7 = vsel %vm1800_vm5, %v1798_v0, %v3941_v27 }
 0x7a1   : > { %v3945_v51 = vpop.permute.xlu1 %3944 }
 0x7a2   : > { %v3947_v1 = vunpack.i.h.bf16 %v3945_v51  ;;  %v3946_v25 = vunpack.i.l.bf16 %v3945_v51 }
 0x7a4   : > { %v1804_v8 = vsel %vm1803_vm6, %v1801_v7, %v3946_v25  ;;  %v1805_v11 = vsel %vm1803_vm6, %v1802_v6, %v3947_v1  ;;  %v4011_v1 = vld [vmem:[%s4981_s8 + $0x24] ss:$8 sps:$4 sm:$0xff]   ;;  %v4009_v25 = vld [vmem:[%s4981_s8 + $0x20] ss:$8 sps:$4 sm:$0xff]   ;;  %v4014_v6 = vld [vmem:[%s4981_s8 + $0x34] ss:$8 sps:$4 sm:$0xff]  }
 0x7a5   : > { %v2342_v12 = vpack.c.bf16 %v1805_v11, %v1804_v8  ;;  %2633 = vmatprep.subr.bf16.mxu0 %v4011_v1  ;;  %v4012_v7 = vld [vmem:[%s4981_s8 + $0x30] ss:$8 sps:$4 sm:$0xff]   ;;  %v4017_v8 = vld [vmem:[%s4981_s8 + $0x44] ss:$8 sps:$4 sm:$0xff]   ;;  %v4015_v11 = vld [vmem:[%s4981_s8 + $0x40] ss:$8 sps:$4 sm:$0xff]  }
 0x7a6   : > { %2634 = vmatpush1.bf16.msra.mxu0 %v4009_v25 }
 0x7a7   : > { %3752 = vmatprep.mubr.bf16.mxu1 %v2342_v12  ;;  %2635 = vmatprep.subr.bf16.mxu0 %v4014_v6  ;;  %v4020_v12 = vld [vmem:[%s4981_s8 + $0x54] ss:$8 sps:$4 sm:$0xff]  }
 0x7aa   : > { %2636 = vmatpush1.bf16.msra.mxu0 %v4012_v7 }
 0x7ab   : > { %2637 = vmatprep.subr.bf16.mxu0 %v4017_v8 }
 0x7ae   : > { %2638 = vmatpush1.bf16.msra.mxu0 %v4015_v11 }
 0x7af   : > { %2639 = vmatprep.subr.bf16.mxu0 %v4020_v12 }
 0x7b1   : > { %v3950_v39 = vpop.permute.xlu1 %3949 }
 0x7b2   : > { %v3952_v15 = vunpack.i.h.bf16 %v3950_v39  ;;  %v3951_v5 = vunpack.i.l.bf16 %v3950_v39  ;;  %v4018_v39 = vld [vmem:[%s4981_s8 + $0x50] ss:$8 sps:$4 sm:$0xff]  }
 0x7b3   : > { %2640 = vmatpush1.bf16.msra.mxu0 %v4018_v39 }
 0x7b4   : > { %v2321_v3 = vsel %vm1292_vm1, %v5345_v30, %v3952_v15  ;;  %v2320_v44 = vsel %vm1292_vm1, %v5343_v55, %v3951_v5  ;;  %v4023_v15 = vld [vmem:[%s4981_s8 + $0x64] ss:$8 sps:$4 sm:$0xff]   ;;  %v4026_v5 = vld [vmem:[%s4981_s8 + $0x74] ss:$8 sps:$4 sm:$0xff]  }
 0x7b5   : > { %2641 = vmatprep.subr.bf16.mxu0 %v4023_v15 }
 0x7da   : > { %v3955_v13 = vpop.permute.xlu0 %3954 }
 0x7db   : > { %v3957_v42 = vunpack.i.h.bf16 %v3955_v13  ;;  %v3956_v9 = vunpack.i.l.bf16 %v3955_v13  ;;  %v4021_v13 = vld [vmem:[%s4981_s8 + $0x60] ss:$8 sps:$4 sm:$0xff]  }
 0x7dc   : > { %2642 = vmatpush1.bf16.msra.mxu0 %v4021_v13 }
 0x7dd   : > { %v2323_v53 = vsel %vm1800_vm5, %v2321_v3, %v3957_v42  ;;  %v2322_v24 = vsel %vm1800_vm5, %v2320_v44, %v3956_v9  ;;  %v4024_v42 = vld [vmem:[%s4981_s8 + $0x70] ss:$8 sps:$4 sm:$0xff]   ;;  %2643 = vmatprep.subr.bf16.mxu0 %v4026_v5 }
 0x7e0   : > { %2644 = vmatpush1.bf16.msra.mxu0 %v4024_v42 }
 0x7e2   : > { %v3960_v61 = vpop.permute.xlu1 %3959 }
 0x7e3   : > { %v3962_v16 = vunpack.i.h.bf16 %v3960_v61  ;;  %v3961_v17 = vunpack.i.l.bf16 %v3960_v61 }
 0x7e5   : > { %v2325_v62 = vsel %vm1803_vm6, %v2323_v53, %v3962_v16  ;;  %v2324_v26 = vsel %vm1803_vm6, %v2322_v24, %v3961_v17 }
 0x7e6   : > { %v2343_v28 = vpack.c.bf16 %v2325_v62, %v2324_v26 }
 0x7e8   : > { %3753 = vmatmul.mubr.bf16.vlgmr.msra.gmra.mrb[32].mxu1 %v2343_v28 }
 0x8bb   : > { %v3754_v57 = vpop.f32.mrb[32].mxu1 }
 0x8bc   : > { %v2433_v30 = vpop.f32.mrb[33].mxu1  ;;  %v2442_v59 = vadd.f32 %v3754_v57, %v3468_v29 }
 0x8bd   : > { %v2434_v55 = vadd.f32 %v3468_v29, %v2433_v30  ;;  %v3755_v35 = vpop.f32.mrb[34].mxu1  ;;  %v3477_v30 = vld [vmem:[%s5670_s26] ss:$0 sm:$0xff] }
 0x8be   : > { %v2436_v36 = vpop.f32.mrb[35].mxu1  ;;  %v2445_v14 = vadd.f32 %v3755_v35, %v3468_v29  ;;  %v2450_v45 = vadd.f32 %v4141_v48, %v2442_v59 }
 0x8bf   : > { %v2437_v37 = vadd.f32 %v3468_v29, %v2436_v36  ;;  %v2448_v38 = vadd.f32 %v4139_v10, %v2434_v55  ;;  %v3478_v10 = vld [vmem:[%s5672_s27] ss:$0 sm:$0xff] }
 0x8c0   : > { %v2451_v23 = vadd.f32 %v4142_v2, %v2445_v14 }
 0x8c1   : > { %2454 = vadd.xlane.f32.xlu0 %v2448_v38  ;;  %v2449_v43 = vadd.f32 %v4140_v40, %v2437_v37 }
 0x8c3   : > { %2456 = vadd.xlane.f32.xlu1 %v2449_v43 }
 0x8c5   : > { %2458 = vadd.xlane.f32.xlu0 %v2450_v45 }
 0x8c9   : > { %2460 = vadd.xlane.f32.xlu0 %v2451_v23 }
 0x94e   : > { %v2455_v49 = vpop.xlane.xlu0 %2454 }
 0x94f   : > { %v2463_v50 = vmul.f32 0.0078125, %v2455_v49  ;;  %v4027_v49 = vld [vmem:[%s4983_s30 + $0x40] sm:$0xff]  }
 0x950   : > { %v2457_v54 = vpop.xlane.xlu1 %2456  ;;  %3583 = vmatprep.subr.bf16.mxu1 %v4027_v49 }
 0x951   : > { %v2467_v56 = vsub.f32 %v2448_v38, %v2463_v50  ;;  %v2464_v4 = vmul.f32 0.0078125, %v2457_v54  ;;  %v4028_v50 = vld [vmem:[%s4983_s30] sm:$0xff]   ;;  %v4029_v54 = vld [vmem:[%s4983_s30 + $0x48] sm:$0xff]  }
 0x952   : > { %v2459_v58 = vpop.xlane.xlu0 %2458  ;;  %3584 = vmatpush3.bf16.msra.mxu1 %v4028_v50 }
 0x953   : > { %v2468_v18 = vsub.f32 %v2449_v43, %v2464_v4  ;;  %v2465_v34 = vmul.f32 0.0078125, %v2459_v58  ;;  %v2471_v41 = vmul.f32 %v2467_v56, %v2467_v56  ;;  %3585 = vmatprep.subr.bf16.mxu1 %v4029_v54  ;;  %v4032_v4 = vld [vmem:[%s4983_s30 + $0x10] sm:$0xff]   ;;  %v4033_v58 = vld [vmem:[%s4983_s30 + $0x58] sm:$0xff]  }
 0x955   : > { %v2469_v32 = vsub.f32 %v2450_v45, %v2465_v34  ;;  %2475 = vadd.xlane.f32.xlu1 %v2471_v41  ;;  %v2472_v31 = vmul.f32 %v2468_v18, %v2468_v18  ;;  %v4035_v34 = vld [vmem:[%s4983_s30 + $0x60] sm:$0xff]  }
 0x956   : > { %v2461_v60 = vpop.xlane.xlu0 %2460  ;;  %v4036_v41 = vld [vmem:[%s4983_s30 + $0x20] sm:$0xff]  }
 0x957   : > { %v2466_v27 = vmul.f32 0.0078125, %v2461_v60  ;;  %2477 = vadd.xlane.f32.xlu0 %v2472_v31  ;;  %v2473_v51 = vmul.f32 %v2469_v32, %v2469_v32  ;;  %v4038_v31 = vld [vmem:[%s4983_s30 + $0x28] sm:$0xff]   ;;  %v4039_v60 = vld [vmem:[%s4983_s30 + $0x70] sm:$0xff]  }
 0x959   : > { %v2470_v63 = vsub.f32 %v2451_v23, %v2466_v27  ;;  %2479 = vadd.xlane.f32.xlu1 %v2473_v51  ;;  %v4040_v27 = vld [vmem:[%s4983_s30 + $0x30] sm:$0xff]   ;;  %v4041_v51 = vld [vmem:[%s4983_s30 + $0x78] sm:$0xff]  }
 0x95b   : > { %v2474_v0 = vmul.f32 %v2470_v63, %v2470_v63 }
 0x95d   : > { %2481 = vadd.xlane.f32.xlu0 %v2474_v0  ;;  %v2537_v0 = vld [vmem:[%s5015_s24] sm:$0x3] }
 0x95e   : > { %v2542_v1 = vrot.slane %v2537_v0, %v5065_v20  ;;  %v2546_v25 = vrot.slane %v2537_v0, %v1038_v22 }
 0x9e2   : > { %v2476_v9 = vpop.xlane.xlu1 %2475 }
 0x9e3   : > { %v2483_v61 = vmul.f32 0.0078125, %v2476_v9 }
 0x9e4   : > { %v2478_v3 = vpop.xlane.xlu0 %2477 }
 0x9e5   : > { %v2487_v44 = vadd.f32 1e-12, %v2483_v61  ;;  %v2484_v16 = vmul.f32 0.0078125, %v2478_v3 }
 0x9e6   : > { %v2480_v17 = vpop.xlane.xlu1 %2479 }
 0x9e7   : > { %4107 = vrsqrt.f32 %v2487_v44  ;;  %v2488_v53 = vadd.f32 1e-12, %v2484_v16  ;;  %v2485_v24 = vmul.f32 0.0078125, %v2480_v17 }
 0x9e9   : > { %4109 = vrsqrt.f32 %v2488_v53  ;;  %v2489_v62 = vadd.f32 1e-12, %v2485_v24 }
 0x9ea   : > { %v2482_v26 = vpop.xlane.xlu0 %2481 }
 0x9eb   : > { %4111 = vrsqrt.f32 %v2489_v62  ;;  %v2486_v28 = vmul.f32 0.0078125, %v2482_v26 }
 0x9ed   : > { %v2490_v29 = vadd.f32 1e-12, %v2486_v28 }
 0x9ef   : > { %4113 = vrsqrt.f32 %v2490_v29 }
 0x9f1   : > { %v4108_v57 = vpop.eup %4107 }
 0x9f2   : > { %v2495_v55 = vmul.f32 %v4108_v57, %v2467_v56  ;;  %v4030_v56 = vld [vmem:[%s4983_s30 + $0x8] sm:$0xff]  }
 0x9f3   : > { %v4110_v35 = vpop.eup %4109  ;;  %3586 = vmatpush3.bf16.msra.mxu1 %v4030_v56 }
 0x9f4   : > { %v2496_v36 = vmul.f32 %v4110_v35, %v2468_v18  ;;  %v2505_v59 = vmul.f32 %v3477_v30, %v2495_v55  ;;  %v4034_v18 = vld [vmem:[%s4983_s30 + $0x18] sm:$0xff]  }
 0x9f5   : > { %v4112_v37 = vpop.eup %4111 }
 0x9f6   : > { %v2506_v38 = vmul.f32 %v3477_v30, %v2496_v36  ;;  %v5405_v40 = vadd.f32 %v3478_v10, %v2505_v59  ;;  %v2497_v14 = vmul.f32 %v4112_v37, %v2469_v32  ;;  %v4037_v32 = vld [vmem:[%s4983_s30 + $0x68] sm:$0xff]  }
 0x9f8   : > { %v5407_v43 = vadd.f32 %v3478_v10, %v2506_v38  ;;  %v2507_v23 = vmul.f32 %v3477_v30, %v2497_v14 }
 0x9f9   : > { %v4114_v48 = vpop.eup %4113 }
 0x9fa   : > { %v2535_v45 = vpack.c.bf16 %v5407_v43, %v5405_v40  ;;  %v2498_v2 = vmul.f32 %v4114_v48, %v2470_v63  ;;  %v5414_v21 = vadd.f32 %v3478_v10, %v2507_v23  ;;  %v4042_v63 = vld [vmem:[%s4983_s30 + $0x38] sm:$0xff]  }
 0x9fc   : > { %2662 = vmatmul.mubr.bf16.vlgmr.msra.gmra.mrb[44].mxu0 %v2535_v45  ;;  %v2508_v46 = vmul.f32 %v3477_v30, %v2498_v2 }
 0x9fd   : > { %2671 = vmatprep.mubr.bf16.mxu0 %v4526_v52  ;;  %v4031_v52 = vld [vmem:[%s4983_s30 + $0x50] sm:$0xff]  }
 0x9fe   : > { %v5412_v33 = vadd.f32 %v3478_v10, %v2508_v46  ;;  %3587 = vmatprep.subr.bf16.mxu1 %v4031_v52 }
 0x9ff   : > { %3588 = vmatpush3.bf16.msra.mxu1 %v4032_v4 }
 0xa00   : > { %v2536_v47 = vpack.c.bf16 %v5412_v33, %v5414_v21  ;;  %3589 = vmatprep.subr.bf16.mxu1 %v4033_v58 }
 0xa03   : > { %3590 = vmatpush3.bf16.msra.mxu1 %v4034_v18 }
 0xa04   : > { %2672 = vmatmul.mubr.bf16.gmra.mrb[48].mxu0 %v2536_v47  ;;  %3591 = vmatprep.subr.bf16.mxu1 %v4035_v34 }
 0xa07   : > { %3592 = vmatpush3.bf16.msra.mxu1 %v4036_v41 }
 0xa08   : > { %3593 = vmatprep.subr.bf16.mxu1 %v4037_v32 }
 0xa0b   : > { %3594 = vmatpush3.bf16.msra.mxu1 %v4038_v31 }
 0xa0c   : > { %3595 = vmatprep.subr.bf16.mxu1 %v4039_v60 }
 0xa0f   : > { %3596 = vmatpush3.bf16.msra.mxu1 %v4040_v27 }
 0xa10   : > { %3597 = vmatprep.subr.bf16.mxu1 %v4041_v51 }
 0xa13   : > { %3598 = vmatpush3.bf16.msra.mxu1 %v4042_v63 }
 0xacf   : > { %v2663_v6 = vpop.f32.mrb[44].mxu0 }
 0xad0   : > { %v5438_v7 = vadd.f32 %v2663_v6, %v2542_v1  ;;  %v2665_v8 = vpop.f32.mrb[45].mxu0 }
 0xad1   : > { %v5440_v11 = vadd.f32 %v2665_v8, %v2546_v25  ;;  %v2667_v12 = vpop.f32.mrb[46].mxu0 }
 0xad2   : > { %v2690_v39 = vmul.f32 0.044715, %v5438_v7  ;;  %v5443_v13 = vadd.f32 %v2667_v12, %v2542_v1  ;;  %v2669_v15 = vpop.f32.mrb[47].mxu0  ;;  %v2682_v12 = vmul.f32 0.5, %v5438_v7 }
 0xad3   : > { %v2691_v5 = vmul.f32 0.044715, %v5440_v11  ;;  %v5446_v42 = vadd.f32 %v2669_v15, %v2546_v25 }
 0xad4   : > { %v2698_v20 = vmul.f32 %v2690_v39, %v5438_v7  ;;  %v2692_v19 = vmul.f32 0.044715, %v5443_v13  ;;  %v2684_v39 = vmul.f32 0.5, %v5443_v13 }
 0xad5   : > { %v2699_v22 = vmul.f32 %v2691_v5, %v5440_v11  ;;  %v2693_v9 = vmul.f32 0.044715, %v5446_v42  ;;  %v2683_v5 = vmul.f32 0.5, %v5440_v11 }
 0xad6   : > { %v2706_v61 = vmul.f32 %v2698_v20, %v5438_v7  ;;  %v2700_v3 = vmul.f32 %v2692_v19, %v5443_v13  ;;  %v2685_v20 = vmul.f32 0.5, %v5446_v42 }
 0xad7   : > { %v2707_v44 = vmul.f32 %v2699_v22, %v5440_v11  ;;  %v2701_v16 = vmul.f32 %v2693_v9, %v5446_v42  ;;  %v2673_v17 = vpop.f32.mrb[48].mxu0 }
 0xad8   : > { %v2714_v53 = vadd.f32 %v2706_v61, %v5438_v7  ;;  %v2708_v24 = vmul.f32 %v2700_v3, %v5443_v13  ;;  %v5458_v62 = vadd.f32 %v2673_v17, %v2542_v1  ;;  %v2675_v26 = vpop.f32.mrb[49].mxu0 }
 0xad9   : > { %v2709_v28 = vmul.f32 %v2701_v16, %v5446_v42  ;;  %v5461_v29 = vadd.f32 %v2675_v26, %v2546_v25  ;;  %v2677_v57 = vpop.f32.mrb[50].mxu0  ;;  %v2715_v30 = vadd.f32 %v2707_v44, %v5440_v11 }
 0xada   : > { %v2722_v55 = vmul.f32 0.7978846, %v2714_v53  ;;  %v2716_v35 = vadd.f32 %v2708_v24, %v5443_v13  ;;  %v2694_v36 = vmul.f32 0.044715, %v5458_v62  ;;  %v2678_v59 = vadd.f32 %v2677_v57, %v2542_v1  ;;  %v2679_v37 = vpop.f32.mrb[51].mxu0 }
 0xadb   : > { %v2695_v10 = vmul.f32 0.044715, %v5461_v29  ;;  %v2680_v38 = vadd.f32 %v2679_v37, %v2546_v25  ;;  %v2717_v14 = vadd.f32 %v2709_v28, %v5446_v42  ;;  %v2723_v48 = vmul.f32 0.7978846, %v2715_v30 }
 0xadc   : > { %4115 = vtanh.f32 %v2722_v55  ;;  %v2724_v45 = vmul.f32 0.7978846, %v2716_v35  ;;  %v2702_v2 = vmul.f32 %v2694_v36, %v5458_v62  ;;  %v2696_v23 = vmul.f32 0.044715, %v2678_v59 }
 0xadd   : > { %v2703_v46 = vmul.f32 %v2695_v10, %v5461_v29  ;;  %v2697_v47 = vmul.f32 0.044715, %v2680_v38  ;;  %v2725_v49 = vmul.f32 0.7978846, %v2717_v14  ;;  %4117 = vtanh.f32 %v2723_v48 }
 0xade   : > { %4119 = vtanh.f32 %v2724_v45  ;;  %v2710_v50 = vmul.f32 %v2702_v2, %v5458_v62  ;;  %v2704_v54 = vmul.f32 %v2696_v23, %v2678_v59  ;;  %v2686_v11 = vmul.f32 0.5, %v5458_v62 }
 0xadf   : > { %v2711_v56 = vmul.f32 %v2703_v46, %v5461_v29  ;;  %v2705_v52 = vmul.f32 %v2697_v47, %v2680_v38  ;;  %4121 = vtanh.f32 %v2725_v49  ;;  %v2688_v13 = vmul.f32 0.5, %v2678_v59 }
 0xae0   : > { %v2712_v4 = vmul.f32 %v2704_v54, %v2678_v59  ;;  %v2718_v58 = vadd.f32 %v2710_v50, %v5458_v62  ;;  %v2687_v57 = vmul.f32 0.5, %v5461_v29  ;;  %v2689_v30 = vmul.f32 0.5, %v2680_v38  ;;  %v3495_v62 = vld [vmem:[%s905_s18] ss:$0 sm:$0xff] }
 0xae1   : > { %v2713_v18 = vmul.f32 %v2705_v52, %v2680_v38  ;;  %v2719_v34 = vadd.f32 %v2711_v56, %v5461_v29 }
 0xae2   : > { %v2720_v41 = vadd.f32 %v2712_v4, %v2678_v59  ;;  %v2726_v32 = vmul.f32 0.7978846, %v2718_v58 }
 0xae3   : > { %v2721_v31 = vadd.f32 %v2713_v18, %v2680_v38  ;;  %v2727_v60 = vmul.f32 0.7978846, %v2719_v34 }
 0xae4   : > { %v2728_v27 = vmul.f32 0.7978846, %v2720_v41  ;;  %4123 = vtanh.f32 %v2726_v32 }
 0xae5   : > { %v2729_v51 = vmul.f32 0.7978846, %v2721_v31  ;;  %4125 = vtanh.f32 %v2727_v60 }
 0xae6   : > { %v4116_v63 = vpop.eup %4115  ;;  %4127 = vtanh.f32 %v2728_v27 }
 0xae7   : > { %v4118_v0 = vpop.eup %4117  ;;  %v2738_v1 = vadd.f32 1.0, %v4116_v63  ;;  %4129 = vtanh.f32 %v2729_v51 }
 0xae8   : > { %v4120_v25 = vpop.eup %4119  ;;  %v2739_v6 = vadd.f32 1.0, %v4118_v0 }
 0xae9   : > { %v4122_v8 = vpop.eup %4121  ;;  %v2740_v15 = vadd.f32 1.0, %v4120_v25  ;;  %v2746_v22 = vmul.f32 %v2738_v1, %v2682_v12 }
 0xaea   : > { %v2741_v19 = vadd.f32 1.0, %v4122_v8  ;;  %v2747_v61 = vmul.f32 %v2739_v6, %v2683_v5 }
 0xaeb   : > { %v2748_v9 = vmul.f32 %v2740_v15, %v2684_v39 }
 0xaec   : > { %v2749_v3 = vmul.f32 %v2741_v19, %v2685_v20 }
 0xaed   : > { %v2786_v44 = vpack.c.bf16 %v2748_v9, %v2746_v22 }
 0xaee   : > { %v4124_v16 = vpop.eup %4123  ;;  %v2787_v17 = vpack.c.bf16 %v2749_v3, %v2747_v61 }
 0xaef   : > { %v4126_v53 = vpop.eup %4125  ;;  %v2742_v24 = vadd.f32 1.0, %v4124_v16 }
 0xaf0   : > { %v4128_v26 = vpop.eup %4127  ;;  %2925 = vmatprep.mubr.bf16.mxu1 %v2787_v17  ;;  %v2743_v7 = vadd.f32 1.0, %v4126_v53 }
 0xaf1   : > { %v4130_v28 = vpop.eup %4129  ;;  %2926 = vmatmul.mubr.bf16.vlgmr.msra.gmra.mrb[36].mxu1 %v2786_v44  ;;  %v2744_v42 = vadd.f32 1.0, %v4128_v26  ;;  %v2750_v35 = vmul.f32 %v2742_v24, %v2686_v11 }
 0xaf2   : > { %v2745_v55 = vadd.f32 1.0, %v4130_v28  ;;  %v2751_v37 = vmul.f32 %v2743_v7, %v2687_v57  ;;  %v3512_v7 = vld [vmem:[%s908_s15] ss:$0 sm:$0xff]  ;;  %s5676_s15 = sld [smem:[#allocation24_spill]] }
 0xaf3   : > { %v2752_v36 = vmul.f32 %v2744_v42, %v2688_v13  ;;  %v3513_v13 = vld [vmem:[%s911_s17] ss:$0 sm:$0xff] }
 0xaf4   : > { %v2753_v10 = vmul.f32 %v2745_v55, %v2689_v30 }
 0xaf5   : > { %v2788_v14 = vpack.c.bf16 %v2752_v36, %v2750_v35 }
 0xaf6   : > { %v2789_v48 = vpack.c.bf16 %v2753_v10, %v2751_v37 }
 0xaf8   : > { %2933 = vmatprep.mubr.bf16.mxu1 %v2789_v48  ;;  %p3514_p1 = scmp.ne.s32.totalorder %s5676_s15, 1 }
 0xaf9   : > { %2934 = vmatmul.mubr.bf16.gmra.mrb[40].mxu1 %v2788_v14  ;;  %vm4534_vm7 = vmmov (!%p3514_p1), 0   ;;  %vm3023_vm8 = vcmask (!%p3514_p1), 1040384   ;;  %s5677_s21 = sld [smem:[#allocation45_spill]] (!%p3514_p1) }
 0xbc4   : > { %v3599_v45 = vpop.f32.mrb[36].mxu1 }
 0xbc5   : > { %v3600_v59 = vpop.f32.mrb[37].mxu1 }
 0xbc6   : > { %v3601_v2 = vadd.f32 %v3600_v59, %v3599_v45  ;;  %v3602_v23 = vpop.f32.mrb[38].mxu1 }
 0xbc7   : > { %v3603_v29 = vpop.f32.mrb[39].mxu1 }
 0xbc8   : > { %v2928_v38 = vadd.f32 %v3601_v2, %v3495_v62  ;;  %v3604_v46 = vadd.f32 %v3603_v29, %v3602_v23  ;;  %v4143_v2 = vld [vmem:[#allocation15] sm:$0xff] (!%p3514_p1)   ;;  %v4533_v23 = vmov (!%p3514_p1), 0.0   ;;  %v4144_v29 = vld [vmem:[#allocation15 + $0x8] sm:$0xff] (!%p3514_p1)  }
 0xbc9   : > { %3756 = vmatprep.subr.bf16.mxu0 (!%p3514_p1), %v4533_v23  ;;  %3772 = vmatprep.mubr.msk.bf16.mxu0 (!%p3514_p1), %vm4534_vm7, %v4533_v23 }
 0xbca   : > { %v2931_v47 = vadd.f32 %v3604_v46, %v3495_v62  ;;  %v2942_v49 = vadd.f32 %v2928_v38, %v5405_v40  ;;  %3757 = vmatpush3.bf16.msra.mxu0 (!%p3514_p1), %v4143_v2  ;;  %v4145_v38 = vld [vmem:[#allocation15 + $0x10] sm:$0xff] (!%p3514_p1)   ;;  %v4146_v46 = vld [vmem:[#allocation15 + $0x18] sm:$0xff] (!%p3514_p1)  }
 0xbcb   : > { %3758 = vmatprep.subr.bf16.mxu0 (!%p3514_p1), %v4533_v23 }
 0xbcc   : > { %v3605_v50 = vpop.f32.mrb[40].mxu1  ;;  %2948 = vadd.xlane.f32.xlu1 %v2942_v49  ;;  %v2943_v54 = vadd.f32 %v2931_v47, %v5407_v43  ;;  %v4147_v47 = vld [vmem:[#allocation15 + $0x20] sm:$0xff] (!%p3514_p1)  }
 0xbcd   : > { %v3606_v56 = vpop.f32.mrb[41].mxu1 }
 0xbce   : > { %v3607_v52 = vadd.f32 %v3606_v56, %v3605_v50  ;;  %v3608_v4 = vpop.f32.mrb[42].mxu1  ;;  %2950 = vadd.xlane.f32.xlu0 %v2943_v54  ;;  %3759 = vmatpush3.bf16.msra.mxu0 (!%p3514_p1), %v4144_v29  ;;  %v4149_v50 = vld [vmem:[#allocation15 + $0x30] sm:$0xff] (!%p3514_p1)   ;;  %v4150_v56 = vld [vmem:[#allocation15 + $0x38] sm:$0xff] (!%p3514_p1)  }
 0xbcf   : > { %v3609_v58 = vpop.f32.mrb[43].mxu1  ;;  %3760 = vmatprep.subr.bf16.mxu0 (!%p3514_p1), %v4533_v23 }
 0xbd0   : > { %v2936_v18 = vadd.f32 %v3607_v52, %v3495_v62  ;;  %v3610_v34 = vadd.f32 %v3609_v58, %v3608_v4  ;;  %v3515_v58 = vld [vmem:[%s5677_s21] ss:$0 sm:$0xff] (!%p3514_p1) }
 0xbd2   : > { %v2939_v41 = vadd.f32 %v3610_v34, %v3495_v62  ;;  %v2944_v32 = vadd.f32 %v2936_v18, %v5414_v21  ;;  %3761 = vmatpush3.bf16.msra.mxu0 (!%p3514_p1), %v4145_v38 }
 0xbd3   : > { %3762 = vmatprep.subr.bf16.mxu0 (!%p3514_p1), %v4533_v23 }
 0xbd4   : > { %2952 = vadd.xlane.f32.xlu1 %v2944_v32  ;;  %v2945_v31 = vadd.f32 %v2939_v41, %v5412_v33 }
 0xbd6   : > { %2954 = vadd.xlane.f32.xlu0 %v2945_v31  ;;  %3763 = vmatpush3.bf16.msra.mxu0 (!%p3514_p1), %v4146_v46 }
 0xbd7   : > { %3764 = vmatprep.subr.bf16.mxu0 (!%p3514_p1), %v4533_v23 }
 0xbda   : > { %3765 = vmatpush3.bf16.msra.mxu0 (!%p3514_p1), %v4147_v47 }
 0xbdb   : > { %3766 = vmatprep.subr.bf16.mxu0 (!%p3514_p1), %v4533_v23 }
 0xc59   : > { %v2949_v60 = vpop.xlane.xlu1 %2948 }
 0xc5a   : > { %v2956_v40 = vmul.f32 0.0078125, %v2949_v60 }
 0xc5b   : > { %v2951_v27 = vpop.xlane.xlu0 %2950 }
 0xc5c   : > { %v2960_v51 = vsub.f32 %v2942_v49, %v2956_v40  ;;  %v2957_v63 = vmul.f32 0.0078125, %v2951_v27  ;;  %v4148_v49 = vld [vmem:[#allocation15 + $0x28] sm:$0xff] (!%p3514_p1)  }
 0xc5d   : > { %3767 = vmatpush3.bf16.msra.mxu0 (!%p3514_p1), %v4148_v49 }
 0xc5e   : > { %v2961_v43 = vsub.f32 %v2943_v54, %v2957_v63  ;;  %v2964_v0 = vmul.f32 %v2960_v51, %v2960_v51  ;;  %3768 = vmatprep.subr.bf16.mxu0 (!%p3514_p1), %v4533_v23 }
 0xc60   : > { %2968 = vadd.xlane.f32.xlu1 %v2964_v0  ;;  %v2965_v1 = vmul.f32 %v2961_v43, %v2961_v43 }
 0xc61   : > { %v2953_v25 = vpop.xlane.xlu1 %2952  ;;  %3769 = vmatpush3.bf16.msra.mxu0 (!%p3514_p1), %v4149_v50 }
 0xc62   : > { %v2958_v6 = vmul.f32 0.0078125, %v2953_v25  ;;  %2970 = vadd.xlane.f32.xlu0 %v2965_v1  ;;  %3770 = vmatprep.subr.bf16.mxu0 (!%p3514_p1), %v4533_v23 }
 0xc63   : > { %v2955_v8 = vpop.xlane.xlu0 %2954 }
 0xc64   : > { %v2962_v12 = vsub.f32 %v2944_v32, %v2958_v6  ;;  %v2959_v39 = vmul.f32 0.0078125, %v2955_v8 }
 0xc65   : > { %3771 = vmatpush3.bf16.msra.mxu0 (!%p3514_p1), %v4150_v56 }
 0xc66   : > { %v2963_v21 = vsub.f32 %v2945_v31, %v2959_v39  ;;  %v2966_v15 = vmul.f32 %v2962_v12, %v2962_v12 }
 0xc68   : > { %2972 = vadd.xlane.f32.xlu1 %v2966_v15  ;;  %v2967_v33 = vmul.f32 %v2963_v21, %v2963_v21 }
 0xc6a   : > { %2974 = vadd.xlane.f32.xlu0 %v2967_v33 }
 0xced   : > { %v2969_v5 = vpop.xlane.xlu1 %2968 }
 0xcee   : > { %v2976_v20 = vmul.f32 0.0078125, %v2969_v5 }
 0xcef   : > { %v2971_v19 = vpop.xlane.xlu0 %2970 }
 0xcf0   : > { %v2980_v22 = vadd.f32 1e-12, %v2976_v20  ;;  %v2977_v9 = vmul.f32 0.0078125, %v2971_v19 }
 0xcf2   : > { %4131 = vrsqrt.f32 %v2980_v22  ;;  %v2981_v61 = vadd.f32 1e-12, %v2977_v9 }
 0xcf4   : > { %4133 = vrsqrt.f32 %v2981_v61 }
 0xcf5   : > { %v2973_v3 = vpop.xlane.xlu1 %2972 }
 0xcf6   : > { %v2978_v44 = vmul.f32 0.0078125, %v2973_v3 }
 0xcf7   : > { %v2975_v16 = vpop.xlane.xlu0 %2974 }
 0xcf8   : > { %v2982_v17 = vadd.f32 1e-12, %v2978_v44  ;;  %v2979_v53 = vmul.f32 0.0078125, %v2975_v16 }
 0xcfa   : > { %4135 = vrsqrt.f32 %v2982_v17  ;;  %v2983_v24 = vadd.f32 1e-12, %v2979_v53 }
 0xcfc   : > { %v4132_v26 = vpop.eup %4131  ;;  %4137 = vrsqrt.f32 %v2983_v24 }
 0xcfd   : > { %v2988_v28 = vmul.f32 %v4132_v26, %v2960_v51 }
 0xcfe   : > { %v4134_v11 = vpop.eup %4133 }
 0xcff   : > { %v2998_v42 = vmul.f32 %v3512_v7, %v2988_v28  ;;  %v2989_v57 = vmul.f32 %v4134_v11, %v2961_v43 }
 0xd01   : > { %v3008_v30 = vadd.f32 %v3513_v13, %v2998_v42  ;;  %v2999_v55 = vmul.f32 %v3512_v7, %v2989_v57 }
 0xd03   : > { %3012 = vst [vmem:[#allocation2] sm:$0xff] %v3008_v30  ;;  %v3009_v35 = vadd.f32 %v3513_v13, %v2999_v55 }
 0xd04   : > { %v4136_v36 = vpop.eup %4135 }
 0xd05   : > { %3013 = vst [vmem:[#allocation2 + $0x8] sm:$0xff] %v3009_v35  ;;  %v2990_v37 = vmul.f32 %v4136_v36, %v2962_v12 }
 0xd06   : > { %v4138_v10 = vpop.eup %4137 }
 0xd07   : > { %v3000_v14 = vmul.f32 %v3512_v7, %v2990_v37  ;;  %v2991_v48 = vmul.f32 %v4138_v10, %v2963_v21  ;;  %3019 = sbr.rel (%p3514_p1) target bundleno = 3559 (0xde7), region = 136 }
 0xd09   : > { %v3010_v45 = vadd.f32 %v3513_v13, %v3000_v14  ;;  %v3001_v62 = vmul.f32 %v3512_v7, %v2991_v48 }
 0xd0b   : > { %3014 = vst [vmem:[#allocation2 + $0x10] sm:$0xff] %v3010_v45  ;;  %v3011_v59 = vadd.f32 %v3513_v13, %v3001_v62  ;;  %v3021_v54 = vrot.slane (!%p3514_p1), %v3010_v45, 7 }
 0xd0d   : > { %3015 = vst [vmem:[#allocation2 + $0x18] sm:$0xff] %v3011_v59  ;;  %v3024_v52 = vsel (!%p3514_p1), %vm3023_vm8, %v3008_v30, %v3021_v54 }
 0xd0e   : > { %v3041_v4 = vpack.c.bf16 %v3024_v52, %v3024_v52 }
 0xd10   : > { %3773 = vmatmul.mubr.bf16.vlgmr.msra.gmra.mrb[0].mxu0 %v3041_v4 }
 0xde3   : > { %v3131_v18 = vpop.f32.mrb[0].mxu0 }
 0xde4   : > { %v3132_v34 = vadd.f32 %v3515_v58, %v3131_v18  ;;  %v3774_v41 = vpop.f32.mrb[1].mxu0 }
 0xde5   : > { %v3134_v32 = vpop.f32.mrb[2].mxu0 }
 0xde6   : > { %3137 = vst [vmem:[#allocation16] sm:$0x3] %v3132_v34  ;;  %v3775_v31 = vpop.f32.mrb[3].mxu0 }
 0xde7 PF: > { %p3852_p7 = scmp.eq.s32.totalorder %s4660_s1, 1  ;;  %s4535_s17 = smov [#allocation16]  }
 0xde8   : > { %s3147_s3 = sshll.u32 %s4535_s17, 4  ;;  %s3148_s3 = int_to_ptr.vmem [resolvable:$true] %s3147_s3 }
 0xde9   : > { %s4411_s10 = scalar_lea.vmem %s3148_s3, 32  ;;  %p4418_p3 = scmp.lt.s32.totalorder %s3148_s3, %s3148_s3 }
 0xdea   : > { %p4412_p9 = scmp.ne.s32.totalorder %s3148_s3, %s4411_s10  ;;  %p4419_p5 = scmp.lt.s32.totalorder %s4411_s10, %s4411_s10 }
 0xdec   : > { %p4413_p12 = pnand %p4412_p9, %p3852_p7  ;;  %p4420_p8 = por %p4419_p5, %p4418_p3 }
 0xdee   : > { %p4414_p11 = pneg %p4413_p12 }
 0xdf0   : > { %p4421_p4 = pnand %p4420_p8, %p4414_p11 }
 0xdf2   : > { %4424 = shalt.err (!%p4421_p4)
}
 0xdf3   : > { %s5678_s19 = sld [smem:[#allocation46_spill]] }
 0xdf9   : > { %s5679_s6 = smov %s5678_s19  ;;  %s4425_s8 = scalar_lea.hbm %s5678_s19, 32 }
 0xdfa   : > { %p4426_p10 = scmp.ne.s32.totalorder %s5679_s6, %s4425_s8  ;;  %p4431_p0 = scmp.lt.u32.totalorder %s4425_s8, %s5679_s6 }
 0xdfc   : > { %p4427_p13 = pnand %p4426_p10, %p3852_p7 }
 0xdfe   : > { %p4428_p2 = pneg %p4427_p13 }
 0xe00   : > { %p4433_p6 = pnand %p4431_p0, %p4428_p2 }
 0xe02   : > { %4436 = shalt.err (!%p4433_p6)
}
 0xe03   : > { %3809 = dma.vmem_to_hbm [thread:$0]  (%p3852_p7), %s3148_s3, 32, %s5679_s6, [#allocation5]  }
 0xe04   : > { %4482 = dma.done.wait (%p3852_p7), [#allocation5], 32  }
 0xe05   : > { %4484 = vsyncadd (%p3852_p7), [#allocation5], 4294967264 }
 0xe06 PF: > { %s5680_s27 = sld [smem:[#allocation25_spill]]  ;;  %s5681_s24 = sld [smem:[#allocation23_spill]] }
 0xe07   : > { %s5682_s29 = sld [smem:[#allocation27_spill]]  ;;  %s5683_s9 = sld [smem:[#allocation26_spill]] }
 0xe08   : > { %s5686_s30 = smov %s4503_s0 }
 0xe0c   : > { %s32_s19 = sadd.s32 1, %s5680_s27   ;;  %s5684_s27 = smov %s4491_s28 }
 0xe0d   : > { %p29_p1 = scmp.ge.s32.totalorder %s32_s19, 4   ;;  %s5685_s28 = smov %s5681_s24 }
 0xe0e   : > { %s5687_s0 = smov %s5683_s9 }
 0xe0f   :  { %31 = sbr.rel (!%p29_p1) target bundleno = 26 (0x1a), region = 217 }
 0xe16   :  { %3160 = vsyncpa [#allocation4], 1 }
 0xe17   :  { %3162 = vsyncpa [#allocation4 + $0x1], 1 }
 0xe18   :  { %3163 = vsyncpa [#allocation7], 1 }
 0xe19   :  { %3164 = vsyncpa [#allocation10], 1 }
 0xe1a   :  { %3165 = vsyncpa [#allocation5], 1 }
 0xe1b   :  { %3167 = vsyncpa [#allocation5 + $0x1], 1 }

</bundles_post_ra>
